<compile_context>
chip_gen: v6e
topology: v6e:2x2x1
jax: 0.10.0
libtpu: 0.0.40
codegen_flags: <defaults>
</compile_context>

<pallas_src>
from functools import partial

import jax
import jax.numpy as jnp
from jax.experimental import pallas as pl
from jax.experimental.pallas import tpu as pltpu


FEAT256_DIM = 256   # nn.Linear(backbone_out_channels, 256)


def _round_up(x, m):
    return (x + m - 1) // m * m


def _pad_rows(x, n_pad):
    n = x.shape[0]
    if n == n_pad:
        return x
    pad = [(0, n_pad - n)] + [(0, 0)] * (x.ndim - 1)
    return jnp.pad(x, pad)


# --------------------------------------------------------------------------- #
# Kernel 1: fused per-point heads + loss epilogues (single lane-dense output)
# --------------------------------------------------------------------------- #
def _fused_heads_kernel(feat_ref, w_ref, b_ref, gt_ref, valid_ref, label_ref,
                        main_ref, *, c256, n_cls):
    # MXU matmul: bf16 inputs, f32 accumulation.
    y = jnp.dot(feat_ref[...], w_ref[...],
                preferred_element_type=jnp.float32) + b_ref[...]

    logits = y[:, c256:c256 + n_cls]                         # (tm, n_cls)
    off = y[:, c256 + n_cls:c256 + n_cls + 3]                # (tm, 3)

    # --- offset L1 distance, masked by validity (epilogue, stays in VMEM) ---
    dist = jnp.sum(jnp.abs(off - gt_ref[...]), axis=-1, keepdims=True)
    dist = dist * valid_ref[...]                             # (tm, 1)

    # --- per-point cross entropy with ignore_index = -1 ---
    labels = label_ref[...]                                  # (tm, 1) int32
    m = jnp.max(logits, axis=-1, keepdims=True)
    lse = m + jnp.log(jnp.sum(jnp.exp(logits - m), axis=-1, keepdims=True))
    cls_ids = jax.lax.broadcasted_iota(jnp.int32, logits.shape, 1)
    onehot = (cls_ids == labels).astype(jnp.float32)
    tgt = jnp.sum(logits * onehot, axis=-1, keepdims=True)
    valid_lbl = (labels >= 0).astype(jnp.float32)
    ce = (lse - tgt) * valid_lbl                             # (tm, 1)

    # Pack dist / ce into spare (zero-padded) lanes of the single output slab:
    # one lane-dense store stream, no extra masked (tm, 2) output.
    c_aux = c256 + n_cls + 3
    col = jax.lax.broadcasted_iota(jnp.int32, y.shape, 1)
    y = jnp.where(col == c_aux, dist, y)
    y = jnp.where(col == c_aux + 1, ce, y)
    main_ref[...] = y


def fused_heads(feat, w_all, b_all, gt_off, valid_f, labels, n_cls, tile_m=512):
    """Single pallas_call: fused matmul over all per-point heads + loss epilogues."""
    n, cin = feat.shape
    cout = w_all.shape[1]                                    # multiple of 128
    tile_m = min(tile_m, _round_up(n, 8))
    n_pad = _round_up(n, tile_m)

    feat_p = _pad_rows(feat, n_pad).astype(jnp.bfloat16)
    gt_p = _pad_rows(gt_off, n_pad)
    valid_p = _pad_rows(valid_f, n_pad)
    lbl_p = _pad_rows(labels, n_pad)

    kernel = partial(_fused_heads_kernel, c256=FEAT256_DIM, n_cls=n_cls)
    main = pl.pallas_call(
        kernel,
        out_shape=jax.ShapeDtypeStruct((n_pad, cout), jnp.float32),
        grid=(n_pad // tile_m,),
        in_specs=[
            pl.BlockSpec((tile_m, cin), lambda i: (i, 0)),
            pl.BlockSpec((cin, cout), lambda i: (0, 0)),
            pl.BlockSpec((1, cout), lambda i: (0, 0)),
            pl.BlockSpec((tile_m, 3), lambda i: (i, 0)),
            pl.BlockSpec((tile_m, 1), lambda i: (i, 0)),
            pl.BlockSpec((tile_m, 1), lambda i: (i, 0)),
        ],
        out_specs=pl.BlockSpec((tile_m, cout), lambda i: (i, 0)),
        compiler_params=pltpu.CompilerParams(
            dimension_semantics=("parallel",)),
    )(feat_p, w_all.astype(jnp.bfloat16), b_all.reshape(1, cout),
      gt_p, valid_p, lbl_p)
    return main[:n]


# --------------------------------------------------------------------------- #
# Kernel 2: both distillation cosine similarities in one row-tiled kernel
# --------------------------------------------------------------------------- #
def _pair_cosine_kernel(sam_ref, fpair_ref, ilog_ref, plog_ref, o_ref):
    def _cos(a, b):
        dot = jnp.sum(a * b, axis=-1, keepdims=True)
        na = jnp.sqrt(jnp.sum(a * a, axis=-1, keepdims=True))
        nb = jnp.sqrt(jnp.sum(b * b, axis=-1, keepdims=True))
        # F.cosine_similarity semantics: clamp EACH norm at eps
        return dot / (jnp.maximum(na, 1e-8) * jnp.maximum(nb, 1e-8))

    cf = _cos(sam_ref[...], fpair_ref[...])       # feature distillation
    cl = _cos(ilog_ref[...], plog_ref[...])       # logits distillation
    col = jax.lax.broadcasted_iota(jnp.int32, (cf.shape[0], 2), 1)
    o_ref[...] = jnp.where(col == 0, cf, cl)      # col0 = cos_fea, col1 = cos_logits


def pallas_pair_cosine(sam, feat_pair, img_logits, logit_pair, tile_p=512):
    p, c_fea = sam.shape
    c_log = img_logits.shape[1]
    tile_p = min(tile_p, _round_up(p, 8))
    p_pad = _round_up(p, tile_p)

    out = pl.pallas_call(
        _pair_cosine_kernel,
        out_shape=jax.ShapeDtypeStruct((p_pad, 2), jnp.float32),
        grid=(p_pad // tile_p,),
        in_specs=[
            pl.BlockSpec((tile_p, c_fea), lambda i: (i, 0)),
            pl.BlockSpec((tile_p, c_fea), lambda i: (i, 0)),
            pl.BlockSpec((tile_p, c_log), lambda i: (i, 0)),
            pl.BlockSpec((tile_p, c_log), lambda i: (i, 0)),
        ],
        out_specs=pl.BlockSpec((tile_p, 2), lambda i: (i, 0)),
        compiler_params=pltpu.CompilerParams(
            dimension_semantics=("parallel",)),
    )(_pad_rows(sam, p_pad), _pad_rows(feat_pair, p_pad),
      _pad_rows(img_logits, p_pad), _pad_rows(logit_pair, p_pad))
    return out[:p]


# --------------------------------------------------------------------------- #
# Forward pass (mirrors MultiSpaceTraining.forward, training=True, 'nuScenes')
# --------------------------------------------------------------------------- #
def multi_space_training_forward(params, data):
    feat = data["feat"]                                      # backbone output [N, 96]
    n = feat.shape[0]
    n_cls = params["text_embeddings_nu"].shape[0]

    # Fold proj_head + text-embedding 1x1 conv into a single 96 x n_cls weight,
    # and concatenate all per-point heads into one lane-dense fused weight.
    w_seg = params["w_proj"] @ params["text_embeddings_nu"].T        # (96, C)
    b_seg = params["b_proj"] @ params["text_embeddings_nu"].T        # (C,)
    w_all = jnp.concatenate([params["w_feat256"], w_seg, params["w_off"]], axis=1)
    b_all = jnp.concatenate([params["b_feat256"], b_seg, params["b_off"]])
    # +2 spare lanes so the kernel can stash per-point dist / ce in the padding columns.
    cout_pad = _round_up(w_all.shape[1] + 2, 128)
    w_all = jnp.pad(w_all, ((0, 0), (0, cout_pad - w_all.shape[1])))
    b_all = jnp.pad(b_all, (0, cout_pad - b_all.shape[0]))

    valid_f = data["valid"].astype(jnp.float32).reshape(n, 1)
    labels = data["segment"].astype(jnp.int32).reshape(n, 1)

    main = fused_heads(feat, w_all, b_all, data["gt_off"], valid_f, labels, n_cls)
    c_aux = FEAT256_DIM + n_cls + 3
    feat_256c = main[:, :FEAT256_DIM]                                 # [N, 256]
    seg_logits = main[:, FEAT256_DIM:FEAT256_DIM + n_cls]             # [N, C]
    dist = main[:, c_aux]                                             # |off - gt|_1 * valid
    ce = main[:, c_aux + 1]                                           # per-point CE

    # ----- instance (offset) loss, per batch element, then averaged -----
    batch_index = data["batch_index"]                                 # python ints
    seg_losses = []
    for i in range(len(batch_index) - 1):
        s, e = batch_index[i], batch_index[i + 1]
        seg_losses.append(jnp.sum(dist[s:e]) / (jnp.sum(valid_f[s:e, 0]) + 1e-6))
    loss_ins = jnp.mean(jnp.stack(seg_losses))

    # ----- feature / logits distillation losses (one fused cosine kernel) -----
    pairing_points = data["pairing_points"]
    feat_pair = jnp.take(feat_256c, pairing_points, axis=0)           # glue gather (XLA)
    logit_pair = jnp.take(seg_logits, pairing_points, axis=0)
    # F.normalize before cosine dropped: cosine similarity is scale-invariant.
    cos = pallas_pair_cosine(data["sam_features"], feat_pair,
                             data["img_logits"], logit_pair)
    loss_fea = jnp.mean(1.0 - cos[:, 0])
    loss_logits = jnp.mean(1.0 - cos[:, 1])

    # ----- criteria: CrossEntropyLoss(ignore_index=-1, reduction='mean') -----
    valid_lbl = (data["segment"] >= 0).astype(jnp.float32)
    loss_ce = jnp.sum(ce) / jnp.maximum(jnp.sum(valid_lbl), 1.0)

    loss = loss_ce + loss_fea + loss_ins + loss_logits
    return dict(loss=loss, seg_logits=seg_logits)


# --------------------------------------------------------------------------- #
# Deterministic parameter / input construction and run
# --------------------------------------------------------------------------- #
def make_params(key, backbone_out_channels=96, proj_channels=512,
                feat256_channels=256, num_classes=16):
    ks = jax.random.split(key, 8)
    s = lambda cin: 1.0 / jnp.sqrt(cin)
    return {
        "w_feat256": jax.random.normal(ks[0], (backbone_out_channels, feat256_channels),
                                       jnp.float32) * s(backbone_out_channels),
        "b_feat256": jax.random.normal(ks[1], (feat256_channels,), jnp.float32) * 0.01,
        "w_proj": jax.random.normal(ks[2], (backbone_out_channels, proj_channels),
                                    jnp.float32) * s(backbone_out_channels),
        "b_proj": jax.random.normal(ks[3], (proj_channels,), jnp.float32) * 0.01,
        "w_off": jax.random.normal(ks[4], (backbone_out_channels, 3),
                                   jnp.float32) * s(backbone_out_channels),
        "b_off": jnp.zeros((3,), jnp.float32),
        # registered buffer text_embeddings_nu (CLIP ViT16 text prompts) -> synthetic
        "text_embeddings_nu": jax.random.normal(ks[5], (num_classes, proj_channels),
                                                jnp.float32) * 0.05,
    }


def make_data(key, n_points=256, backbone_out_channels=96, num_classes=16, n_pair=64):
    ks = jax.random.split(key, 8)
    return {
        "feat": jax.random.normal(ks[0], (n_points, backbone_out_channels), jnp.float32),
        "gt_off": jax.random.normal(ks[1], (n_points, 3), jnp.float32),
        "valid": (jax.random.uniform(ks[2], (n_points,)) > 0.3),
        "batch_index": [0, n_points // 2, n_points],
        "pairing_points": jax.random.randint(ks[3], (n_pair,), 0, n_points),
        "sam_features": jax.random.normal(ks[4], (n_pair, 256), jnp.float32),
        "img_logits": jax.random.normal(ks[5], (n_pair, num_classes), jnp.float32),
        "segment": jax.random.randint(ks[6], (n_points,), 0, num_classes),
        "condition": "nuScenes",
    }


if __name__ == "__main__":
    key = jax.random.PRNGKey(0)
    k_param, k_data = jax.random.split(key)
    params = make_params(k_param)
    data = make_data(k_data)

    out = multi_space_training_forward(params, data)
    jax.block_until_ready(out["loss"])
    jax.block_until_ready(out["seg_logits"])
    assert out["seg_logits"].shape == (256, 16)
    assert jnp.isfinite(out["loss"])
    print("KERNEL_OK")
</pallas_src>

<mosaic_0001>
module attributes {stable_mosaic.version = 11 : i64} {
  func.func @_fused_heads_kernel(%arg0: i32, %arg1: memref<256x96xbf16, #tpu.memory_space<vmem>>, %arg2: memref<96x384xbf16, #tpu.memory_space<vmem>>, %arg3: memref<1x384xf32, #tpu.memory_space<vmem>>, %arg4: memref<256x3xf32, #tpu.memory_space<vmem>>, %arg5: memref<256x1xf32, #tpu.memory_space<vmem>>, %arg6: memref<256x1xi32, #tpu.memory_space<vmem>>, %arg7: memref<256x384xf32, #tpu.memory_space<vmem>>) attributes {dimension_semantics = [#tpu.dimension_semantics<parallel>], iteration_bounds = array<i64: 1>, scalar_prefetch = 0 : i64, scratch_operands = 0 : i64, tpu.core_type = #tpu.core_type<tc>, window_params = [{transform_indices = @transform_0, window_bounds = array<i64: 256, 96>}, {pipeline_mode = #tpu.pipeline_mode<synchronous>, transform_indices = @transform_1, window_bounds = array<i64: 96, 384>}, {pipeline_mode = #tpu.pipeline_mode<synchronous>, transform_indices = @transform_2, window_bounds = array<i64: 1, 384>}, {transform_indices = @transform_3, window_bounds = array<i64: 256, 3>}, {transform_indices = @transform_4, window_bounds = array<i64: 256, 1>}, {transform_indices = @transform_5, window_bounds = array<i64: 256, 1>}, {transform_indices = @transform_6, window_bounds = array<i64: 256, 384>}]} {
    %c0 = arith.constant 0 : index
    %c0_0 = arith.constant 0 : index
    %0 = vector.load %arg1[%c0, %c0_0] : memref<256x96xbf16, #tpu.memory_space<vmem>>, vector<256x96xbf16>
    %c0_1 = arith.constant 0 : index
    %c0_2 = arith.constant 0 : index
    %1 = vector.load %arg2[%c0_1, %c0_2] : memref<96x384xbf16, #tpu.memory_space<vmem>>, vector<96x384xbf16>
    %cst = arith.constant dense<0.000000e+00> : vector<256x384xf32>
    %2 = tpu.matmul %0, %1, %cst {dimension_numbers = #tpu.dot_dimension_numbers<[1], [0], [0], [1], [0, 0, 1, 1], [], []>} : vector<256x96xbf16>, vector<96x384xbf16>, vector<256x384xf32> -> vector<256x384xf32>
    %c0_3 = arith.constant 0 : index
    %c0_4 = arith.constant 0 : index
    %3 = vector.load %arg3[%c0_3, %c0_4] : memref<1x384xf32, #tpu.memory_space<vmem>>, vector<1x384xf32>
    %4 = vector.broadcast %3 : vector<1x384xf32> to vector<256x384xf32>
    %5 = arith.addf %2, %4 : vector<256x384xf32>
    %6 = vector.extract_strided_slice %5 {offsets = [0, 256], sizes = [256, 16], strides = [1, 1]} : vector<256x384xf32> to vector<256x16xf32>
    %7 = vector.extract_strided_slice %5 {offsets = [0, 272], sizes = [256, 3], strides = [1, 1]} : vector<256x384xf32> to vector<256x3xf32>
    %c0_5 = arith.constant 0 : index
    %c0_6 = arith.constant 0 : index
    %8 = vector.load %arg4[%c0_5, %c0_6] : memref<256x3xf32, #tpu.memory_space<vmem>>, vector<256x3xf32>
    %9 = arith.subf %7, %8 : vector<256x3xf32>
    %10 = math.absf %9 : vector<256x3xf32>
    %cst_7 = arith.constant dense<0.000000e+00> : vector<256xf32>
    %11 = vector.multi_reduction <add>, %10, %cst_7 [1] : vector<256x3xf32> to vector<256xf32>
    %12 = vector.shape_cast %11 : vector<256xf32> to vector<256x1xf32>
    %c0_8 = arith.constant 0 : index
    %c0_9 = arith.constant 0 : index
    %13 = vector.load %arg5[%c0_8, %c0_9] : memref<256x1xf32, #tpu.memory_space<vmem>>, vector<256x1xf32>
    %14 = arith.mulf %12, %13 : vector<256x1xf32>
    %c0_10 = arith.constant 0 : index
    %c0_11 = arith.constant 0 : index
    %15 = vector.load %arg6[%c0_10, %c0_11] : memref<256x1xi32, #tpu.memory_space<vmem>>, vector<256x1xi32>
    %cst_12 = arith.constant dense<0xFF800000> : vector<256xf32>
    %16 = vector.multi_reduction <maximumf>, %6, %cst_12 [1] : vector<256x16xf32> to vector<256xf32>
    %17 = vector.shape_cast %16 : vector<256xf32> to vector<256x1xf32>
    %18 = vector.broadcast %17 : vector<256x1xf32> to vector<256x16xf32>
    %19 = arith.subf %6, %18 : vector<256x16xf32>
    %20 = math.exp %19 : vector<256x16xf32>
    %cst_13 = arith.constant dense<0.000000e+00> : vector<256xf32>
    %21 = vector.multi_reduction <add>, %20, %cst_13 [1] : vector<256x16xf32> to vector<256xf32>
    %22 = vector.shape_cast %21 : vector<256xf32> to vector<256x1xf32>
    %23 = math.log %22 : vector<256x1xf32>
    %24 = arith.addf %17, %23 : vector<256x1xf32>
    %25 = tpu.iota {dimensions = array<i32: 1>} : vector<256x16xi32>
    %26 = vector.broadcast %15 : vector<256x1xi32> to vector<256x16xi32>
    %27 = arith.cmpi eq, %25, %26 : vector<256x16xi32>
    %28 = arith.extui %27 : vector<256x16xi1> to vector<256x16xi32>
    %29 = arith.sitofp %28 : vector<256x16xi32> to vector<256x16xf32>
    %30 = arith.mulf %6, %29 : vector<256x16xf32>
    %cst_14 = arith.constant dense<0.000000e+00> : vector<256xf32>
    %31 = vector.multi_reduction <add>, %30, %cst_14 [1] : vector<256x16xf32> to vector<256xf32>
    %32 = vector.shape_cast %31 : vector<256xf32> to vector<256x1xf32>
    %c0_i32 = arith.constant 0 : i32
    %33 = vector.broadcast %c0_i32 : i32 to vector<256x1xi32>
    %34 = arith.cmpi sge, %15, %33 : vector<256x1xi32>
    %35 = arith.extui %34 : vector<256x1xi1> to vector<256x1xi32>
    %36 = arith.sitofp %35 : vector<256x1xi32> to vector<256x1xf32>
    %37 = arith.subf %24, %32 : vector<256x1xf32>
    %38 = arith.mulf %37, %36 : vector<256x1xf32>
    %39 = tpu.iota {dimensions = array<i32: 1>} : vector<256x384xi32>
    %c275_i32 = arith.constant 275 : i32
    %40 = vector.broadcast %c275_i32 : i32 to vector<256x384xi32>
    %41 = arith.cmpi eq, %39, %40 : vector<256x384xi32>
    %42 = vector.shape_cast %14 : vector<256x1xf32> to vector<256x1xf32>
    %43 = vector.broadcast %42 : vector<256x1xf32> to vector<256x384xf32>
    %44 = arith.select %41, %43, %5 : vector<256x384xi1>, vector<256x384xf32>
    %c276_i32 = arith.constant 276 : i32
    %45 = vector.broadcast %c276_i32 : i32 to vector<256x384xi32>
    %46 = arith.cmpi eq, %39, %45 : vector<256x384xi32>
    %47 = vector.shape_cast %38 : vector<256x1xf32> to vector<256x1xf32>
    %48 = vector.broadcast %47 : vector<256x1xf32> to vector<256x384xf32>
    %49 = arith.select %46, %48, %44 : vector<256x384xi1>, vector<256x384xf32>
    %c0_15 = arith.constant 0 : index
    %c0_16 = arith.constant 0 : index
    %50 = vector.load %arg7[%c0_15, %c0_16] : memref<256x384xf32, #tpu.memory_space<vmem>>, vector<256x384xf32>
    tpu.vector_store %arg7[%c0_15, %c0_16], %49 {strides = array<i32>} : memref<256x384xf32, #tpu.memory_space<vmem>>, vector<256x384xf32>,
    return
  }
  func.func @transform_0(%arg0: i32) -> (i32, i32) {
    %c0_i32 = arith.constant 0 : i32
    %c0_i32_0 = arith.constant 0 : i32
    return %arg0, %c0_i32 : i32, i32
  }
  func.func @transform_1(%arg0: i32) -> (i32, i32) {
    %c0_i32 = arith.constant 0 : i32
    %c0_i32_0 = arith.constant 0 : i32
    %c0_i32_1 = arith.constant 0 : i32
    return %c0_i32, %c0_i32_0 : i32, i32
  }
  func.func @transform_2(%arg0: i32) -> (i32, i32) {
    %c0_i32 = arith.constant 0 : i32
    %c0_i32_0 = arith.constant 0 : i32
    %c0_i32_1 = arith.constant 0 : i32
    return %c0_i32, %c0_i32_0 : i32, i32
  }
  func.func @transform_3(%arg0: i32) -> (i32, i32) {
    %c0_i32 = arith.constant 0 : i32
    %c0_i32_0 = arith.constant 0 : i32
    return %arg0, %c0_i32 : i32, i32
  }
  func.func @transform_4(%arg0: i32) -> (i32, i32) {
    %c0_i32 = arith.constant 0 : i32
    %c0_i32_0 = arith.constant 0 : i32
    return %arg0, %c0_i32 : i32, i32
  }
  func.func @transform_5(%arg0: i32) -> (i32, i32) {
    %c0_i32 = arith.constant 0 : i32
    %c0_i32_0 = arith.constant 0 : i32
    return %arg0, %c0_i32 : i32, i32
  }
  func.func @transform_6(%arg0: i32) -> (i32, i32) {
    %c0_i32 = arith.constant 0 : i32
    %c0_i32_0 = arith.constant 0 : i32
    return %arg0, %c0_i32 : i32, i32
  }
}

</mosaic_0001>

<bundles_post_ra>
// kernel: tpu_custom_call.1
= control target key start
LH: loop header
LB: loop body
LE: loop exit
PB: predicated region body
PF: predicated region fallthrough
CT: control target
= control target key end

     0   :  { %v3160_v2 = vmov 0   ;;  %s3161_s13 = smov 16   ;;  %vm274_vm0 = vcmask 785408   ;;  %s5155_s0 = inlined_call_operand.vmem [shape: bf16[256,96], index: 0, kind: input, shape index: {}]   ;;  %s5156_s1 = inlined_call_operand.vmem [shape: bf16[96,384], index: 1, kind: input, shape index: {}]   ;;  %s5157_s2 = inlined_call_operand.vmem [shape: f32[1,384], index: 2, kind: input, shape index: {}]   ;;  %s5158_s3 = inlined_call_operand.vmem [shape: f32[256,3], index: 3, kind: input, shape index: {}]   ;;  %s5159_s4 = inlined_call_operand.vmem [shape: f32[256,1], index: 4, kind: input, shape index: {}]   ;;  %s5160_s5 = inlined_call_operand.vmem [shape: s32[256,1], index: 5, kind: input, shape index: {}]   ;;  %s5161_s6 = inlined_call_operand.hbm [shape: f32[256,384], index: 6, kind: output, shape index: {}]  }
   0x1   :  { %v2938_v0 = vld [vmem:[%s5156_s1 + $0x7c] ss:$12 sps:$4 sm:$0xff]   ;;  %v2940_v1 = vld [vmem:[%s5156_s1 + $0x78] ss:$12 sps:$4 sm:$0xff]   ;;  %475 = vmatprep.mubr.bf16.mxu1 %v3160_v2  ;;  %2936 = vset.pattern.permute.xlu1 %v3160_v2  ;;  %v2943_v4 = vld [vmem:[%s5156_s1 + $0x60] ss:$12 sps:$4 sm:$0xff]  }
   0x2   :  { %2917 = vmatprep.subr.bf16.mxu1 %v2938_v0  ;;  %v2941_v3 = vld [vmem:[%s5156_s1 + $0x64] ss:$12 sps:$4 sm:$0xff]   ;;  %2937 = vset.pattern.permute.xlu0 %v3160_v2  ;;  %v2944_v5 = vld [vmem:[%s5156_s1 + $0x4c] ss:$12 sps:$4 sm:$0xff]   ;;  %v2946_v6 = vld [vmem:[%s5156_s1 + $0x48] ss:$12 sps:$4 sm:$0xff]  }
   0x3   :  { %2923 = vmatpush1.bf16.msra.mxu1 %v2940_v1  ;;  %327 = vmatprep.subr.bf16.mxu0 %v2938_v0  ;;  %v2947_v7 = vld [vmem:[%s5156_s1 + $0x34] ss:$12 sps:$4 sm:$0xff]   ;;  %v680_v9 = vld [vmem:[%s5158_s3 + $0x18] sm:$0xff]  ;;  %v682_v12 = vld [vmem:[%s5158_s3 + $0x28] sm:$0xff] }
   0x4   :  { %2918 = vmatprep.subr.bf16.mxu1 %v2941_v3  ;;  %328 = vmatpush1.bf16.msra.mxu0 %v2940_v1  ;;  %v679_v8 = vld [vmem:[%s5158_s3 + $0x10] sm:$0xff]  ;;  %v2950_v11 = vld [vmem:[%s5156_s1 + $0x1c] ss:$12 sps:$4 sm:$0xff]   ;;  %v2952_v13 = vld [vmem:[%s5156_s1 + $0x18] ss:$12 sps:$4 sm:$0xff]  }
   0x5   :  { %329 = vmatprep.subr.bf16.mxu0 %v2941_v3  ;;  %355 = vmatprep.mubr.bf16.mxu0 %v3160_v2  ;;  %v2949_v10 = vld [vmem:[%s5156_s1 + $0x30] ss:$12 sps:$4 sm:$0xff]   ;;  %v2955_v16 = vld [vmem:[%s5156_s1] ss:$12 sps:$4 sm:$0xff]   ;;  %v2958_v20 = vld [vmem:[%s5156_s1 + $0x68] ss:$12 sps:$4 sm:$0xff]  }
   0x6   :  { %745 = vrot.lane.b32.xlu1 %v679_v8, %s3161_s13  ;;  %v2953_v14 = vld [vmem:[%s5156_s1 + $0x4] ss:$12 sps:$4 sm:$0xff]   ;;  %v684_v15 = vld [vmem:[%s5158_s3 + $0x38] sm:$0xff]  ;;  %v2957_v17 = vld [vmem:[%s5156_s1 + $0x80] ss:$12 sps:$4 sm:$0xff]  }
   0x7   :  { %2924 = vmatpush1.bf16.msra.mxu1 %v2943_v4  ;;  %v3263_v18 = vld [vmem:[%s5155_s0 + $0x60] sm:$0xff]   ;;  %v686_v19 = vld [vmem:[%s5158_s3 + $0x48] sm:$0xff]  ;;  %v688_v21 = vld [vmem:[%s5158_s3 + $0x58] sm:$0xff] }
   0x8   :  { %2919 = vmatprep.subr.bf16.mxu1 %v2944_v5  ;;  %330 = vmatpush1.bf16.msra.mxu0 %v2943_v4  ;;  %v677_v22 = vld [vmem:[%s5158_s3] sm:$0xff]  ;;  %v2960_v24 = vld [vmem:[%s5156_s1 + $0x50] ss:$12 sps:$4 sm:$0xff]   ;;  %v3292_v25 = vld [vmem:[%s5155_s0 + $0x68] sm:$0xff]  }
   0x9   :  { %331 = vmatprep.subr.bf16.mxu0 %v2944_v5  ;;  %v2966_v23 = vld [vmem:[%s5155_s0] sm:$0xff]   ;;  %741 = vrot.lane.b32.xlu0 %v677_v22, %s3161_s13  ;;  %v678_v26 = vld [vmem:[%s5158_s3 + $0x8] sm:$0xff]  ;;  %v692_v30 = vld [vmem:[%s5158_s3 + $0x78] sm:$0xff] }
   0xa   :  { %747 = vrot.lane.b32.xlu1 %v680_v9, %s3161_s13  ;;  %v690_v27 = vld [vmem:[%s5158_s3 + $0x68] sm:$0xff]  ;;  %v2962_v28 = vld [vmem:[%s5156_s1 + $0x38] ss:$12 sps:$4 sm:$0xff]   ;;  %v3323_v32 = vld [vmem:[%s5155_s0 + $0x70] sm:$0xff]  }
   0xb   :  { %2925 = vmatpush1.bf16.msra.mxu1 %v2946_v6  ;;  %v681_v29 = vld [vmem:[%s5158_s3 + $0x20] sm:$0xff]  ;;  %v2967_v31 = vld [vmem:[%s5155_s0 + $0x8] sm:$0xff]   ;;  %v683_v34 = vld [vmem:[%s5158_s3 + $0x30] sm:$0xff] }
   0xc   :  { %2920 = vmatprep.subr.bf16.mxu1 %v2947_v7  ;;  %332 = vmatpush1.bf16.msra.mxu0 %v2946_v6  ;;  %v2963_v33 = vld [vmem:[%s5156_s1 + $0x20] ss:$12 sps:$4 sm:$0xff]   ;;  %v2965_v36 = vld [vmem:[%s5156_s1 + $0x8] ss:$12 sps:$4 sm:$0xff]   ;;  %v696_v38 = vld [vmem:[%s5158_s3 + $0x98] sm:$0xff] }
   0xd   :  { %333 = vmatprep.subr.bf16.mxu0 %v2947_v7  ;;  %743 = vrot.lane.b32.xlu0 %v678_v26, %s3161_s13  ;;  %v694_v35 = vld [vmem:[%s5158_s3 + $0x88] sm:$0xff]  ;;  %v685_v37 = vld [vmem:[%s5158_s3 + $0x40] sm:$0xff]  ;;  %v2968_v39 = vld [vmem:[%s5155_s0 + $0x10] sm:$0xff]  }
   0xe   :  { %751 = vrot.lane.b32.xlu1 %v682_v12, %s3161_s13  ;;  %v687_v40 = vld [vmem:[%s5158_s3 + $0x50] sm:$0xff]  ;;  %v3364_v41 = vld [vmem:[%s5155_s0 + $0x78] sm:$0xff]   ;;  %v698_v42 = vld [vmem:[%s5158_s3 + $0xa8] sm:$0xff] }
   0xf   :  { %2926 = vmatpush1.bf16.msra.mxu1 %v2949_v10  ;;  %v689_v43 = vld [vmem:[%s5158_s3 + $0x60] sm:$0xff]  ;;  %v700_v44 = vld [vmem:[%s5158_s3 + $0xb8] sm:$0xff] }
  0x10   :  { %2921 = vmatprep.subr.bf16.mxu1 %v2950_v11  ;;  %334 = vmatpush1.bf16.msra.mxu0 %v2949_v10  ;;  %v2969_v45 = vld [vmem:[%s5155_s0 + $0x18] sm:$0xff]  }
  0x11   :  { %335 = vmatprep.subr.bf16.mxu0 %v2950_v11  ;;  %749 = vrot.lane.b32.xlu0 %v681_v29, %s3161_s13 }
  0x12   :  { %755 = vrot.lane.b32.xlu1 %v684_v15, %s3161_s13 }
  0x13   :  { %2927 = vmatpush1.bf16.msra.mxu1 %v2952_v13 }
  0x14   :  { %2922 = vmatprep.subr.bf16.mxu1 %v2953_v14  ;;  %336 = vmatpush1.bf16.msra.mxu0 %v2952_v13 }
  0x15   :  { %337 = vmatprep.subr.bf16.mxu0 %v2953_v14  ;;  %753 = vrot.lane.b32.xlu0 %v683_v34, %s3161_s13 }
  0x16   :  { %759 = vrot.lane.b32.xlu1 %v686_v19, %s3161_s13 }
  0x17   :  { %2928 = vmatpush1.bf16.msra.mxu1 %v2955_v16 }
  0x18   :  { %2873 = vmatprep.subr.bf16.mxu1 %v2957_v17  ;;  %338 = vmatpush1.bf16.msra.mxu0 %v2955_v16 }
  0x19   :  { %757 = vrot.lane.b32.xlu0 %v685_v37, %s3161_s13 }
  0x1a   :  { %2767 = vmatmul.mubr.msk.bf16.vlgmr.msra.gmra.mxu1 %vm274_vm0, %v3263_v18  ;;  %763 = vrot.lane.b32.xlu1 %v688_v21, %s3161_s13 }
  0x1b   :  { %2874 = vmatpush3.bf16.msra.mxu1 %v2957_v17  ;;  %485 = vmatprep.mubr.bf16.mxu1 %v3160_v2 }
  0x1c   :  { %2875 = vmatprep.subr.bf16.mxu1 %v2958_v20  ;;  %2755 = vmatmul.mubr.msk.bf16.vlgmr.msra.gmra.mxu0 %vm274_vm0, %v2966_v23 }
  0x1d   :  { %365 = vmatprep.mubr.bf16.mxu0 %v3160_v2  ;;  %761 = vrot.lane.b32.xlu0 %v687_v40, %s3161_s13 }
  0x1e   :  { %767 = vrot.lane.b32.xlu1 %v690_v27, %s3161_s13 }
  0x1f   :  { %2876 = vmatpush3.bf16.msra.mxu1 %v2958_v20 }
  0x20   :  { %2877 = vmatprep.subr.bf16.mxu1 %v2960_v24 }
  0x22   :  { %2768 = vmatmul.mubr.msk.bf16.gmra.mxu1 %vm274_vm0, %v3292_v25  ;;  %771 = vrot.lane.b32.xlu1 %v692_v30, %s3161_s13 }
  0x23   :  { %2878 = vmatpush3.bf16.msra.mxu1 %v2960_v24  ;;  %495 = vmatprep.mubr.bf16.mxu1 %v3160_v2 }
  0x24   :  { %2879 = vmatprep.subr.bf16.mxu1 %v2962_v28  ;;  %2756 = vmatmul.mubr.msk.bf16.gmra.mxu0 %vm274_vm0, %v2967_v31 }
  0x25   :  { %375 = vmatprep.mubr.bf16.mxu0 %v3160_v2 }
  0x26   :  { %775 = vrot.lane.b32.xlu1 %v694_v35, %s3161_s13 }
  0x27   :  { %2880 = vmatpush3.bf16.msra.mxu1 %v2962_v28 }
  0x28   :  { %2881 = vmatprep.subr.bf16.mxu1 %v2963_v33 }
  0x2a   :  { %2769 = vmatmul.mubr.msk.bf16.gmra.mxu1 %vm274_vm0, %v3323_v32  ;;  %779 = vrot.lane.b32.xlu1 %v696_v38, %s3161_s13 }
  0x2b   :  { %505 = vmatprep.mubr.bf16.mxu1 %v3160_v2  ;;  %2882 = vmatpush3.bf16.msra.mxu1 %v2963_v33 }
  0x2c   :  { %2883 = vmatprep.subr.bf16.mxu1 %v2965_v36  ;;  %2757 = vmatmul.mubr.msk.bf16.gmra.mxu0 %vm274_vm0, %v2968_v39 }
  0x2d   :  { %385 = vmatprep.mubr.bf16.mxu0 %v3160_v2 }
  0x2e   :  { %783 = vrot.lane.b32.xlu1 %v698_v42, %s3161_s13 }
  0x2f   :  { %2884 = vmatpush3.bf16.msra.mxu1 %v2965_v36 }
  0x32   :  { %2770 = vmatmul.mubr.msk.bf16.gmra.mxu1 %vm274_vm0, %v3364_v41 }
  0x33   :  { %2885 = vmatprep.mubr.msk.bf16.mxu1 %vm274_vm0, %v2966_v23 }
  0x34   :  { %11 = vsyncpa [#allocation3], 0  ;;  %765 = vrot.lane.b32.xlu0 %v689_v43, %s3161_s13  ;;  %787 = vrot.lane.b32.xlu1 %v700_v44, %s3161_s13  ;;  %v691_v46 = vld [vmem:[%s5158_s3 + $0x70] sm:$0xff]  ;;  %v702_v47 = vld [vmem:[%s5158_s3 + $0xc8] sm:$0xff]  ;;  %vm1222_vm1 = vcmask 130048   ;;  %vm1029_vm3 = vcmask 23552  }
  0x35   :  { %2758 = vmatmul.mubr.msk.bf16.gmra.mxu0 %vm274_vm0, %v2969_v45  ;;  %v693_v48 = vld [vmem:[%s5158_s3 + $0x80] sm:$0xff]  ;;  %v704_v49 = vld [vmem:[%s5158_s3 + $0xd8] sm:$0xff]  ;;  %v695_v51 = vld [vmem:[%s5158_s3 + $0x90] sm:$0xff] }
  0x36   :  { %395 = vmatprep.mubr.bf16.mxu0 %v3160_v2  ;;  %v2970_v50 = vld [vmem:[%s5155_s0 + $0x20] sm:$0xff]   ;;  %v706_v52 = vld [vmem:[%s5158_s3 + $0xe8] sm:$0xff]  ;;  %v708_v54 = vld [vmem:[%s5158_s3 + $0xf8] sm:$0xff] }
  0x37   :  { %v697_v53 = vld [vmem:[%s5158_s3 + $0xa0] sm:$0xff]  ;;  %v2971_v55 = vld [vmem:[%s5155_s0 + $0x28] sm:$0xff]   ;;  %v699_v56 = vld [vmem:[%s5158_s3 + $0xb0] sm:$0xff] }
  0x38   :  { %769 = vrot.lane.b32.xlu0 %v691_v46, %s3161_s13  ;;  %791 = vrot.lane.b32.xlu1 %v702_v47, %s3161_s13  ;;  %v1190_v57 = vld [vmem:[%s5160_s5] sm:$0xff]  ;;  %v2972_v58 = vld [vmem:[%s5155_s0 + $0x30] sm:$0xff]  }
  0x39   :  { %v701_v59 = vld [vmem:[%s5158_s3 + $0xc0] sm:$0xff]  ;;  %v1192_v60 = vld [vmem:[%s5160_s5 + $0x10] sm:$0xff]  ;;  %v2973_v62 = vld [vmem:[%s5155_s0 + $0x38] sm:$0xff]  }
  0x3a   :  { %2886 = vmatmul.mubr.msk.bf16.vlgmr.msra.gmra.mxu1 %vm274_vm0, %v2967_v31  ;;  %v703_v61 = vld [vmem:[%s5158_s3 + $0xd0] sm:$0xff]  ;;  %v1193_v63 = vld [vmem:[%s5160_s5 + $0x18] sm:$0xff]  ;;  %v2974_v0 = vld [vmem:[%s5155_s0 + $0x40] sm:$0xff]  }
  0x3b   :  { %2889 = vmatprep.mubr.msk.bf16.mxu1 %vm274_vm0, %v2968_v39  ;;  %v705_v1 = vld [vmem:[%s5158_s3 + $0xe0] sm:$0xff]  ;;  %v707_v4 = vld [vmem:[%s5158_s3 + $0xf0] sm:$0xff]  ;;  %v2975_v5 = vld [vmem:[%s5155_s0 + $0x48] sm:$0xff]   ;;  %v83_v39 = vlaneseq }
  0x3c   :  { %773 = vrot.lane.b32.xlu0 %v693_v48, %s3161_s13  ;;  %795 = vrot.lane.b32.xlu1 %v704_v49, %s3161_s13  ;;  %v1194_v3 = vld [vmem:[%s5160_s5 + $0x20] sm:$0xff]  ;;  %v1195_v6 = vld [vmem:[%s5160_s5 + $0x28] sm:$0xff] }
  0x3d   :  { %2759 = vmatmul.mubr.msk.bf16.gmra.mxu0 %vm274_vm0, %v2970_v50  ;;  %v2976_v7 = vld [vmem:[%s5155_s0 + $0x50] sm:$0xff]   ;;  %v1191_v8 = vld [vmem:[%s5160_s5 + $0x8] sm:$0xff]  ;;  %v2977_v11 = vld [vmem:[%s5155_s0 + $0x58] sm:$0xff]   ;;  %v84_v40 = vshrl.u32 %v83_v39, 7 }
  0x3e   :  { %405 = vmatprep.mubr.bf16.mxu0 %v3160_v2  ;;  %v1196_v9 = vld [vmem:[%s5160_s5 + $0x30] sm:$0xff]  ;;  %v1197_v12 = vld [vmem:[%s5160_s5 + $0x38] sm:$0xff]  ;;  %v1202_v13 = vld [vmem:[%s5160_s5 + $0x60] sm:$0xff] }
  0x3f   :  { %v1200_v10 = vld [vmem:[%s5160_s5 + $0x50] sm:$0xff]  ;;  %v1198_v14 = vld [vmem:[%s5160_s5 + $0x40] sm:$0xff]  ;;  %v1199_v16 = vld [vmem:[%s5160_s5 + $0x48] sm:$0xff]  ;;  %v85_v42 = vsub.s32 0, %v84_v40  ;;  %v89_v44 = vsub.s32 1, %v84_v40 }
  0x40   :  { %777 = vrot.lane.b32.xlu0 %v695_v51, %s3161_s13  ;;  %799 = vrot.lane.b32.xlu1 %v706_v52, %s3161_s13  ;;  %v1204_v15 = vld [vmem:[%s5160_s5 + $0x70] sm:$0xff]  ;;  %v1206_v17 = vld [vmem:[%s5160_s5 + $0x80] sm:$0xff] }
  0x41   :  { %v1208_v19 = vld [vmem:[%s5160_s5 + $0x90] sm:$0xff]  ;;  %v1203_v20 = vld [vmem:[%s5160_s5 + $0x68] sm:$0xff]  ;;  %v1210_v21 = vld [vmem:[%s5160_s5 + $0xa0] sm:$0xff] }
  0x42   :  { %2890 = vmatmul.mubr.msk.bf16.gmra.mxu1 %vm274_vm0, %v2969_v45  ;;  %v1205_v22 = vld [vmem:[%s5160_s5 + $0x78] sm:$0xff]  ;;  %v1212_v23 = vld [vmem:[%s5160_s5 + $0xb0] sm:$0xff]  ;;  %v1214_v24 = vld [vmem:[%s5160_s5 + $0xc0] sm:$0xff] }
  0x43   :  { %2893 = vmatprep.mubr.msk.bf16.mxu1 %vm274_vm0, %v2970_v50  ;;  %v1216_v26 = vld [vmem:[%s5160_s5 + $0xd0] sm:$0xff]  ;;  %v1211_v27 = vld [vmem:[%s5160_s5 + $0xa8] sm:$0xff]  ;;  %v1218_v28 = vld [vmem:[%s5160_s5 + $0xe0] sm:$0xff] }
  0x44   :  { %781 = vrot.lane.b32.xlu0 %v697_v53, %s3161_s13  ;;  %803 = vrot.lane.b32.xlu1 %v708_v54, %s3161_s13  ;;  %v1213_v29 = vld [vmem:[%s5160_s5 + $0xb8] sm:$0xff]  ;;  %v1220_v30 = vld [vmem:[%s5160_s5 + $0xf0] sm:$0xff] }
  0x45   :  { %2760 = vmatmul.mubr.msk.bf16.gmra.mxu0 %vm274_vm0, %v2971_v55  ;;  %v1215_v31 = vld [vmem:[%s5160_s5 + $0xc8] sm:$0xff]  ;;  %v1221_v34 = vld [vmem:[%s5160_s5 + $0xf8] sm:$0xff]  ;;  %v81_v43 = vld [vmem:[%s5157_s2] sm:$0x7]  ;;  %s3162_s2 = smov 112  }
  0x46   :  { %415 = vmatprep.mubr.bf16.mxu0 %v3160_v2  ;;  %v1219_v33 = vld [vmem:[%s5160_s5 + $0xe8] sm:$0xff]  ;;  %v3610_v46 = vrot.slane %v81_v43, %v85_v42  ;;  %v3612_v47 = vrot.slane %v81_v43, %v89_v44 }
  0x48   :  { %785 = vrot.lane.b32.xlu0 %v699_v56, %s3161_s13  ;;  %1610 = vperm.xlu1 %2936, %v1190_v57   ;;  %5231 = vst [vmem:[#allocation5_spill] sm:$0xff] %v3610_v46  ;;  %5232 = vst [vmem:[#allocation6_spill] sm:$0xff] %v3612_v47 }
  0x4a   :  { %2894 = vmatmul.mubr.msk.bf16.gmra.mxu1 %vm274_vm0, %v2971_v55 }
  0x4b   :  { %2897 = vmatprep.mubr.msk.bf16.mxu1 %vm274_vm0, %v2972_v58 }
  0x4c   :  { %789 = vrot.lane.b32.xlu0 %v701_v59, %s3161_s13  ;;  %1616 = vperm.xlu1 %2936, %v1192_v60  }
  0x4d   :  { %2761 = vmatmul.mubr.msk.bf16.gmra.mxu0 %vm274_vm0, %v2972_v58 }
  0x4e   :  { %425 = vmatprep.mubr.bf16.mxu0 %v3160_v2 }
  0x50   :  { %793 = vrot.lane.b32.xlu0 %v703_v61, %s3161_s13  ;;  %1619 = vperm.xlu1 %2936, %v1193_v63  }
  0x52   :  { %2898 = vmatmul.mubr.msk.bf16.gmra.mxu1 %vm274_vm0, %v2973_v62 }
  0x53   :  { %2901 = vmatprep.mubr.msk.bf16.mxu1 %vm274_vm0, %v2974_v0 }
  0x54   :  { %797 = vrot.lane.b32.xlu0 %v705_v1, %s3161_s13  ;;  %1622 = vperm.xlu1 %2936, %v1194_v3  }
  0x55   :  { %2762 = vmatmul.mubr.msk.bf16.gmra.mxu0 %vm274_vm0, %v2973_v62 }
  0x56   :  { %435 = vmatprep.mubr.bf16.mxu0 %v3160_v2 }
  0x58   :  { %801 = vrot.lane.b32.xlu0 %v707_v4, %s3161_s13  ;;  %1625 = vperm.xlu1 %2936, %v1195_v6  }
  0x5a   :  { %2902 = vmatmul.mubr.msk.bf16.gmra.mxu1 %vm274_vm0, %v2975_v5 }
  0x5b   :  { %2905 = vmatprep.mubr.msk.bf16.mxu1 %vm274_vm0, %v2976_v7 }
  0x5c   :  { %1613 = vperm.xlu0 %2937, %v1191_v8   ;;  %1628 = vperm.xlu1 %2936, %v1196_v9  }
  0x5d   :  { %2763 = vmatmul.mubr.msk.bf16.gmra.mxu0 %vm274_vm0, %v2974_v0 }
  0x5e   :  { %445 = vmatprep.mubr.bf16.mxu0 %v3160_v2 }
  0x60   :  { %1640 = vperm.xlu0 %2937, %v1200_v10   ;;  %1631 = vperm.xlu1 %2936, %v1197_v12  }
  0x62   :  { %2906 = vmatmul.mubr.msk.bf16.gmra.mxu1 %vm274_vm0, %v2977_v11 }
  0x63   :  { %2909 = vmatprep.mubr.msk.bf16.mxu1 %vm274_vm0, %v3263_v18  ;;  %v1201_v18 = vld [vmem:[%s5160_s5 + $0x58] sm:$0xff] }
  0x64   :  { %1646 = vperm.xlu0 %2937, %v1202_v13   ;;  %1634 = vperm.xlu1 %2936, %v1198_v14  }
  0x65   :  { %2764 = vmatmul.mubr.msk.bf16.gmra.mxu0 %vm274_vm0, %v2975_v5 }
  0x66   :  { %455 = vmatprep.mubr.bf16.mxu0 %v3160_v2 }
  0x68   :  { %1652 = vperm.xlu0 %2937, %v1204_v15   ;;  %1637 = vperm.xlu1 %2936, %v1199_v16   ;;  %v93_v15 = vsub.s32 2, %v84_v40 }
  0x6a   :  { %2910 = vmatmul.mubr.msk.bf16.gmra.mxu1 %vm274_vm0, %v3292_v25  ;;  %v1209_v25 = vld [vmem:[%s5160_s5 + $0x98] sm:$0xff] }
  0x6b   :  { %2913 = vmatprep.mubr.msk.bf16.mxu1 %vm274_vm0, %v3323_v32  ;;  %v1217_v32 = vld [vmem:[%s5160_s5 + $0xd8] sm:$0xff] }
  0x6c   :  { %1658 = vperm.xlu0 %2937, %v1206_v17   ;;  %1643 = vperm.xlu1 %2936, %v1201_v18  }
  0x6d   :  { %2765 = vmatmul.mubr.msk.bf16.gmra.mxu0 %vm274_vm0, %v2976_v7 }
  0x6e   :  { %465 = vmatprep.mubr.bf16.mxu0 %v3160_v2  ;;  %v1207_v2 = vld [vmem:[%s5160_s5 + $0x88] sm:$0xff] }
  0x70   :  { %1664 = vperm.xlu0 %2937, %v1208_v19   ;;  %1649 = vperm.xlu1 %2936, %v1203_v20  }
  0x72   :  { %2914 = vmatmul.mubr.msk.bf16.gmra.mxu1 %vm274_vm0, %v3364_v41 }
  0x74   :  { %1670 = vperm.xlu0 %2937, %v1210_v21   ;;  %1655 = vperm.xlu1 %2936, %v1205_v22   ;;  %v3639_v21 = vrot.slane %v81_v43, %v93_v15 }
  0x75   :  { %2766 = vmatmul.mubr.msk.bf16.gmra.mxu0 %vm274_vm0, %v2977_v11 }
  0x78   :  { %1676 = vperm.xlu0 %2937, %v1212_v23   ;;  %1661 = vperm.xlu1 %2936, %v1207_v2   ;;  %v3594_v35 = vpop.permute.xlu1 %745 }
  0x7c   :  { %1682 = vperm.xlu0 %2937, %v1214_v24   ;;  %1667 = vperm.xlu1 %2936, %v1209_v25   ;;  %v3596_v36 = vpop.permute.xlu1 %747 }
  0x80   :  { %1688 = vperm.xlu0 %2937, %v1216_v26   ;;  %1673 = vperm.xlu1 %2936, %v1211_v27   ;;  %v3598_v37 = vpop.permute.xlu1 %751 }
  0x84   :  { %1694 = vperm.xlu0 %2937, %v1218_v28   ;;  %1679 = vperm.xlu1 %2936, %v1213_v29   ;;  %v3600_v38 = vpop.permute.xlu1 %755 }
  0x88   :  { %1700 = vperm.xlu0 %2937, %v1220_v30   ;;  %1685 = vperm.xlu1 %2936, %v1215_v31   ;;  %v3603_v41 = vpop.permute.xlu1 %759 }
  0x8c   :  { %1691 = vperm.xlu1 %2936, %v1217_v32   ;;  %v3608_v45 = vpop.permute.xlu1 %763 }
  0x90   :  { %1697 = vperm.xlu1 %2936, %v1219_v33   ;;  %v3615_v50 = vpop.permute.xlu1 %767 }
  0x94   :  { %1703 = vperm.xlu1 %2936, %v1221_v34   ;;  %v3620_v57 = vpop.permute.xlu1 %771 }
  0x98   :  { %v3625_v0 = vpop.permute.xlu1 %775 }
  0x9c   :  { %v3630_v8 = vpop.permute.xlu1 %779 }
  0xa0   :  { %v3635_v16 = vpop.permute.xlu1 %783 }
  0xa6   :  { %v3642_v2 = vpop.permute.xlu1 %787 }
  0xaa   :  { %v3654_v31 = vpop.permute.xlu1 %791 }
  0xae   :  { %v3659_v33 = vpop.permute.xlu1 %795 }
  0xb2   :  { %v3664_v42 = vpop.permute.xlu1 %799 }
  0xb6   :  { %v3668_v44 = vpop.permute.xlu1 %803 }
  0xda   :  { %v477_v48 = vpop.f32.mrf.mxu1 }
  0xdb   :  { %v478_v49 = vadd.f32 %v477_v48, %v3610_v46  ;;  %v3672_v48 = vand.u32 127, %v83_v39 }
  0xdc   :  { %v479_v51 = vpop.f32.mrf.mxu1 }
  0xdd   :  { %2681 = vst [vmem:[#allocation2 + $0x240] sm:$0xff] %v478_v49  ;;  %v480_v52 = vadd.f32 %v479_v51, %v3612_v47  ;;  %5236 = vst [vmem:[#allocation10_spill] sm:$0xff] %v3672_v48  ;;  %v1611_v49 = vpop.permute.xlu1 %1610  ;;  %v5162_v51 = vmov 0.0  }
  0xde   :  { %v481_v53 = vpop.f32.mrf.mxu1  ;;  %vm1705_vm2 = vcmp.eq.s32.totalorder %v3672_v48, %v1611_v49 }
  0xdf   :  { %2682 = vst [vmem:[#allocation2 + $0x248] sm:$0xff] %v480_v52  ;;  %v482_v54 = vadd.f32 %v481_v53, %v3610_v46  ;;  %v2787_v52 = vsel %vm1705_vm2, 1.0, %v5162_v51 }
  0xe0   :  { %v483_v55 = vpop.f32.mrf.mxu1 }
  0xe1   :  { %2684 = vst [vmem:[#allocation2 + $0x258] sm:$0xff] %v482_v54  ;;  %v484_v56 = vadd.f32 %v483_v55, %v3612_v47 }
  0xe2   :  { %v487_v58 = vpop.f32.mrf.mxu1 }
  0xe3   :  { %2685 = vst [vmem:[#allocation2 + $0x260] sm:$0xff] %v484_v56  ;;  %v488_v59 = vadd.f32 %v487_v58, %v3610_v46  ;;  %v742_v58 = vpop.permute.xlu0 %741 }
  0xe4   :  { %v489_v60 = vpop.f32.mrf.mxu1 }
  0xe5   :  { %2687 = vst [vmem:[#allocation2 + $0x270] sm:$0xff] %v488_v59  ;;  %v490_v61 = vadd.f32 %v489_v60, %v3612_v47 }
  0xe6   :  { %v491_v62 = vpop.f32.mrf.mxu1 }
  0xe7   :  { %2688 = vst [vmem:[#allocation2 + $0x278] sm:$0xff] %v490_v61  ;;  %v492_v63 = vadd.f32 %v491_v62, %v3610_v46 }
  0xe8   :  { %v493_v1 = vpop.f32.mrf.mxu1 }
  0xe9   :  { %2690 = vst [vmem:[#allocation2 + $0x288] sm:$0xff] %v492_v63  ;;  %v494_v3 = vadd.f32 %v493_v1, %v3612_v47  ;;  %v744_v63 = vpop.permute.xlu0 %743 }
  0xea   :  { %v497_v4 = vpop.f32.mrf.mxu1 }
  0xeb   :  { %2691 = vst [vmem:[#allocation2 + $0x290] sm:$0xff] %v494_v3  ;;  %v498_v5 = vadd.f32 %v497_v4, %v3610_v46 }
  0xec   :  { %v499_v6 = vpop.f32.mrf.mxu1 }
  0xed   :  { %2693 = vst [vmem:[#allocation2 + $0x2a0] sm:$0xff] %v498_v5  ;;  %v500_v7 = vadd.f32 %v499_v6, %v3612_v47  ;;  %v750_v5 = vpop.permute.xlu0 %749 }
  0xee   :  { %v501_v9 = vpop.f32.mrf.mxu1 }
  0xef   :  { %2694 = vst [vmem:[#allocation2 + $0x2a8] sm:$0xff] %v500_v7  ;;  %v502_v10 = vadd.f32 %v501_v9, %v3610_v46 }
  0xf0   :  { %v503_v11 = vpop.f32.mrf.mxu1 }
  0xf1   :  { %2696 = vst [vmem:[#allocation2 + $0x2b8] sm:$0xff] %v502_v10  ;;  %v504_v12 = vadd.f32 %v503_v11, %v3612_v47  ;;  %v754_v6 = vpop.permute.xlu0 %753 }
  0xf2   :  { %v507_v13 = vpop.f32.mrf.mxu1 }
  0xf3   :  { %2697 = vst [vmem:[#allocation2 + $0x2c0] sm:$0xff] %v504_v12  ;;  %v508_v14 = vadd.f32 %v507_v13, %v3610_v46 }
  0xf4   :  { %v509_v17 = vpop.f32.mrf.mxu1 }
  0xf5   :  { %2699 = vst [vmem:[#allocation2 + $0x2d0] sm:$0xff] %v508_v14  ;;  %v510_v18 = vadd.f32 %v509_v17, %v3612_v47 }
  0xf6   :  { %v511_v19 = vpop.f32.mrf.mxu1 }
  0xf7   :  { %2700 = vst [vmem:[#allocation2 + $0x2d8] sm:$0xff] %v510_v18  ;;  %v512_v20 = vadd.f32 %v511_v19, %v3610_v46 }
  0xf8   :  { %v513_v22 = vpop.f32.mrf.mxu1 }
  0xf9   :  { %2702 = vst [vmem:[#allocation2 + $0x2e8] sm:$0xff] %v512_v20  ;;  %v514_v23 = vadd.f32 %v513_v22, %v3612_v47 }
  0xfa   :  { %v2887_v24 = vpop.f32.mrf.mxu1 }
  0xfb   :  { %2703 = vst [vmem:[#allocation2 + $0x2f0] sm:$0xff] %v514_v23  ;;  %v3645_v25 = vadd.f32 %v2887_v24, %v3639_v21 }
  0xfc   :  { %v550_v26 = vpop.f32.mrf.mxu1 }
  0xfd   :  { %5233 = vst [vmem:[#allocation7_spill] sm:$0xff] %v3645_v25  ;;  %v3648_v27 = vadd.f32 %v550_v26, %v3639_v21  ;;  %v1229_v28 = vsel %vm1222_vm1, %v3645_v25, -inf  ;;  %v839_v29 = vsub.f32 %v3645_v25, %v3594_v35 }
  0xfe   :  { %1230 = vmax.xlane.f32.xlu1 %v1229_v28  ;;  %v2888_v34 = vpop.f32.mrf.mxu1 }
  0xff   :  { %5234 = vst [vmem:[#allocation8_spill] sm:$0xff] %v3648_v27  ;;  %v871_v30 = vand.u32 2147483647, %v839_v29  ;;  %v1223_v32 = vsel %vm1222_vm1, %v3648_v27, -inf  ;;  %v3662_v40 = vadd.f32 %v2888_v34, %v3639_v21  ;;  %v1801_v54 = vmul.f32 %v2787_v52, %v3648_v27 }
 0x100   :  { %v553_v55 = vpop.f32.mrf.mxu1  ;;  %v837_v60 = vsub.f32 %v3648_v27, %v742_v58 }
 0x101   :  { %937 = vrot.lane.b32.xlu0 %v871_v30, %s3162_s2  ;;  %5235 = vst [vmem:[#allocation9_spill] sm:$0xff] %v3662_v40  ;;  %v840_v35 = vsub.f32 %v3662_v40, %v3596_v36  ;;  %v1232_v53 = vsel %vm1222_vm1, %v3662_v40, -inf  ;;  %v1833_v36 = vsel %vm1222_vm1, %v1801_v54, 0.0  ;;  %v3688_v62 = vadd.f32 %v553_v55, %v3639_v21 }
 0x102   :  { %1224 = vmax.xlane.f32.xlu1 %v1223_v32  ;;  %v2891_v56 = vpop.f32.mrf.mxu1  ;;  %v869_v61 = vand.u32 2147483647, %v837_v60  ;;  %v758_v32 = vpop.permute.xlu0 %757 }
 0x103   :  { %v872_v43 = vand.u32 2147483647, %v840_v35  ;;  %v3681_v39 = vadd.f32 %v2891_v56, %v3639_v21  ;;  %5238 = vst [vmem:[#allocation12_spill] sm:$0xff] %v3688_v62  ;;  %v838_v1 = vsub.f32 %v3688_v62, %v744_v63  ;;  %v1226_v4 = vsel %vm1222_vm1, %v3688_v62, -inf }
 0x104   :  { %v566_v7 = vpop.f32.mrf.mxu1 }
 0x105   :  { %5237 = vst [vmem:[#allocation11_spill] sm:$0xff] %v3681_v39  ;;  %v1241_v59 = vsel %vm1222_vm1, %v3681_v39, -inf  ;;  %v870_v3 = vand.u32 2147483647, %v838_v1  ;;  %v3695_v9 = vadd.f32 %v566_v7, %v3639_v21  ;;  %v843_v10 = vsub.f32 %v3681_v39, %v754_v6 }
 0x106   :  { %v2892_v13 = vpop.f32.mrf.mxu1  ;;  %v762_v34 = vpop.permute.xlu0 %761 }
 0x107   :  { %5239 = vst [vmem:[#allocation13_spill] sm:$0xff] %v3695_v9  ;;  %v1235_v11 = vsel %vm1222_vm1, %v3695_v9, -inf  ;;  %v875_v12 = vand.u32 2147483647, %v843_v10  ;;  %v3702_v14 = vadd.f32 %v2892_v13, %v3639_v21  ;;  %v841_v24 = vsub.f32 %v3695_v9, %v750_v5 }
 0x108   :  { %v569_v19 = vpop.f32.mrf.mxu1 }
 0x109   :  { %5240 = vst [vmem:[#allocation14_spill] sm:$0xff] %v3702_v14  ;;  %v844_v15 = vsub.f32 %v3702_v14, %v3600_v38  ;;  %v1244_v18 = vsel %vm1222_vm1, %v3702_v14, -inf  ;;  %v873_v26 = vand.u32 2147483647, %v841_v24  ;;  %v3717_v38 = vadd.f32 %v569_v19, %v3639_v21 }
 0x10a   :  { %v2895_v20 = vpop.f32.mrf.mxu1  ;;  %v766_v6 = vpop.permute.xlu0 %765 }
 0x10b   :  { %v876_v17 = vand.u32 2147483647, %v844_v15  ;;  %v3710_v22 = vadd.f32 %v2895_v20, %v3639_v21  ;;  %5242 = vst [vmem:[#allocation16_spill] sm:$0xff] %v3717_v38  ;;  %v842_v28 = vsub.f32 %v3717_v38, %v3598_v37  ;;  %v1238_v30 = vsel %vm1222_vm1, %v3717_v38, -inf }
 0x10c   :  { %v582_v35 = vpop.f32.mrf.mxu1 }
 0x10d   :  { %5241 = vst [vmem:[#allocation15_spill] sm:$0xff] %v3710_v22  ;;  %v1253_v23 = vsel %vm1222_vm1, %v3710_v22, -inf  ;;  %v874_v29 = vand.u32 2147483647, %v842_v28  ;;  %v847_v49 = vsub.f32 %v3710_v22, %v762_v34 }
 0x10e   :  { %v770_v7 = vpop.permute.xlu0 %769 }
 0x10f   :  { %v879_v37 = vand.u32 2147483647, %v847_v49 }
 0x112   :  { %v774_v49 = vpop.permute.xlu0 %773 }
 0x113   :  { %939 = vrot.lane.b32.xlu1 %v872_v43, %s3162_s2  ;;  %v3725_v43 = vadd.f32 %v582_v35, %v3639_v21 }
 0x115   :  { %5243 = vst [vmem:[#allocation17_spill] sm:$0xff] %v3725_v43  ;;  %v1247_v52 = vsel %vm1222_vm1, %v3725_v43, -inf  ;;  %v845_v63 = vsub.f32 %v3725_v43, %v758_v32 }
 0x117   :  { %v877_v1 = vand.u32 2147483647, %v845_v63 }
 0x120   :  { %1233 = vmax.xlane.f32.xlu0 %v1232_v53  ;;  %v2896_v53 = vpop.f32.mrf.mxu1 }
 0x121   :  { %v3732_v54 = vadd.f32 %v2896_v53, %v3639_v21 }
 0x122   :  { %v585_v58 = vpop.f32.mrf.mxu1 }
 0x123   :  { %5244 = vst [vmem:[#allocation18_spill] sm:$0xff] %v3732_v54  ;;  %v1256_v56 = vsel %vm1222_vm1, %v3732_v54, -inf }
 0x124   :  { %1834 = vadd.xlane.f32.xlu0 %v1833_v36  ;;  %v848_v36 = vsub.f32 %v3732_v54, %v3608_v45  ;;  %v3747_v45 = vadd.f32 %v585_v58, %v3639_v21 }
 0x126   :  { %v880_v55 = vand.u32 2147483647, %v848_v36  ;;  %5246 = vst [vmem:[#allocation20_spill] sm:$0xff] %v3747_v45  ;;  %v1250_v5 = vsel %vm1222_vm1, %v3747_v45, -inf }
 0x137   :  { %1242 = vmax.xlane.f32.xlu1 %v1241_v59  ;;  %v2899_v59 = vpop.f32.mrf.mxu1 }
 0x138   :  { %v3740_v60 = vadd.f32 %v2899_v59, %v3639_v21 }
 0x139   :  { %v598_v10 = vpop.f32.mrf.mxu1 }
 0x13a   :  { %933 = vrot.lane.b32.xlu0 %v869_v61, %s3162_s2  ;;  %5245 = vst [vmem:[#allocation19_spill] sm:$0xff] %v3740_v60  ;;  %v1265_v61 = vsel %vm1222_vm1, %v3740_v60, -inf }
 0x13b   :  { %v2900_v15 = vpop.f32.mrf.mxu1 }
 0x148   :  { %935 = vrot.lane.b32.xlu1 %v870_v3, %s3162_s2  ;;  %v846_v3 = vsub.f32 %v3747_v45, %v3603_v41 }
 0x159   :  { %1227 = vmax.xlane.f32.xlu0 %v1226_v4  ;;  %v878_v4 = vand.u32 2147483647, %v846_v3 }
 0x16c   :  { %1236 = vmax.xlane.f32.xlu1 %v1235_v11  ;;  %v3755_v11 = vadd.f32 %v598_v10, %v3639_v21 }
 0x16e   :  { %5247 = vst [vmem:[#allocation21_spill] sm:$0xff] %v3755_v11  ;;  %v1259_v13 = vsel %vm1222_vm1, %v3755_v11, -inf }
 0x16f   :  { %945 = vrot.lane.b32.xlu0 %v875_v12, %s3162_s2  ;;  %v851_v12 = vsub.f32 %v3740_v60, %v770_v7 }
 0x171   :  { %v883_v41 = vand.u32 2147483647, %v851_v12 }
 0x17d   :  { %947 = vrot.lane.b32.xlu1 %v876_v17, %s3162_s2  ;;  %v3762_v17 = vadd.f32 %v2900_v15, %v3639_v21 }
 0x17f   :  { %5248 = vst [vmem:[#allocation22_spill] sm:$0xff] %v3762_v17  ;;  %v1268_v20 = vsel %vm1222_vm1, %v3762_v17, -inf }
 0x18e   :  { %1245 = vmax.xlane.f32.xlu0 %v1244_v18  ;;  %v852_v18 = vsub.f32 %v3762_v17, %v3620_v57 }
 0x190   :  { %v884_v19 = vand.u32 2147483647, %v852_v18 }
 0x1a1   :  { %1254 = vmax.xlane.f32.xlu1 %v1253_v23  ;;  %v601_v23 = vpop.f32.mrf.mxu1 }
 0x1a2   :  { %v3777_v57 = vadd.f32 %v601_v23, %v3639_v21 }
 0x1a3   :  { %v2903_v24 = vpop.f32.mrf.mxu1 }
 0x1a4   :  { %941 = vrot.lane.b32.xlu0 %v873_v26, %s3162_s2  ;;  %v3770_v26 = vadd.f32 %v2903_v24, %v3639_v21  ;;  %5250 = vst [vmem:[#allocation24_spill] sm:$0xff] %v3777_v57  ;;  %v850_v32 = vsub.f32 %v3777_v57, %v3615_v50  ;;  %v1262_v35 = vsel %vm1222_vm1, %v3777_v57, -inf }
 0x1a6   :  { %5249 = vst [vmem:[#allocation23_spill] sm:$0xff] %v3770_v26  ;;  %v1277_v28 = vsel %vm1222_vm1, %v3770_v26, -inf  ;;  %v882_v34 = vand.u32 2147483647, %v850_v32 }
 0x1b2   :  { %943 = vrot.lane.b32.xlu1 %v874_v29, %s3162_s2  ;;  %v849_v29 = vsub.f32 %v3755_v11, %v766_v6 }
 0x1c3   :  { %1239 = vmax.xlane.f32.xlu0 %v1238_v30  ;;  %v881_v30 = vand.u32 2147483647, %v849_v29 }
 0x1d6   :  { %1248 = vmax.xlane.f32.xlu1 %v1247_v52  ;;  %v778_v52 = vpop.permute.xlu0 %777 }
 0x1d7   :  { %v855_v36 = vsub.f32 %v3770_v26, %v778_v52 }
 0x1d9   :  { %953 = vrot.lane.b32.xlu0 %v879_v37, %s3162_s2  ;;  %v614_v37 = vpop.f32.mrf.mxu1  ;;  %v887_v50 = vand.u32 2147483647, %v855_v36 }
 0x1da   :  { %v3785_v53 = vadd.f32 %v614_v37, %v3639_v21 }
 0x1dc   :  { %5251 = vst [vmem:[#allocation25_spill] sm:$0xff] %v3785_v53  ;;  %v853_v6 = vsub.f32 %v3785_v53, %v774_v49 }
 0x1de   :  { %v885_v7 = vand.u32 2147483647, %v853_v6 }
 0x1e7   :  { %955 = vrot.lane.b32.xlu1 %v880_v55, %s3162_s2  ;;  %v1271_v55 = vsel %vm1222_vm1, %v3785_v53, -inf }
 0x1f8   :  { %1257 = vmax.xlane.f32.xlu0 %v1256_v56  ;;  %v2904_v56 = vpop.f32.mrf.mxu1 }
 0x1f9   :  { %v3792_v58 = vadd.f32 %v2904_v56, %v3639_v21 }
 0x1fb   :  { %5252 = vst [vmem:[#allocation26_spill] sm:$0xff] %v3792_v58  ;;  %v856_v59 = vsub.f32 %v3792_v58, %v3630_v8  ;;  %v1280_v63 = vsel %vm1222_vm1, %v3792_v58, -inf }
 0x20b   :  { %1266 = vmax.xlane.f32.xlu1 %v1265_v61  ;;  %v888_v61 = vand.u32 2147483647, %v856_v59 }
 0x20e   :  { %949 = vrot.lane.b32.xlu0 %v877_v1, %s3162_s2  ;;  %v617_v1 = vpop.f32.mrf.mxu1 }
 0x20f   :  { %v3807_v8 = vadd.f32 %v617_v1, %v3639_v21 }
 0x210   :  { %v2907_v3 = vpop.f32.mrf.mxu1 }
 0x211   :  { %5254 = vst [vmem:[#allocation28_spill] sm:$0xff] %v3807_v8  ;;  %v854_v10 = vsub.f32 %v3807_v8, %v3625_v0 }
 0x212   :  { %v630_v18 = vpop.f32.mrf.mxu1 }
 0x213   :  { %v886_v12 = vand.u32 2147483647, %v854_v10 }
 0x214   :  { %v2908_v24 = vpop.f32.mrf.mxu1 }
 0x21c   :  { %951 = vrot.lane.b32.xlu1 %v878_v4, %s3162_s2  ;;  %v3800_v4 = vadd.f32 %v2907_v3, %v3639_v21 }
 0x21e   :  { %5253 = vst [vmem:[#allocation27_spill] sm:$0xff] %v3800_v4 }
 0x22d   :  { %1251 = vmax.xlane.f32.xlu0 %v1250_v5  ;;  %v1289_v5 = vsel %vm1222_vm1, %v3800_v4, -inf }
 0x240   :  { %1260 = vmax.xlane.f32.xlu1 %v1259_v13  ;;  %v1274_v13 = vsel %vm1222_vm1, %v3807_v8, -inf }
 0x243   :  { %961 = vrot.lane.b32.xlu0 %v883_v41, %s3162_s2  ;;  %v782_v41 = vpop.permute.xlu0 %781 }
 0x247   :  { %v786_v15 = vpop.permute.xlu0 %785 }
 0x24b   :  { %v790_v59 = vpop.permute.xlu0 %789 }
 0x251   :  { %963 = vrot.lane.b32.xlu1 %v884_v19, %s3162_s2  ;;  %v3815_v19 = vadd.f32 %v630_v18, %v3639_v21 }
 0x253   :  { %5255 = vst [vmem:[#allocation29_spill] sm:$0xff] %v3815_v19  ;;  %v1283_v23 = vsel %vm1222_vm1, %v3815_v19, -inf  ;;  %v857_v37 = vsub.f32 %v3815_v19, %v782_v41 }
 0x255   :  { %v889_v36 = vand.u32 2147483647, %v857_v37 }
 0x262   :  { %1269 = vmax.xlane.f32.xlu0 %v1268_v20  ;;  %v859_v20 = vsub.f32 %v3800_v4, %v786_v15 }
 0x264   :  { %v891_v0 = vand.u32 2147483647, %v859_v20 }
 0x275   :  { %1278 = vmax.xlane.f32.xlu1 %v1277_v28  ;;  %v3822_v28 = vadd.f32 %v2908_v24, %v3639_v21 }
 0x277   :  { %5256 = vst [vmem:[#allocation30_spill] sm:$0xff] %v3822_v28  ;;  %v860_v29 = vsub.f32 %v3822_v28, %v3642_v2  ;;  %v1292_v32 = vsel %vm1222_vm1, %v3822_v28, -inf }
 0x278   :  { %957 = vrot.lane.b32.xlu0 %v881_v30, %s3162_s2 }
 0x279   :  { %v892_v30 = vand.u32 2147483647, %v860_v29 }
 0x286   :  { %959 = vrot.lane.b32.xlu1 %v882_v34, %s3162_s2  ;;  %v633_v34 = vpop.f32.mrf.mxu1 }
 0x287   :  { %v3837_v2 = vadd.f32 %v633_v34, %v3639_v21 }
 0x289   :  { %5258 = vst [vmem:[#allocation32_spill] sm:$0xff] %v3837_v2  ;;  %v1286_v56 = vsel %vm1222_vm1, %v3837_v2, -inf }
 0x297   :  { %1263 = vmax.xlane.f32.xlu0 %v1262_v35  ;;  %v2911_v35 = vpop.f32.mrf.mxu1 }
 0x298   :  { %v3830_v49 = vadd.f32 %v2911_v35, %v3639_v21 }
 0x29a   :  { %5257 = vst [vmem:[#allocation31_spill] sm:$0xff] %v3830_v49  ;;  %v1301_v52 = vsel %vm1222_vm1, %v3830_v49, -inf }
 0x2aa   :  { %1272 = vmax.xlane.f32.xlu1 %v1271_v55  ;;  %v858_v55 = vsub.f32 %v3837_v2, %v3635_v16 }
 0x2ad   :  { %969 = vrot.lane.b32.xlu0 %v887_v50, %s3162_s2  ;;  %v890_v50 = vand.u32 2147483647, %v858_v55 }
 0x2bb   :  { %971 = vrot.lane.b32.xlu1 %v888_v61, %s3162_s2  ;;  %v794_v61 = vpop.permute.xlu0 %793 }
 0x2bc   :  { %v863_v3 = vsub.f32 %v3830_v49, %v794_v61 }
 0x2be   :  { %v895_v16 = vand.u32 2147483647, %v863_v3 }
 0x2cc   :  { %1281 = vmax.xlane.f32.xlu0 %v1280_v63  ;;  %v646_v63 = vpop.f32.mrf.mxu1 }
 0x2cd   :  { %v3845_v1 = vadd.f32 %v646_v63, %v3639_v21 }
 0x2ce   :  { %v2912_v6 = vpop.f32.mrf.mxu1 }
 0x2cf   :  { %5259 = vst [vmem:[#allocation33_spill] sm:$0xff] %v3845_v1  ;;  %v3854_v10 = vadd.f32 %v2912_v6, %v3639_v21  ;;  %v861_v61 = vsub.f32 %v3845_v1, %v790_v59 }
 0x2d1   :  { %5260 = vst [vmem:[#allocation34_spill] sm:$0xff] %v3854_v10  ;;  %v864_v41 = vsub.f32 %v3854_v10, %v3659_v33  ;;  %v1304_v33 = vsel %vm1222_vm1, %v3854_v10, -inf }
 0x2d3   :  { %v896_v18 = vand.u32 2147483647, %v864_v41 }
 0x2df   :  { %1290 = vmax.xlane.f32.xlu1 %v1289_v5  ;;  %v1295_v5 = vsel %vm1222_vm1, %v3845_v1, -inf }
 0x2e2   :  { %965 = vrot.lane.b32.xlu0 %v885_v7, %s3162_s2  ;;  %v3851_v7 = vpop.permute.xlu0 %797 }
 0x2f0   :  { %967 = vrot.lane.b32.xlu1 %v886_v12, %s3162_s2  ;;  %v3856_v12 = vpop.permute.xlu1 %1616 }
 0x2f1   :  { %5261 = vst [vmem:[#allocation35_spill] sm:$0xff] %v3856_v12 }
 0x2f4   :  { %v3860_v15 = vpop.permute.xlu1 %1619 }
 0x2f5   :  { %5262 = vst [vmem:[#allocation36_spill] sm:$0xff] %v3860_v15 }
 0x301   :  { %1275 = vmax.xlane.f32.xlu0 %v1274_v13  ;;  %v802_v13 = vpop.permute.xlu0 %801 }
 0x305   :  { %v3862_v20 = vpop.permute.xlu0 %1613 }
 0x306   :  { %5263 = vst [vmem:[#allocation37_spill] sm:$0xff] %v3862_v20 }
 0x314   :  { %1284 = vmax.xlane.f32.xlu1 %v1283_v23  ;;  %v3865_v23 = vpop.permute.xlu1 %1622 }
 0x315   :  { %5264 = vst [vmem:[#allocation38_spill] sm:$0xff] %v3865_v23 }
 0x317   :  { %977 = vrot.lane.b32.xlu0 %v891_v0, %s3162_s2  ;;  %v3867_v0 = vpop.permute.xlu0 %1640 }
 0x318   :  { %5265 = vst [vmem:[#allocation39_spill] sm:$0xff] %v3867_v0  ;;  %v3869_v24 = vpop.permute.xlu1 %1625 }
 0x319   :  { %5266 = vst [vmem:[#allocation40_spill] sm:$0xff] %v3869_v24 }
 0x31b   :  { %v3871_v29 = vpop.permute.xlu0 %1646 }
 0x31c   :  { %5267 = vst [vmem:[#allocation41_spill] sm:$0xff] %v3871_v29 }
 0x325   :  { %979 = vrot.lane.b32.xlu1 %v892_v30, %s3162_s2  ;;  %v3873_v30 = vpop.permute.xlu1 %1628 }
 0x326   :  { %5268 = vst [vmem:[#allocation42_spill] sm:$0xff] %v3873_v30 }
 0x329   :  { %v3879_v34 = vpop.permute.xlu1 %1631 }
 0x32a   :  { %5270 = vst [vmem:[#allocation44_spill] sm:$0xff] %v3879_v34 }
 0x32d   :  { %v3883_v37 = vpop.permute.xlu1 %1634 }
 0x32e   :  { %5272 = vst [vmem:[#allocation46_spill] sm:$0xff] %v3883_v37 }
 0x331   :  { %v3893_v63 = vpop.permute.xlu1 %1637 }
 0x332   :  { %5275 = vst [vmem:[#allocation49_spill] sm:$0xff] %v3893_v63 }
 0x336   :  { %1293 = vmax.xlane.f32.xlu0 %v1292_v32  ;;  %v3875_v32 = vpop.permute.xlu0 %1652 }
 0x337   :  { %5269 = vst [vmem:[#allocation43_spill] sm:$0xff] %v3875_v32 }
 0x33a   :  { %v3881_v35 = vpop.permute.xlu0 %1658 }
 0x33b   :  { %5271 = vst [vmem:[#allocation45_spill] sm:$0xff] %v3881_v35 }
 0x349   :  { %1302 = vmax.xlane.f32.xlu1 %v1301_v52  ;;  %v649_v52 = vpop.f32.mrf.mxu1 }
 0x34a   :  { %v3903_v41 = vadd.f32 %v649_v52, %v3639_v21 }
 0x34b   :  { %v2915_v55 = vpop.f32.mrf.mxu1 }
 0x34c   :  { %973 = vrot.lane.b32.xlu0 %v889_v36, %s3162_s2  ;;  %v3885_v36 = vpop.permute.xlu0 %1664  ;;  %5279 = vst [vmem:[#allocation53_spill] sm:$0xff] %v3903_v41  ;;  %v862_v59 = vsub.f32 %v3903_v41, %v3654_v31  ;;  %v1298_v31 = vsel %vm1222_vm1, %v3903_v41, -inf }
 0x34d   :  { %5273 = vst [vmem:[#allocation47_spill] sm:$0xff] %v3885_v36 }
 0x350   :  { %v3895_v3 = vpop.permute.xlu0 %1670 }
 0x351   :  { %5276 = vst [vmem:[#allocation50_spill] sm:$0xff] %v3895_v3 }
 0x354   :  { %v3900_v6 = vpop.permute.xlu0 %1676 }
 0x355   :  { %5278 = vst [vmem:[#allocation52_spill] sm:$0xff] %v3900_v6 }
 0x35a   :  { %975 = vrot.lane.b32.xlu1 %v890_v50, %s3162_s2  ;;  %v3888_v50 = vadd.f32 %v2915_v55, %v3639_v21  ;;  %v894_v55 = vand.u32 2147483647, %v862_v59 }
 0x35c   :  { %5274 = vst [vmem:[#allocation48_spill] sm:$0xff] %v3888_v50 }
 0x36b   :  { %1287 = vmax.xlane.f32.xlu0 %v1286_v56  ;;  %v1313_v56 = vsel %vm1222_vm1, %v3888_v50, -inf }
 0x37e   :  { %1296 = vmax.xlane.f32.xlu1 %v1295_v5  ;;  %v893_v5 = vand.u32 2147483647, %v861_v61 }
 0x381   :  { %985 = vrot.lane.b32.xlu0 %v895_v16, %s3162_s2  ;;  %v3898_v16 = vpop.permute.xlu1 %1643 }
 0x382   :  { %5277 = vst [vmem:[#allocation51_spill] sm:$0xff] %v3898_v16 }
 0x38f   :  { %987 = vrot.lane.b32.xlu1 %v896_v18, %s3162_s2  ;;  %v3905_v18 = vpop.permute.xlu1 %1649 }
 0x390   :  { %5280 = vst [vmem:[#allocation54_spill] sm:$0xff] %v3905_v18 }
 0x393   :  { %v3911_v51 = vpop.permute.xlu1 %1655 }
 0x394   :  { %5282 = vst [vmem:[#allocation56_spill] sm:$0xff] %v3911_v51 }
 0x397   :  { %v3916_v61 = vpop.permute.xlu1 %1661 }
 0x398   :  { %5284 = vst [vmem:[#allocation58_spill] sm:$0xff] %v3916_v61 }
 0x39b   :  { %v3920_v52 = vpop.permute.xlu1 %1667 }
 0x39c   :  { %5286 = vst [vmem:[#allocation60_spill] sm:$0xff] %v3920_v52  ;;  %v662_v52 = vpop.f32.mrf.mxu1 }
 0x39f   :  { %v3928_v59 = vpop.permute.xlu1 %1673 }
 0x3a0   :  { %1305 = vmax.xlane.f32.xlu0 %v1304_v33  ;;  %v3907_v33 = vpop.permute.xlu0 %1682  ;;  %5288 = vst [vmem:[#allocation62_spill] sm:$0xff] %v3928_v59 }
 0x3a1   :  { %5281 = vst [vmem:[#allocation55_spill] sm:$0xff] %v3907_v33  ;;  %v867_v33 = vsub.f32 %v3888_v50, %v802_v13 }
 0x3b3   :  { %1314 = vmax.xlane.f32.xlu1 %v1313_v56  ;;  %v3913_v56 = vpop.permute.xlu0 %1688 }
 0x3b4   :  { %5283 = vst [vmem:[#allocation57_spill] sm:$0xff] %v3913_v56  ;;  %v3932_v56 = vpop.permute.xlu1 %1679 }
 0x3b5   :  { %5289 = vst [vmem:[#allocation63_spill] sm:$0xff] %v3932_v56  ;;  %v899_v56 = vand.u32 2147483647, %v867_v33 }
 0x3b6   :  { %981 = vrot.lane.b32.xlu0 %v893_v5, %s3162_s2 }
 0x3b7   :  { %v3918_v5 = vpop.permute.xlu0 %1694 }
 0x3b8   :  { %5285 = vst [vmem:[#allocation59_spill] sm:$0xff] %v3918_v5  ;;  %v3936_v61 = vpop.permute.xlu1 %1685 }
 0x3b9   :  { %5291 = vst [vmem:[#allocation65_spill] sm:$0xff] %v3936_v61 }
 0x3bb   :  { %v3922_v47 = vpop.permute.xlu0 %1700 }
 0x3bc   :  { %5287 = vst [vmem:[#allocation61_spill] sm:$0xff] %v3922_v47  ;;  %v3941_v47 = vadd.f32 %v662_v52, %v3639_v21  ;;  %v3944_v18 = vpop.permute.xlu1 %1691 }
 0x3bd   :  { %5293 = vst [vmem:[#allocation67_spill] sm:$0xff] %v3944_v18 }
 0x3be   :  { %5292 = vst [vmem:[#allocation66_spill] sm:$0xff] %v3941_v47  ;;  %v865_v29 = vsub.f32 %v3941_v47, %v3851_v7 }
 0x3bf   :  { %v3924_v46 = vpop.permute.xlu0 %937 }
 0x3c0   :  { %v3951_v61 = vpop.permute.xlu1 %1697  ;;  %v897_v37 = vand.u32 2147483647, %v865_v29 }
 0x3c1   :  { %5294 = vst [vmem:[#allocation68_spill] sm:$0xff] %v3951_v61 }
 0x3c3   :  { %v3930_v51 = vpop.xlane.xlu0 %1233 }
 0x3c4   :  { %983 = vrot.lane.b32.xlu1 %v894_v55, %s3162_s2  ;;  %v3958_v18 = vpop.permute.xlu1 %1703 }
 0x3c5   :  { %5296 = vst [vmem:[#allocation70_spill] sm:$0xff] %v3958_v18 }
 0x3c7   :  { %v3934_v55 = vpop.xlane.xlu0 %1834 }
 0x3c8   :  { %5290 = vst [vmem:[#allocation64_spill] sm:$0xff] %v3934_v55  ;;  %v2916_v55 = vpop.f32.mrf.mxu1 }
 0x3c9   :  { %v3954_v52 = vadd.f32 %v2916_v55, %v3639_v21 }
 0x3ca   :  { %v665_v16 = vpop.f32.mrf.mxu1 }
 0x3cb   :  { %v3938_v5 = vpop.permute.xlu0 %933  ;;  %5295 = vst [vmem:[#allocation69_spill] sm:$0xff] %v3954_v52  ;;  %v3961_v3 = vadd.f32 %v665_v16, %v3639_v21  ;;  %v868_v33 = vsub.f32 %v3954_v52, %v3668_v44 }
 0x3cd   :  { %5297 = vst [vmem:[#allocation71_spill] sm:$0xff] %v3961_v3  ;;  %v900_v63 = vand.u32 2147483647, %v868_v33  ;;  %v866_v61 = vsub.f32 %v3961_v3, %v3664_v42  ;;  %v1316_v33 = vsel %vm1222_vm1, %v3954_v52, -inf }
 0x3cf   :  { %v3946_v59 = vpop.xlane.xlu0 %1227  ;;  %v898_v36 = vand.u32 2147483647, %v866_v61 }
 0x3d3   :  { %v946_v6 = vpop.permute.xlu0 %945 }
 0x3d4   :  { %v1048_v15 = vsel %vm1029_vm3, %v946_v6, 0.0 }
 0x3d5   :  { %1299 = vmax.xlane.f32.xlu0 %v1298_v31  ;;  %v1307_v31 = vsel %vm1222_vm1, %v3941_v47, -inf }
 0x3d7   :  { %v3956_v13 = vpop.xlane.xlu0 %1245 }
 0x3e8   :  { %1308 = vmax.xlane.f32.xlu1 %v1307_v31  ;;  %v3965_v31 = vpop.xlane.xlu1 %1230 }
 0x3e9   :  { %5298 = vst [vmem:[#allocation72_spill] sm:$0xff] %v3965_v31 }
 0x3eb   :  { %993 = vrot.lane.b32.xlu0 %v899_v56, %s3162_s2  ;;  %v942_v56 = vpop.permute.xlu0 %941 }
 0x3ec   :  { %v3972_v34 = vpop.xlane.xlu1 %1224  ;;  %v1042_v7 = vsel %vm1029_vm3, %v942_v56, 0.0 }
 0x3ed   :  { %v1319_v56 = vsub.f32 %v3648_v27, %v3972_v34 }
 0x3ef   :  { %v3970_v55 = vpop.xlane.xlu0 %1239 }
 0x3f0   :  { %v3975_v16 = vpop.permute.xlu1 %939 }
 0x3f3   :  { %v954_v21 = vpop.permute.xlu0 %953 }
 0x3f4   :  { %v3979_v18 = vpop.xlane.xlu1 %1242 }
 0x3f5   :  { %5299 = vst [vmem:[#allocation73_spill] sm:$0xff] %v3979_v18 }
 0x3f7   :  { %v3977_v44 = vpop.xlane.xlu0 %1257 }
 0x3f9   :  { %995 = vrot.lane.b32.xlu1 %v900_v63, %s3162_s2  ;;  %v936_v63 = vpop.permute.xlu1 %935 }
 0x3fb   :  { %v950_v42 = vpop.permute.xlu0 %949 }
 0x3fc   :  { %v1054_v47 = vsel %vm1029_vm3, %v950_v42, 0.0 }
 0x3fd   :  { %991 = vrot.lane.b32.xlu1 %v898_v36, %s3162_s2  ;;  %v3985_v61 = vpop.xlane.xlu1 %1236 }
 0x3ff   :  { %v3983_v35 = vpop.xlane.xlu0 %1251 }
 0x401   :  { %v3987_v32 = vpop.permute.xlu1 %947 }
 0x403   :  { %v962_v24 = vpop.permute.xlu0 %961 }
 0x405   :  { %v3993_v0 = vpop.xlane.xlu1 %1254 }
 0x406   :  { %5301 = vst [vmem:[#allocation75_spill] sm:$0xff] %v3993_v0 }
 0x407   :  { %v3989_v36 = vpop.xlane.xlu0 %1269 }
 0x408   :  { %5300 = vst [vmem:[#allocation74_spill] sm:$0xff] %v3989_v36 }
 0x409   :  { %v3997_v23 = vpop.permute.xlu1 %943 }
 0x40a   :  { %1317 = vmax.xlane.f32.xlu0 %v1316_v33  ;;  %v1033_v33 = vsel %vm1029_vm3, %v936_v63, 0.0  ;;  %v1060_v63 = vsel %vm1029_vm3, %v954_v21, 0.0 }
 0x40b   :  { %v958_v30 = vpop.permute.xlu0 %957 }
 0x40d   :  { %v4002_v48 = vpop.xlane.xlu1 %1248 }
 0x40e   :  { %5303 = vst [vmem:[#allocation77_spill] sm:$0xff] %v4002_v48 }
 0x40f   :  { %v3999_v20 = vpop.xlane.xlu0 %1263 }
 0x410   :  { %5302 = vst [vmem:[#allocation76_spill] sm:$0xff] %v3999_v20 }
 0x411   :  { %v4005_v29 = vpop.permute.xlu1 %955 }
 0x413   :  { %v970_v12 = vpop.permute.xlu0 %969 }
 0x414   :  { %v1084_v42 = vsel %vm1029_vm3, %v970_v12, 0.0  ;;  %v1323_v12 = vsub.f32 %v3695_v9, %v3985_v61 }
 0x417   :  { %v4010_v52 = vpop.xlane.xlu0 %1281 }
 0x418   :  { %5304 = vst [vmem:[#allocation78_spill] sm:$0xff] %v4010_v52 }
 0x420   :  { %989 = vrot.lane.b32.xlu0 %v897_v37, %s3162_s2  ;;  %v1321_v37 = vsub.f32 %v3645_v25, %v3965_v31  ;;  %v1351_v31 = vmul.f32 1.442695, %v1319_v56 }
 0x421   :  { %1034 = vadd.xlane.f32.xlu1 %v1033_v33  ;;  %v4012_v33 = vpop.xlane.xlu1 %1266 }
 0x422   :  { %5305 = vst [vmem:[#allocation79_spill] sm:$0xff] %v4012_v33  ;;  %v1355_v6 = vmul.f32 1.442695, %v1321_v37 }
 0x424   :  { %2978 = vpow2.f32 %v1355_v6 }
 0x425   :  { %1049 = vadd.xlane.f32.xlu1 %v1048_v15  ;;  %v966_v15 = vpop.permute.xlu0 %965  ;;  %v4018_v50 = vpop.permute.xlu1 %951  ;;  %2980 = vpow2.f32 %v1351_v31  ;;  %v1036_v31 = vsel %vm1029_vm3, %v3924_v46, 0.0 }
 0x429   :  { %1043 = vadd.xlane.f32.xlu1 %v1042_v7  ;;  %v1072_v7 = vsel %vm1029_vm3, %v962_v24, 0.0  ;;  %v4020_v21 = vpop.xlane.xlu0 %1275  ;;  %v4023_v25 = vpop.xlane.xlu1 %1260  ;;  %v1310_v24 = vsel %vm1222_vm1, %v3961_v3, -inf }
 0x42d   :  { %1061 = vadd.xlane.f32.xlu1 %v1060_v63  ;;  %v1066_v63 = vsel %vm1029_vm3, %v958_v30, 0.0  ;;  %v978_v37 = vpop.permute.xlu0 %977  ;;  %v4030_v6 = vpop.permute.xlu1 %963  ;;  %v1078_v30 = vsel %vm1029_vm3, %v966_v15, 0.0  ;;  %v1030_v15 = vsel %vm1029_vm3, %v3938_v5, 0.0 }
 0x431   :  { %1055 = vadd.xlane.f32.xlu1 %v1054_v47  ;;  %v1325_v47 = vsub.f32 %v3681_v39, %v3979_v18  ;;  %v4033_v27 = vpop.xlane.xlu0 %1293 }
 0x432   :  { %5306 = vst [vmem:[#allocation80_spill] sm:$0xff] %v4033_v27 }
 0x433   :  { %v1363_v56 = vmul.f32 1.442695, %v1325_v47 }
 0x435   :  { %1073 = vadd.xlane.f32.xlu1 %v1072_v7  ;;  %v2979_v7 = vpop.eup %2978  ;;  %2982 = vpow2.f32 %v1363_v56  ;;  %v974_v47 = vpop.permute.xlu0 %973  ;;  %v1039_v56 = vsel %vm1029_vm3, %v3975_v16, 0.0 }
 0x436   :  { %v2981_v18 = vpop.eup %2980 }
 0x437   :  { %v1415_v5 = vsel %vm1222_vm1, %v2981_v18, 0.0  ;;  %v1327_v18 = vsub.f32 %v3725_v43, %v4002_v48 }
 0x439   :  { %1067 = vadd.xlane.f32.xlu1 %v1066_v63  ;;  %v4037_v63 = vpop.xlane.xlu1 %1278 }
 0x43a   :  { %5307 = vst [vmem:[#allocation81_spill] sm:$0xff] %v4037_v63 }
 0x43d   :  { %1085 = vadd.xlane.f32.xlu1 %v1084_v42  ;;  %v1421_v42 = vsel %vm1222_vm1, %v2979_v7, 0.0  ;;  %v960_v46 = vpop.permute.xlu1 %959  ;;  %v1329_v7 = vsub.f32 %v3710_v22, %v3993_v0 }
 0x43f   :  { %1311 = vmax.xlane.f32.xlu0 %v1310_v24  ;;  %v1359_v24 = vmul.f32 1.442695, %v1323_v12  ;;  %v1371_v12 = vmul.f32 1.442695, %v1329_v7 }
 0x441   :  { %1079 = vadd.xlane.f32.xlu1 %v1078_v30  ;;  %v1096_v30 = vsel %vm1029_vm3, %v978_v37, 0.0  ;;  %2984 = vpow2.f32 %v1359_v24  ;;  %v1051_v37 = vsel %vm1029_vm3, %v3987_v32, 0.0  ;;  %v1045_v24 = vsel %vm1029_vm3, %v3997_v23, 0.0 }
 0x442   :  { %v2983_v16 = vpop.eup %2982  ;;  %2986 = vpow2.f32 %v1371_v12  ;;  %v1322_v32 = vsub.f32 %v3662_v40, %v3930_v51  ;;  %v1367_v23 = vmul.f32 1.442695, %v1327_v18 }
 0x443   :  { %1037 = vadd.xlane.f32.xlu0 %v1036_v31  ;;  %v4047_v31 = vpop.xlane.xlu0 %1287 }
 0x444   :  { %5308 = vst [vmem:[#allocation82_spill] sm:$0xff] %v4047_v31  ;;  %2988 = vpow2.f32 %v1367_v23 }
 0x445   :  { %1422 = vadd.xlane.f32.xlu1 %v1421_v42  ;;  %v4052_v42 = vpop.xlane.xlu1 %1272 }
 0x447   :  { %1031 = vadd.xlane.f32.xlu0 %v1030_v15  ;;  %v1090_v15 = vsel %vm1029_vm3, %v974_v47, 0.0  ;;  %v1063_v47 = vsel %vm1029_vm3, %v4005_v29, 0.0  ;;  %v1320_v29 = vsub.f32 %v3688_v62, %v3946_v59 }
 0x449   :  { %1097 = vadd.xlane.f32.xlu1 %v1096_v30  ;;  %v986_v30 = vpop.permute.xlu0 %985  ;;  %v1353_v23 = vmul.f32 1.442695, %v1320_v29 }
 0x44b   :  { %1040 = vadd.xlane.f32.xlu0 %v1039_v56  ;;  %v972_v56 = vpop.permute.xlu1 %971 }
 0x44d   :  { %1416 = vadd.xlane.f32.xlu1 %v1415_v5  ;;  %v1433_v5 = vsel %vm1222_vm1, %v2983_v16, 0.0  ;;  %v4062_v0 = vpop.xlane.xlu0 %1305  ;;  %v1057_v16 = vsel %vm1029_vm3, %v4018_v50, 0.0 }
 0x44e   :  { %5309 = vst [vmem:[#allocation83_spill] sm:$0xff] %v4062_v0  ;;  %v2985_v12 = vpop.eup %2984 }
 0x44f   :  { %1052 = vadd.xlane.f32.xlu0 %v1051_v37  ;;  %v4068_v7 = vpop.xlane.xlu1 %1290  ;;  %v1108_v37 = vsel %vm1029_vm3, %v986_v30, 0.0  ;;  %v1075_v30 = vsel %vm1029_vm3, %v4030_v6, 0.0  ;;  %v2987_v50 = vpop.eup %2986  ;;  %v1326_v6 = vsub.f32 %v3702_v14, %v3956_v13 }
 0x450   :  { %5310 = vst [vmem:[#allocation84_spill] sm:$0xff] %v4068_v7 }
 0x451   :  { %1091 = vadd.xlane.f32.xlu1 %v1090_v15  ;;  %v1357_v15 = vmul.f32 1.442695, %v1322_v32  ;;  %v1365_v29 = vmul.f32 1.442695, %v1326_v6 }
 0x453   :  { %1046 = vadd.xlane.f32.xlu0 %v1045_v24  ;;  %v982_v24 = vpop.permute.xlu0 %981  ;;  %v968_v48 = vpop.permute.xlu1 %967  ;;  %2990 = vpow2.f32 %v1357_v15 }
 0x454   :  { %v1102_v32 = vsel %vm1029_vm3, %v982_v24, 0.0  ;;  %2992 = vpow2.f32 %v1353_v23 }
 0x455   :  { %1434 = vadd.xlane.f32.xlu1 %v1433_v5  ;;  %v1427_v5 = vsel %vm1222_vm1, %v2985_v12, 0.0  ;;  %v1445_v12 = vsel %vm1222_vm1, %v2987_v50, 0.0  ;;  %2994 = vpow2.f32 %v1365_v29 }
 0x457   :  { %1064 = vadd.xlane.f32.xlu0 %v1063_v47  ;;  %v4081_v47 = vpop.xlane.xlu1 %1284 }
 0x458   :  { %5312 = vst [vmem:[#allocation86_spill] sm:$0xff] %v4081_v47 }
 0x459   :  { %1109 = vadd.xlane.f32.xlu1 %v1108_v37  ;;  %v1069_v37 = vsel %vm1029_vm3, %v960_v46, 0.0  ;;  %v1081_v46 = vsel %vm1029_vm3, %v968_v48, 0.0 }
 0x45b   :  { %1058 = vadd.xlane.f32.xlu0 %v1057_v16  ;;  %v1087_v16 = vsel %vm1029_vm3, %v972_v56, 0.0  ;;  %v1324_v56 = vsub.f32 %v3717_v38, %v3970_v55 }
 0x45d   :  { %1428 = vadd.xlane.f32.xlu1 %v1427_v5  ;;  %v980_v5 = vpop.permute.xlu1 %979 }
 0x45e   :  { %v4078_v18 = vpop.xlane.xlu0 %1299  ;;  %v1099_v6 = vsel %vm1029_vm3, %v980_v5, 0.0  ;;  %v1328_v5 = vsub.f32 %v3747_v45, %v3983_v35 }
 0x45f   :  { %5311 = vst [vmem:[#allocation85_spill] sm:$0xff] %v4078_v18  ;;  %1076 = vadd.xlane.f32.xlu0 %v1075_v30  ;;  %v2989_v30 = vpop.eup %2988 }
 0x460   :  { %v1439_v50 = vsel %vm1222_vm1, %v2989_v30, 0.0 }
 0x461   :  { %1103 = vadd.xlane.f32.xlu1 %v1102_v32  ;;  %v2991_v32 = vpop.eup %2990 }
 0x462   :  { %v994_v15 = vpop.permute.xlu0 %993  ;;  %v1424_v23 = vsel %vm1222_vm1, %v2991_v32, 0.0 }
 0x463   :  { %1070 = vadd.xlane.f32.xlu0 %v1069_v37  ;;  %v1120_v24 = vsel %vm1029_vm3, %v994_v15, 0.0  ;;  %v4090_v37 = vpop.xlane.xlu1 %1302  ;;  %v1361_v15 = vmul.f32 1.442695, %v1324_v56 }
 0x464   :  { %5313 = vst [vmem:[#allocation87_spill] sm:$0xff] %v4090_v37 }
 0x465   :  { %1446 = vadd.xlane.f32.xlu1 %v1445_v12  ;;  %2996 = vpow2.f32 %v1361_v15  ;;  %v1369_v15 = vmul.f32 1.442695, %v1328_v5 }
 0x467   :  { %1088 = vadd.xlane.f32.xlu0 %v1087_v16  ;;  %v976_v12 = vpop.permute.xlu1 %975  ;;  %v2993_v16 = vpop.eup %2992 }
 0x468   :  { %v1418_v30 = vsel %vm1222_vm1, %v2993_v16, 0.0  ;;  %v2995_v32 = vpop.eup %2994 }
 0x469   :  { %1121 = vadd.xlane.f32.xlu1 %v1120_v24  ;;  %v1330_v24 = vsub.f32 %v3732_v54, %v3977_v44  ;;  %v1436_v56 = vsel %vm1222_vm1, %v2995_v32, 0.0  ;;  %v1331_v32 = vsub.f32 %v3755_v11, %v4023_v25 }
 0x46b   :  { %1082 = vadd.xlane.f32.xlu0 %v1081_v46  ;;  %v4097_v48 = vpop.xlane.xlu1 %1296  ;;  %v1373_v29 = vmul.f32 1.442695, %v1330_v24  ;;  %v1093_v46 = vsel %vm1029_vm3, %v976_v12, 0.0  ;;  %v1333_v12 = vsub.f32 %v3740_v60, %v4012_v33 }
 0x46c   :  { %5314 = vst [vmem:[#allocation88_spill] sm:$0xff] %v4097_v48 }
 0x46d   :  { %1440 = vadd.xlane.f32.xlu1 %v1439_v50  ;;  %2998 = vpow2.f32 %v1373_v29 }
 0x46e   :  { %3000 = vpow2.f32 %v1369_v15  ;;  %v1375_v15 = vmul.f32 1.442695, %v1331_v32  ;;  %v1336_v32 = vsub.f32 %v3807_v8, %v4020_v21 }
 0x46f   :  { %1425 = vadd.xlane.f32.xlu0 %v1424_v23  ;;  %v988_v50 = vpop.permute.xlu1 %987 }
 0x472   :  { %v2997_v16 = vpop.eup %2996 }
 0x473   :  { %1100 = vadd.xlane.f32.xlu0 %v1099_v6  ;;  %v4106_v23 = vpop.xlane.xlu1 %1314  ;;  %v1111_v6 = vsel %vm1029_vm3, %v988_v50, 0.0  ;;  %v1430_v29 = vsel %vm1222_vm1, %v2997_v16, 0.0  ;;  %v1337_v16 = vsub.f32 %v3770_v26, %v4037_v63 }
 0x474   :  { %5315 = vst [vmem:[#allocation89_spill] sm:$0xff] %v4106_v23 }
 0x477   :  { %1419 = vadd.xlane.f32.xlu0 %v1418_v30  ;;  %v984_v24 = vpop.permute.xlu1 %983  ;;  %v1334_v30 = vsub.f32 %v3762_v17, %v3989_v36 }
 0x479   :  { %v1381_v50 = vmul.f32 1.442695, %v1334_v30 }
 0x47a   :  { %v2999_v33 = vpop.eup %2998 }
 0x47b   :  { %1094 = vadd.xlane.f32.xlu0 %v1093_v46  ;;  %v1379_v46 = vmul.f32 1.442695, %v1333_v12  ;;  %v4116_v5 = vpop.xlane.xlu1 %1308  ;;  %v1448_v36 = vsel %vm1222_vm1, %v2999_v33, 0.0 }
 0x47c   :  { %5316 = vst [vmem:[#allocation90_spill] sm:$0xff] %v4116_v5 }
 0x47d   :  { %3002 = vpow2.f32 %v1379_v46 }
 0x47e   :  { %3004 = vpow2.f32 %v1381_v50 }
 0x47f   :  { %1437 = vadd.xlane.f32.xlu0 %v1436_v56  ;;  %v1332_v56 = vsub.f32 %v3777_v57, %v3999_v20  ;;  %v996_v30 = vpop.permute.xlu1 %995  ;;  %3006 = vpow2.f32 %v1375_v15  ;;  %v1387_v20 = vmul.f32 1.442695, %v1337_v16  ;;  %v1385_v15 = vmul.f32 1.442695, %v1336_v32 }
 0x480   :  { %v1123_v50 = vsel %vm1029_vm3, %v996_v30, 0.0  ;;  %v1342_v16 = vsub.f32 %v3822_v28, %v4033_v27  ;;  %v1340_v32 = vsub.f32 %v3837_v2, %v4047_v31 }
 0x481   :  { %v1377_v12 = vmul.f32 1.442695, %v1332_v56  ;;  %v3001_v56 = vpop.eup %3000 }
 0x483   :  { %1112 = vadd.xlane.f32.xlu0 %v1111_v6  ;;  %v1105_v6 = vsel %vm1029_vm3, %v984_v24, 0.0  ;;  %v1335_v24 = vsub.f32 %v3785_v53, %v4052_v42  ;;  %3008 = vpow2.f32 %v1377_v12  ;;  %v1442_v12 = vsel %vm1222_vm1, %v3001_v56, 0.0 }
 0x484   :  { %3010 = vpow2.f32 %v1387_v20 }
 0x485   :  { %v1383_v33 = vmul.f32 1.442695, %v1335_v24 }
 0x487   :  { %1431 = vadd.xlane.f32.xlu0 %v1430_v29  ;;  %v1338_v29 = vsub.f32 %v3792_v58, %v4010_v52 }
 0x489   :  { %v1389_v46 = vmul.f32 1.442695, %v1338_v29  ;;  %v992_v29 = vpop.permute.xlu1 %991 }
 0x48a   :  { %v3003_v24 = vpop.eup %3002  ;;  %v1117_v27 = vsel %vm1029_vm3, %v992_v29, 0.0  ;;  %v1343_v29 = vsub.f32 %v3845_v1, %v4097_v48 }
 0x48b   :  { %1106 = vadd.xlane.f32.xlu0 %v1105_v6  ;;  %3012 = vpow2.f32 %v1389_v46  ;;  %v1397_v46 = vmul.f32 1.442695, %v1342_v16  ;;  %v3005_v56 = vpop.eup %3004 }
 0x48c   :  { %3014 = vpow2.f32 %v1383_v33  ;;  %v1345_v33 = vsub.f32 %v3830_v49, %v4090_v37  ;;  %v1460_v16 = vsel %vm1222_vm1, %v3005_v56, 0.0  ;;  %v1399_v56 = vmul.f32 1.442695, %v1343_v29 }
 0x48d   :  { %3016 = vpow2.f32 %v1385_v15  ;;  %v1346_v15 = vsub.f32 %v3854_v10, %v4062_v0 }
 0x48f   :  { %1449 = vadd.xlane.f32.xlu0 %v1448_v36  ;;  %v1341_v36 = vsub.f32 %v3800_v4, %v4068_v7  ;;  %v3007_v7 = vpop.eup %3006 }
 0x491   :  { %v1395_v30 = vmul.f32 1.442695, %v1341_v36  ;;  %v1457_v36 = vsel %vm1222_vm1, %v3003_v24, 0.0  ;;  %v1405_v24 = vmul.f32 1.442695, %v1346_v15 }
 0x493   :  { %1124 = vadd.xlane.f32.xlu0 %v1123_v50  ;;  %v4131_v6 = vpop.xlane.xlu0 %1317  ;;  %v1339_v50 = vsub.f32 %v3815_v19, %v4081_v47  ;;  %3018 = vpow2.f32 %v1395_v30  ;;  %v1451_v30 = vsel %vm1222_vm1, %v3007_v7, 0.0 }
 0x494   :  { %5317 = vst [vmem:[#allocation91_spill] sm:$0xff] %v4131_v6  ;;  %3020 = vpow2.f32 %v1397_v46  ;;  %v1344_v46 = vsub.f32 %v3903_v41, %v4078_v18  ;;  %v5327_v18 = vld [vmem:[#allocation38_spill] sm:$0xff] }
 0x496   :  { %v1401_v7 = vmul.f32 1.442695, %v1344_v46 }
 0x497   :  { %1443 = vadd.xlane.f32.xlu0 %v1442_v12  ;;  %v990_v52 = vpop.permute.xlu0 %989  ;;  %v1391_v12 = vmul.f32 1.442695, %v1339_v50 }
 0x498   :  { %v1114_v20 = vsel %vm1029_vm3, %v990_v52, 0.0  ;;  %v1393_v52 = vmul.f32 1.442695, %v1340_v32 }
 0x499   :  { %1115 = vadd.xlane.f32.xlu1 %v1114_v20  ;;  %v3009_v20 = vpop.eup %3008  ;;  %3022 = vpow2.f32 %v1391_v12  ;;  %v5318_v12 = vld [vmem:[#allocation48_spill] sm:$0xff] }
 0x49a   :  { %v3011_v50 = vpop.eup %3010  ;;  %3024 = vpow2.f32 %v1393_v52  ;;  %v1454_v32 = vsel %vm1222_vm1, %v3009_v20, 0.0  ;;  %v5319_v20 = vld [vmem:[#allocation66_spill] sm:$0xff] }
 0x49b   :  { %1118 = vadd.xlane.f32.xlu0 %v1117_v27  ;;  %v1403_v27 = vmul.f32 1.442695, %v1345_v33  ;;  %v1349_v33 = vsub.f32 %v5318_v12, %v4106_v23 }
 0x49d   :  { %1458 = vadd.xlane.f32.xlu1 %v1457_v36  ;;  %v3013_v36 = vpop.eup %3012  ;;  %3026 = vpow2.f32 %v1403_v27 }
 0x49e   :  { %v3015_v0 = vpop.eup %3014  ;;  %3028 = vpow2.f32 %v1405_v24  ;;  %v1472_v52 = vsel %vm1222_vm1, %v3013_v36, 0.0 }
 0x49f   :  { %1461 = vadd.xlane.f32.xlu0 %v1460_v16  ;;  %v1469_v16 = vsel %vm1222_vm1, %v3011_v50, 0.0  ;;  %v3017_v15 = vpop.eup %3016  ;;  %3030 = vpow2.f32 %v1399_v56  ;;  %v1463_v27 = vsel %vm1222_vm1, %v3015_v0, 0.0 }
 0x4a0   :  { %v3019_v29 = vpop.eup %3018  ;;  %3032 = vpow2.f32 %v1401_v7  ;;  %v1466_v50 = vsel %vm1222_vm1, %v3017_v15, 0.0 }
 0x4a1   :  { %1452 = vadd.xlane.f32.xlu1 %v1451_v30  ;;  %v1411_v30 = vmul.f32 1.442695, %v1349_v33  ;;  %v3021_v23 = vpop.eup %3020  ;;  %v1481_v36 = vsel %vm1222_vm1, %v3019_v29, 0.0  ;;  %v5320_v33 = vld [vmem:[#allocation69_spill] sm:$0xff] }
 0x4a2   :  { %v1484_v0 = vsel %vm1222_vm1, %v3021_v23, 0.0 }
 0x4a3   :  { %1455 = vadd.xlane.f32.xlu0 %v1454_v32  ;;  %v1347_v32 = vsub.f32 %v5319_v20, %v4116_v5  ;;  %3034 = vpow2.f32 %v1411_v30 }
 0x4a5   :  { %1470 = vadd.xlane.f32.xlu1 %v1469_v16  ;;  %v1407_v24 = vmul.f32 1.442695, %v1347_v32  ;;  %v1350_v16 = vsub.f32 %v5320_v33, %v4131_v6 }
 0x4a6   :  { %v3023_v56 = vpop.eup %3022 }
 0x4a7   :  { %1473 = vadd.xlane.f32.xlu0 %v1472_v52  ;;  %v3025_v52 = vpop.eup %3024  ;;  %3036 = vpow2.f32 %v1407_v24  ;;  %v1475_v7 = vsel %vm1222_vm1, %v3023_v56, 0.0  ;;  %v1413_v30 = vmul.f32 1.442695, %v1350_v16  ;;  %v5324_v16 = vld [vmem:[#allocation36_spill] sm:$0xff] }
 0x4a9   :  { %1464 = vadd.xlane.f32.xlu1 %v1463_v27  ;;  %v1478_v27 = vsel %vm1222_vm1, %v3025_v52, 0.0  ;;  %3038 = vpow2.f32 %v1413_v30 }
 0x4aa   :  { %v4164_v46 = vpop.xlane.xlu1 %1034  ;;  %v3027_v15 = vpop.eup %3026 }
 0x4ab   :  { %1467 = vadd.xlane.f32.xlu0 %v1466_v50  ;;  %v3029_v29 = vpop.eup %3028  ;;  %v5321_v50 = vld [vmem:[#allocation35_spill] sm:$0xff]  ;;  %v1493_v6 = vsel %vm1222_vm1, %v3027_v15, 0.0 }
 0x4ac   :  { %v3031_v23 = vpop.eup %3030  ;;  %v1496_v24 = vsel %vm1222_vm1, %v3029_v29, 0.0  ;;  %v5326_v15 = vld [vmem:[#allocation7_spill] sm:$0xff] }
 0x4ad   :  { %1482 = vadd.xlane.f32.xlu1 %v1481_v36  ;;  %v5322_v36 = vld [vmem:[#allocation10_spill] sm:$0xff]  ;;  %v3033_v56 = vpop.eup %3032 }
 0x4ae   :  { %v4171_v32 = vpop.xlane.xlu1 %1049  ;;  %vm1707_vm4 = vcmp.eq.s32.totalorder %v5322_v36, %v5321_v50  ;;  %vm1708_vm5 = vcmp.eq.s32.totalorder %v5322_v36, %v5324_v16  ;;  %v5325_v50 = vld [vmem:[#allocation37_spill] sm:$0xff]  ;;  %vm1709_vm7 = vcmp.eq.s32.totalorder %v5322_v36, %v5327_v18 }
 0x4af   :  { %1485 = vadd.xlane.f32.xlu0 %v1484_v0  ;;  %v5323_v0 = vmov 0.0   ;;  %vm1706_vm6 = vcmp.eq.s32.totalorder %v5322_v36, %v5325_v50 }
 0x4b0   :  { %v3035_v5 = vpop.eup %3034  ;;  %v2790_v29 = vsel %vm1708_vm5, 1.0, %v5323_v0  ;;  %v2788_v16 = vsel %vm1706_vm6, 1.0, %v5323_v0 }
 0x4b1   :  { %1476 = vadd.xlane.f32.xlu1 %v1475_v7  ;;  %v2789_v7 = vsel %vm1707_vm4, 1.0, %v5323_v0  ;;  %v1802_v50 = vmul.f32 %v2788_v16, %v3688_v62  ;;  %v5329_v16 = vld [vmem:[#allocation46_spill] sm:$0xff] }
 0x4b2   :  { %v4181_v52 = vpop.xlane.xlu1 %1043  ;;  %v1803_v30 = vmul.f32 %v2789_v7, %v5326_v15  ;;  %vm1713_vm9 = vcmp.eq.s32.totalorder %v5322_v36, %v5329_v16 }
 0x4b3   :  { %1479 = vadd.xlane.f32.xlu0 %v1478_v27  ;;  %v1487_v27 = vsel %vm1222_vm1, %v3031_v23, 0.0 }
 0x4b4   :  { %v3037_v37 = vpop.eup %3036 }
 0x4b5   :  { %1494 = vadd.xlane.f32.xlu1 %v1493_v6  ;;  %v1490_v6 = vsel %vm1222_vm1, %v3033_v56, 0.0  ;;  %v1804_v56 = vmul.f32 %v2790_v29, %v3662_v40  ;;  %v1499_v7 = vsel %vm1222_vm1, %v3037_v37, 0.0 }
 0x4b6   :  { %v4193_v23 = vpop.xlane.xlu1 %1061  ;;  %v3039_v18 = vpop.eup %3038 }
 0x4b7   :  { %1497 = vadd.xlane.f32.xlu0 %v1496_v24  ;;  %v1505_v24 = vsel %vm1222_vm1, %v3035_v5, 0.0  ;;  %v2791_v5 = vsel %vm1709_vm7, 1.0, %v5323_v0 }
 0x4b8   :  { %v1805_v29 = vmul.f32 %v2791_v5, %v3695_v9  ;;  %v5331_v5 = vld [vmem:[#allocation39_spill] sm:$0xff] }
 0x4b9   :  { %1488 = vadd.xlane.f32.xlu1 %v1487_v27  ;;  %v1839_v27 = vsel %vm1222_vm1, %v1803_v30, 0.0  ;;  %v1836_v30 = vsel %vm1222_vm1, %v1802_v50, 0.0  ;;  %vm1715_vm10 = vcmp.eq.s32.totalorder %v5322_v36, %v5331_v5 }
 0x4ba   :  { %v4203_v15 = vpop.xlane.xlu1 %1055 }
 0x4bb   :  { %1491 = vadd.xlane.f32.xlu0 %v1490_v6  ;;  %v5328_v6 = vld [vmem:[#allocation42_spill] sm:$0xff] }
 0x4bc   :  { %vm1711_vm8 = vcmp.eq.s32.totalorder %v5322_v36, %v5328_v6 }
 0x4bd   :  { %1506 = vadd.xlane.f32.xlu1 %v1505_v24  ;;  %v1842_v24 = vsel %vm1222_vm1, %v1804_v56, 0.0  ;;  %v2793_v37 = vsel %vm1711_vm8, 1.0, %v5323_v0  ;;  %v1845_v56 = vsel %vm1222_vm1, %v1805_v29, 0.0 }
 0x4be   :  { %v1807_v6 = vmul.f32 %v2793_v37, %v3681_v39  ;;  %v2797_v37 = vsel %vm1715_vm10, 1.0, %v5323_v0  ;;  %v5332_v39 = vld [vmem:[#allocation41_spill] sm:$0xff] }
 0x4bf   :  { %1840 = vadd.xlane.f32.xlu0 %v1839_v27  ;;  %v1508_v27 = vsel %vm1222_vm1, %v3039_v18, 0.0  ;;  %vm1717_vm11 = vcmp.eq.s32.totalorder %v5322_v36, %v5332_v39 }
 0x4c0   :  { %v2799_v40 = vsel %vm1717_vm11, 1.0, %v5323_v0 }
 0x4c1   :  { %1500 = vadd.xlane.f32.xlu1 %v1499_v7  ;;  %v1813_v39 = vmul.f32 %v2799_v40, %v3755_v11  ;;  %v5336_v40 = vld [vmem:[#allocation44_spill] sm:$0xff]  ;;  %v5337_v11 = vld [vmem:[#allocation47_spill] sm:$0xff] }
 0x4c2   :  { %vm1712_vm15 = vcmp.eq.s32.totalorder %v5322_v36, %v5336_v40  ;;  %vm1723_vm0 = vcmp.eq.s32.totalorder %v5322_v36, %v5337_v11 }
 0x4c3   :  { %1843 = vadd.xlane.f32.xlu0 %v1842_v24  ;;  %v2795_v24 = vsel %vm1713_vm9, 1.0, %v5323_v0  ;;  %v2805_v11 = vsel %vm1723_vm0, 1.0, %v5323_v0 }
 0x4c4   :  { %v1809_v29 = vmul.f32 %v2795_v24, %v3725_v43 }
 0x4c5   :  { %1837 = vadd.xlane.f32.xlu1 %v1836_v30  ;;  %v4220_v30 = vpop.xlane.xlu1 %1073 }
 0x4c6   :  { %v1857_v5 = vsel %vm1222_vm1, %v1809_v29, 0.0  ;;  %v5335_v29 = vld [vmem:[#allocation45_spill] sm:$0xff] }
 0x4c7   :  { %1509 = vadd.xlane.f32.xlu0 %v1508_v27  ;;  %v1851_v27 = vsel %vm1222_vm1, %v1807_v6, 0.0  ;;  %v5333_v6 = vld [vmem:[#allocation43_spill] sm:$0xff]  ;;  %vm1721_vm14 = vcmp.eq.s32.totalorder %v5322_v36, %v5335_v29 }
 0x4c8   :  { %v4211_v7 = vpop.xlane.xlu0 %1311  ;;  %vm1719_vm12 = vcmp.eq.s32.totalorder %v5322_v36, %v5333_v6 }
 0x4c9   :  { %5330 = vst [vmem:[#allocation35_spill] sm:$0xff] %v4211_v7  ;;  %v1348_v50 = vsub.f32 %v3961_v3, %v4211_v7  ;;  %1846 = vadd.xlane.f32.xlu1 %v1845_v56  ;;  %v4229_v56 = vpop.xlane.xlu1 %1067  ;;  %v2801_v43 = vsel %vm1719_vm12, 1.0, %v5323_v0  ;;  %v2794_v7 = vsel %vm1712_vm15, 1.0, %v5323_v0 }
 0x4cb   :  { %v1409_v16 = vmul.f32 1.442695, %v1348_v50  ;;  %v1811_v50 = vmul.f32 %v2797_v37, %v3710_v22  ;;  %v1869_v22 = vsel %vm1222_vm1, %v1813_v39, 0.0 }
 0x4cc   :  { %v4222_v18 = vpop.xlane.xlu0 %1037 }
 0x4cd   :  { %3040 = vpow2.f32 %v1409_v16  ;;  %1852 = vadd.xlane.f32.xlu1 %v1851_v27  ;;  %v1863_v16 = vsel %vm1222_vm1, %v1811_v50, 0.0  ;;  %v5334_v27 = vld [vmem:[#allocation40_spill] sm:$0xff]  ;;  %v4247_v37 = vpop.xlane.xlu1 %1085  ;;  %v1815_v50 = vmul.f32 %v2801_v43, %v3740_v60  ;;  %v1808_v60 = vmul.f32 %v2794_v7, %v3702_v14 }
 0x4ce   :  { %vm1710_vm13 = vcmp.eq.s32.totalorder %v5322_v36, %v5334_v27  ;;  %v2803_v27 = vsel %vm1721_vm14, 1.0, %v5323_v0 }
 0x4cf   :  { %v1875_v39 = vsel %vm1222_vm1, %v1815_v50, 0.0  ;;  %v1817_v40 = vmul.f32 %v2803_v27, %v3785_v53  ;;  %v1819_v27 = vmul.f32 %v2805_v11, %v3770_v26  ;;  %v1854_v7 = vsel %vm1222_vm1, %v1808_v60, 0.0  ;;  %v5342_v26 = vld [vmem:[#allocation54_spill] sm:$0xff] }
 0x4d0   :  { %v4231_v9 = vpop.xlane.xlu0 %1031  ;;  %vm1718_vm6 = vcmp.eq.s32.totalorder %v5322_v36, %v5342_v26 }
 0x4d1   :  { %1858 = vadd.xlane.f32.xlu1 %v1857_v5  ;;  %v2792_v5 = vsel %vm1710_vm13, 1.0, %v5323_v0  ;;  %v4262_v48 = vpop.xlane.xlu1 %1079  ;;  %v1881_v50 = vsel %vm1222_vm1, %v1817_v40, 0.0  ;;  %v1887_v11 = vsel %vm1222_vm1, %v1819_v27, 0.0 }
 0x4d2   :  { %v1806_v62 = vmul.f32 %v2792_v5, %v3717_v38 }
 0x4d4   :  { %v4238_v24 = vpop.xlane.xlu0 %1040  ;;  %v1848_v5 = vsel %vm1222_vm1, %v1806_v62, 0.0 }
 0x4d5   :  { %1864 = vadd.xlane.f32.xlu1 %v1863_v16  ;;  %v4285_v62 = vpop.xlane.xlu1 %1422 }
 0x4d8   :  { %v4250_v6 = vpop.xlane.xlu0 %1052 }
 0x4d9   :  { %1870 = vadd.xlane.f32.xlu1 %v1869_v22  ;;  %v5338_v22 = vld [vmem:[#allocation49_spill] sm:$0xff] }
 0x4da   :  { %v3041_v16 = vpop.eup %3040  ;;  %vm1714_vm2 = vcmp.eq.s32.totalorder %v5322_v36, %v5338_v22  ;;  %v5340_v22 = vld [vmem:[#allocation51_spill] sm:$0xff] }
 0x4db   :  { %v1502_v29 = vsel %vm1222_vm1, %v3041_v16, 0.0  ;;  %v5339_v16 = vld [vmem:[#allocation50_spill] sm:$0xff]  ;;  %vm1716_vm4 = vcmp.eq.s32.totalorder %v5322_v36, %v5340_v22 }
 0x4dc   :  { %1503 = vadd.xlane.f32.xlu0 %v1502_v29  ;;  %v4264_v43 = vpop.xlane.xlu0 %1046  ;;  %vm1725_vm3 = vcmp.eq.s32.totalorder %v5322_v36, %v5339_v16  ;;  %v2796_v29 = vsel %vm1714_vm2, 1.0, %v5323_v0  ;;  %v5341_v16 = vld [vmem:[#allocation52_spill] sm:$0xff]  ;;  %v2798_v53 = vsel %vm1716_vm4, 1.0, %v5323_v0 }
 0x4dd   :  { %1876 = vadd.xlane.f32.xlu1 %v1875_v39  ;;  %v2807_v39 = vsel %vm1725_vm3, 1.0, %v5323_v0  ;;  %vm1727_vm5 = vcmp.eq.s32.totalorder %v5322_v36, %v5341_v16  ;;  %v5343_v16 = vld [vmem:[#allocation55_spill] sm:$0xff] }
 0x4de   :  { %v1821_v22 = vmul.f32 %v2807_v39, %v3815_v19  ;;  %vm1729_vm7 = vcmp.eq.s32.totalorder %v5322_v36, %v5343_v16  ;;  %v5344_v19 = vld [vmem:[#allocation56_spill] sm:$0xff] }
 0x4df   :  { %vm1720_vm8 = vcmp.eq.s32.totalorder %v5322_v36, %v5344_v19 }
 0x4e0   :  { %1849 = vadd.xlane.f32.xlu0 %v1848_v5  ;;  %v4276_v38 = vpop.xlane.xlu0 %1064  ;;  %v1810_v5 = vmul.f32 %v2796_v29, %v3747_v45  ;;  %v1812_v29 = vmul.f32 %v2798_v53, %v3732_v54  ;;  %v4302_v45 = vpop.xlane.xlu1 %1097  ;;  %v1893_v39 = vsel %vm1222_vm1, %v1821_v22, 0.0 }
 0x4e1   :  { %1882 = vadd.xlane.f32.xlu1 %v1881_v50  ;;  %v2809_v50 = vsel %vm1727_vm5, 1.0, %v5323_v0 }
 0x4e2   :  { %v1860_v60 = vsel %vm1222_vm1, %v1810_v5, 0.0  ;;  %v1823_v26 = vmul.f32 %v2809_v50, %v3800_v4  ;;  %v5345_v5 = vld [vmem:[#allocation57_spill] sm:$0xff]  ;;  %v1866_v53 = vsel %vm1222_vm1, %v1812_v29, 0.0  ;;  %v5347_v29 = vld [vmem:[#allocation58_spill] sm:$0xff] }
 0x4e3   :  { %vm1731_vm9 = vcmp.eq.s32.totalorder %v5322_v36, %v5345_v5  ;;  %vm1722_vm11 = vcmp.eq.s32.totalorder %v5322_v36, %v5347_v29  ;;  %v5349_v29 = vld [vmem:[#allocation61_spill] sm:$0xff] }
 0x4e4   :  { %1855 = vadd.xlane.f32.xlu0 %v1854_v7  ;;  %v4290_v40 = vpop.xlane.xlu0 %1058  ;;  %v2800_v7 = vsel %vm1718_vm6, 1.0, %v5323_v0  ;;  %v1899_v22 = vsel %vm1222_vm1, %v1823_v26, 0.0  ;;  %v2813_v19 = vsel %vm1731_vm9, 1.0, %v5323_v0  ;;  %v4323_v5 = vpop.xlane.xlu1 %1416  ;;  %vm1735_vm13 = vcmp.eq.s32.totalorder %v5322_v36, %v5349_v29 }
 0x4e5   :  { %1888 = vadd.xlane.f32.xlu1 %v1887_v11  ;;  %v2811_v11 = vsel %vm1729_vm7, 1.0, %v5323_v0  ;;  %v1814_v16 = vmul.f32 %v2800_v7, %v3777_v57 }
 0x4e6   :  { %v1825_v50 = vmul.f32 %v2811_v11, %v3845_v1  ;;  %v1827_v11 = vmul.f32 %v2813_v19, %v3830_v49  ;;  %v2804_v1 = vsel %vm1722_vm11, 1.0, %v5323_v0  ;;  %v2817_v49 = vsel %vm1735_vm13, 1.0, %v5323_v0 }
 0x4e7   :  { %v1872_v7 = vsel %vm1222_vm1, %v1814_v16, 0.0 }
 0x4e8   :  { %1861 = vadd.xlane.f32.xlu0 %v1860_v60  ;;  %v4304_v27 = vpop.xlane.xlu0 %1076  ;;  %v2802_v60 = vsel %vm1720_vm8, 1.0, %v5323_v0  ;;  %v1905_v26 = vsel %vm1222_vm1, %v1825_v50, 0.0  ;;  %v4342_v50 = vpop.xlane.xlu1 %1091 }
 0x4e9   :  { %1894 = vadd.xlane.f32.xlu1 %v1893_v39  ;;  %v5346_v39 = vld [vmem:[#allocation59_spill] sm:$0xff] }
 0x4ea   :  { %vm1733_vm10 = vcmp.eq.s32.totalorder %v5322_v36, %v5346_v39 }
 0x4eb   :  { %v2815_v39 = vsel %vm1733_vm10, 1.0, %v5323_v0 }
 0x4ec   :  { %1867 = vadd.xlane.f32.xlu0 %v1866_v53  ;;  %v4316_v54 = vpop.xlane.xlu0 %1070  ;;  %v1816_v53 = vmul.f32 %v2802_v60, %v3762_v17  ;;  %v1818_v60 = vmul.f32 %v2804_v1, %v3807_v8  ;;  %v5350_v17 = vld [vmem:[#allocation62_spill] sm:$0xff]  ;;  %v1831_v8 = vmul.f32 %v2817_v49, %v5318_v12 }
 0x4ed   :  { %1900 = vadd.xlane.f32.xlu1 %v1899_v22  ;;  %v5348_v22 = vld [vmem:[#allocation60_spill] sm:$0xff]  ;;  %vm1726_vm14 = vcmp.eq.s32.totalorder %v5322_v36, %v5350_v17 }
 0x4ee   :  { %vm1724_vm12 = vcmp.eq.s32.totalorder %v5322_v36, %v5348_v22  ;;  %v1878_v16 = vsel %vm1222_vm1, %v1816_v53, 0.0  ;;  %v1911_v22 = vsel %vm1222_vm1, %v1827_v11, 0.0  ;;  %v1884_v53 = vsel %vm1222_vm1, %v1818_v60, 0.0 }
 0x4ef   :  { %v2808_v11 = vsel %vm1726_vm14, 1.0, %v5323_v0 }
 0x4f0   :  { %1873 = vadd.xlane.f32.xlu0 %v1872_v7  ;;  %v4329_v4 = vpop.xlane.xlu0 %1088  ;;  %v2806_v7 = vsel %vm1724_vm12, 1.0, %v5323_v0  ;;  %v1822_v60 = vmul.f32 %v2808_v11, %v3837_v2 }
 0x4f1   :  { %1906 = vadd.xlane.f32.xlu1 %v1905_v26  ;;  %v1829_v26 = vmul.f32 %v2815_v39, %v5319_v20  ;;  %v1820_v1 = vmul.f32 %v2806_v7, %v3792_v58  ;;  %v4358_v39 = vpop.xlane.xlu1 %1434  ;;  %v5354_v20 = vld [vmem:[#allocation68_spill] sm:$0xff] }
 0x4f2   :  { %vm1734_vm3 = vcmp.eq.s32.totalorder %v5322_v36, %v5354_v20 }
 0x4f3   :  { %v1890_v17 = vsel %vm1222_vm1, %v1820_v1, 0.0 }
 0x4f4   :  { %1879 = vadd.xlane.f32.xlu0 %v1878_v16  ;;  %v4344_v19 = vpop.xlane.xlu0 %1082  ;;  %v1917_v16 = vsel %vm1222_vm1, %v1829_v26, 0.0  ;;  %v5352_v26 = vld [vmem:[#allocation65_spill] sm:$0xff] }
 0x4f5   :  { %1912 = vadd.xlane.f32.xlu1 %v1911_v22  ;;  %v5351_v22 = vld [vmem:[#allocation63_spill] sm:$0xff]  ;;  %vm1730_vm0 = vcmp.eq.s32.totalorder %v5322_v36, %v5352_v26 }
 0x4f6   :  { %vm1728_vm15 = vcmp.eq.s32.totalorder %v5322_v36, %v5351_v22  ;;  %v4372_v22 = vpop.xlane.xlu1 %1109  ;;  %v2812_v11 = vsel %vm1730_vm0, 1.0, %v5323_v0 }
 0x4f7   :  { %v2810_v49 = vsel %vm1728_vm15, 1.0, %v5323_v0 }
 0x4f8   :  { %1885 = vadd.xlane.f32.xlu0 %v1884_v53  ;;  %v4353_v29 = vpop.xlane.xlu0 %1425  ;;  %v1923_v53 = vsel %vm1222_vm1, %v1831_v8, 0.0  ;;  %v1824_v12 = vmul.f32 %v2810_v49, %v3822_v28 }
 0x4f9   :  { %1918 = vadd.xlane.f32.xlu1 %v1917_v16  ;;  %v1896_v16 = vsel %vm1222_vm1, %v1822_v60, 0.0 }
 0x4fa   :  { %v1902_v8 = vsel %vm1222_vm1, %v1824_v12, 0.0  ;;  %v4384_v49 = vpop.xlane.xlu1 %1428  ;;  %v1126_v12 = vld [vmem:[%s5159_s4] sm:$0xff] }
 0x4fc   :  { %1891 = vadd.xlane.f32.xlu0 %v1890_v17  ;;  %v4364_v7 = vpop.xlane.xlu0 %1100  ;;  %v5353_v17 = vld [vmem:[#allocation67_spill] sm:$0xff] }
 0x4fd   :  { %1924 = vadd.xlane.f32.xlu1 %v1923_v53  ;;  %vm1732_vm2 = vcmp.eq.s32.totalorder %v5322_v36, %v5353_v17  ;;  %v1826_v53 = vmul.f32 %v2812_v11, %v3903_v41  ;;  %v2816_v11 = vsel %vm1734_vm3, 1.0, %v5323_v0 }
 0x4fe   :  { %v2814_v60 = vsel %vm1732_vm2, 1.0, %v5323_v0  ;;  %v1830_v20 = vmul.f32 %v2816_v11, %v3961_v3  ;;  %v4401_v2 = vpop.xlane.xlu1 %1103 }
 0x4ff   :  { %v1828_v28 = vmul.f32 %v2814_v60, %v3854_v10 }
 0x500   :  { %1897 = vadd.xlane.f32.xlu0 %v1896_v16  ;;  %v4374_v1 = vpop.xlane.xlu0 %1419  ;;  %v1908_v16 = vsel %vm1222_vm1, %v1826_v53, 0.0  ;;  %v1158_v53 = vmul.f32 %v1126_v12, %v4231_v9 }
 0x501   :  { %v1914_v41 = vsel %vm1222_vm1, %v1828_v28, 0.0  ;;  %3042 = vlog2.f32 %v4374_v1  ;;  %v1140_v1 = vld [vmem:[%s5159_s4 + $0x70] sm:$0xff] }
 0x502   :  { %v4417_v12 = vpop.xlane.xlu1 %1446  ;;  %3044 = vlog2.f32 %v4353_v29 }
 0x503   :  { %3046 = vlog2.f32 %v4323_v5 }
 0x504   :  { %1903 = vadd.xlane.f32.xlu0 %v1902_v8  ;;  %v4381_v26 = vpop.xlane.xlu0 %1094  ;;  %v5355_v8 = vld [vmem:[#allocation70_spill] sm:$0xff]  ;;  %3048 = vlog2.f32 %v4285_v62 }
 0x505   :  { %vm1736_vm4 = vcmp.eq.s32.totalorder %v5322_v36, %v5355_v8  ;;  %v1920_v8 = vsel %vm1222_vm1, %v1830_v20, 0.0  ;;  %3050 = vlog2.f32 %v4384_v49  ;;  %v1152_v49 = vld [vmem:[%s5159_s4 + $0xd0] sm:$0xff] }
 0x506   :  { %v2818_v10 = vsel %vm1736_vm4, 1.0, %v5323_v0 }
 0x507   :  { %v1832_v28 = vmul.f32 %v2818_v10, %v5320_v33  ;;  %v1131_v10 = vld [vmem:[%s5159_s4 + $0x28] sm:$0xff] }
 0x508   :  { %1909 = vadd.xlane.f32.xlu0 %v1908_v16  ;;  %v4390_v17 = vpop.xlane.xlu0 %1437  ;;  %v1128_v16 = vld [vmem:[%s5159_s4 + $0x10] sm:$0xff]  ;;  %v1127_v33 = vld [vmem:[%s5159_s4 + $0x8] sm:$0xff] }
 0x509   :  { %v1160_v11 = vmul.f32 %v1128_v16, %v4222_v18  ;;  %v1926_v3 = vsel %vm1222_vm1, %v1832_v28, 0.0  ;;  %v1163_v18 = vmul.f32 %v1131_v10, %v4264_v43  ;;  %v4427_v16 = vpop.xlane.xlu1 %1121  ;;  %v1133_v28 = vld [vmem:[%s5159_s4 + $0x38] sm:$0xff] }
 0x50a   :  { %v1137_v10 = vld [vmem:[%s5159_s4 + $0x58] sm:$0xff] }
 0x50c   :  { %1915 = vadd.xlane.f32.xlu0 %v1914_v41  ;;  %v4403_v60 = vpop.xlane.xlu0 %1112  ;;  %v1129_v41 = vld [vmem:[%s5159_s4 + $0x18] sm:$0xff] }
 0x50e   :  { %2096 = vperm.xlu1 %2936, %v1158_v53   ;;  %v1161_v53 = vmul.f32 %v1129_v41, %v4238_v24  ;;  %v4440_v41 = vpop.xlane.xlu1 %1440 }
 0x510   :  { %1921 = vadd.xlane.f32.xlu0 %v1920_v8  ;;  %v4412_v9 = vpop.xlane.xlu0 %1431 }
 0x511   :  { %3052 = vlog2.f32 %v4412_v9 }
 0x512   :  { %2106 = vperm.xlu1 %2936, %v1160_v11   ;;  %v1135_v11 = vld [vmem:[%s5159_s4 + $0x48] sm:$0xff]  ;;  %3054 = vlog2.f32 %v4358_v39  ;;  %v1184_v39 = vmul.f32 %v1152_v49, %v4372_v22 }
 0x513   :  { %v1167_v43 = vmul.f32 %v1135_v11, %v4290_v40  ;;  %v1139_v40 = vld [vmem:[%s5159_s4 + $0x68] sm:$0xff]  ;;  %v1159_v11 = vmul.f32 %v1127_v33, %v4164_v46  ;;  %3056 = vlog2.f32 %v4390_v17 }
 0x514   :  { %1927 = vadd.xlane.f32.xlu0 %v1926_v3  ;;  %v4421_v20 = vpop.xlane.xlu0 %1106  ;;  %v1165_v3 = vmul.f32 %v1133_v28, %v4250_v6  ;;  %v1169_v6 = vmul.f32 %v1137_v10, %v4276_v38  ;;  %v1171_v58 = vmul.f32 %v1139_v40, %v4316_v54  ;;  %v1130_v38 = vld [vmem:[%s5159_s4 + $0x20] sm:$0xff]  ;;  %v1141_v10 = vld [vmem:[%s5159_s4 + $0x78] sm:$0xff]  ;;  %v1132_v54 = vld [vmem:[%s5159_s4 + $0x30] sm:$0xff]  ;;  %3058 = vlog2.f32 %v4440_v41 }
 0x515   :  { %v1173_v46 = vmul.f32 %v1141_v10, %v4304_v27  ;;  %v1143_v40 = vld [vmem:[%s5159_s4 + $0x88] sm:$0xff]  ;;  %v1134_v27 = vld [vmem:[%s5159_s4 + $0x40] sm:$0xff]  ;;  %v1156_v41 = vld [vmem:[%s5159_s4 + $0xf0] sm:$0xff] }
 0x516   :  { %2111 = vperm.xlu1 %2936, %v1161_v53  }
 0x518   :  { %v4429_v8 = vpop.xlane.xlu0 %1449 }
 0x51a   :  { %2121 = vperm.xlu1 %2936, %v1163_v18  }
 0x51c   :  { %v4435_v24 = vpop.xlane.xlu0 %1124 }
 0x51e   :  { %2131 = vperm.xlu1 %2936, %v1165_v3  }
 0x520   :  { %v4443_v53 = vpop.xlane.xlu0 %1443 }
 0x521   :  { %3060 = vlog2.f32 %v4443_v53  ;;  %v3108_v53 = vld [vmem:[%s5160_s5] sm:$0xff] }
 0x522   :  { %v4448_v18 = vpop.xlane.xlu1 %1115  ;;  %2141 = vperm.xlu1 %2936, %v1167_v43   ;;  %3062 = vlog2.f32 %v4417_v12  ;;  %vm1929_vm6 = vcmp.ge.s32.totalorder %v3108_v53, 0  ;;  %v3112_v53 = vld [vmem:[%s5160_s5 + $0x30] sm:$0xff] }
 0x523   :  { %3064 = vlog2.f32 %v4429_v8  ;;  %v3109_v8 = vld [vmem:[%s5160_s5 + $0x10] sm:$0xff]  ;;  %vm1935_vm10 = vcmp.ge.s32.totalorder %v3112_v53, 0 }
 0x524   :  { %v4451_v28 = vpop.xlane.xlu0 %1118  ;;  %vm1931_vm7 = vcmp.ge.s32.totalorder %v3109_v8, 0 }
 0x526   :  { %v4459_v3 = vpop.xlane.xlu1 %1458  ;;  %2151 = vperm.xlu1 %2936, %v1169_v6   ;;  %v1162_v6 = vmul.f32 %v1130_v38, %v4181_v52  ;;  %v1175_v52 = vmul.f32 %v1143_v40, %v4344_v19  ;;  %v1145_v38 = vld [vmem:[%s5159_s4 + $0x98] sm:$0xff]  ;;  %v1136_v19 = vld [vmem:[%s5159_s4 + $0x50] sm:$0xff] }
 0x528   :  { %v4463_v43 = vpop.xlane.xlu0 %1461 }
 0x52a   :  { %v4471_v57 = vpop.xlane.xlu1 %1452  ;;  %2101 = vperm.xlu0 %2937, %v1159_v11   ;;  %2161 = vperm.xlu1 %2936, %v1171_v58   ;;  %v1164_v58 = vmul.f32 %v1132_v54, %v4171_v32  ;;  %v1177_v32 = vmul.f32 %v1145_v38, %v4329_v4  ;;  %v1147_v54 = vld [vmem:[%s5159_s4 + $0xa8] sm:$0xff]  ;;  %v1138_v4 = vld [vmem:[%s5159_s4 + $0x60] sm:$0xff] }
 0x52b   :  { %3066 = vlog2.f32 %v4471_v57  ;;  %v2821_v57 = vsel %vm1931_vm7, 1.0, %v5323_v0 }
 0x52c   :  { %v4475_v33 = vpop.xlane.xlu0 %1455 }
 0x52d   :  { %3068 = vlog2.f32 %v4475_v33  ;;  %v3110_v33 = vld [vmem:[%s5160_s5 + $0x20] sm:$0xff] }
 0x52e   :  { %v4483_v14 = vpop.xlane.xlu1 %1470  ;;  %2116 = vperm.xlu0 %2937, %v1162_v6   ;;  %2171 = vperm.xlu1 %2936, %v1173_v46   ;;  %v1166_v6 = vmul.f32 %v1134_v27, %v4203_v15  ;;  %v1179_v15 = vmul.f32 %v1147_v54, %v4381_v26  ;;  %v1149_v27 = vld [vmem:[%s5159_s4 + $0xb8] sm:$0xff]  ;;  %3070 = vlog2.f32 %v4459_v3  ;;  %vm1933_vm8 = vcmp.ge.s32.totalorder %v3110_v33, 0 }
 0x52f   :  { %3072 = vlog2.f32 %v4463_v43  ;;  %v5361_v43 = vld [vmem:[#allocation73_spill] sm:$0xff] }
 0x530   :  { %v4487_v11 = vpop.xlane.xlu0 %1473 }
 0x532   :  { %v4495_v10 = vpop.xlane.xlu1 %1464  ;;  %2126 = vperm.xlu0 %2937, %v1164_v58   ;;  %2181 = vperm.xlu1 %2936, %v1175_v52   ;;  %v1168_v58 = vmul.f32 %v1136_v19, %v4193_v23  ;;  %v5356_v23 = vld [vmem:[#allocation5_spill] sm:$0xff]  ;;  %v1181_v19 = vmul.f32 %v1149_v27, %v4364_v7 }
 0x534   :  { %v4499_v46 = vpop.xlane.xlu0 %1467 }
 0x536   :  { %v4507_v40 = vpop.xlane.xlu1 %1482  ;;  %2136 = vperm.xlu0 %2937, %v1166_v6   ;;  %2191 = vperm.xlu1 %2936, %v1177_v32   ;;  %v357_v6 = vpop.f32.mrf.mxu0  ;;  %v1170_v32 = vmul.f32 %v1138_v4, %v4229_v56  ;;  %v1172_v4 = vmul.f32 %v1140_v1, %v4220_v30 }
 0x537   :  { %v358_v26 = vadd.f32 %v357_v6, %v5356_v23 }
 0x538   :  { %v4511_v52 = vpop.xlane.xlu0 %1485  ;;  %v359_v36 = vpop.f32.mrf.mxu0 }
 0x539   :  { %2609 = vst [vmem:[#allocation2] sm:$0xff] %v358_v26  ;;  %v1142_v26 = vld [vmem:[%s5159_s4 + $0x80] sm:$0xff] }
 0x53a   :  { %v4520_v38 = vpop.xlane.xlu1 %1476  ;;  %2146 = vperm.xlu0 %2937, %v1168_v58   ;;  %2201 = vperm.xlu1 %2936, %v1179_v15   ;;  %v1151_v58 = vld [vmem:[%s5159_s4 + $0xc8] sm:$0xff]  ;;  %v361_v56 = vpop.f32.mrf.mxu0  ;;  %v1174_v1 = vmul.f32 %v1142_v26, %v4262_v48 }
 0x53b   :  { %v5357_v15 = vld [vmem:[#allocation6_spill] sm:$0xff]  ;;  %v362_v7 = vadd.f32 %v361_v56, %v5356_v23  ;;  %v1183_v27 = vmul.f32 %v1151_v58, %v4421_v20 }
 0x53c   :  { %v4526_v54 = vpop.xlane.xlu0 %1479  ;;  %v360_v29 = vadd.f32 %v359_v36, %v5357_v15  ;;  %v363_v47 = vpop.f32.mrf.mxu0  ;;  %v1153_v36 = vld [vmem:[%s5159_s4 + $0xd8] sm:$0xff] }
 0x53d   :  { %2612 = vst [vmem:[#allocation2 + $0x18] sm:$0xff] %v362_v7  ;;  %v1185_v58 = vmul.f32 %v1153_v36, %v4403_v60  ;;  %v1144_v7 = vld [vmem:[%s5159_s4 + $0x90] sm:$0xff] }
 0x53e   :  { %v4535_v31 = vpop.xlane.xlu1 %1494  ;;  %2156 = vperm.xlu0 %2937, %v1170_v32   ;;  %2211 = vperm.xlu1 %2936, %v1181_v19   ;;  %2610 = vst [vmem:[#allocation2 + $0x8] sm:$0xff] %v360_v29  ;;  %v364_v32 = vadd.f32 %v363_v47, %v5357_v15  ;;  %v367_v30 = vpop.f32.mrf.mxu0  ;;  %v1155_v47 = vld [vmem:[%s5159_s4 + $0xe8] sm:$0xff]  ;;  %v1176_v36 = vmul.f32 %v1144_v7, %v4247_v37 }
 0x53f   :  { %v368_v20 = vadd.f32 %v367_v30, %v5356_v23  ;;  %v1187_v30 = vmul.f32 %v1155_v47, %v4451_v28  ;;  %v3106_v28 = vld [vmem:[%s5160_s5 + $0x8] sm:$0xff] }
 0x540   :  { %v4540_v6 = vpop.xlane.xlu0 %1497  ;;  %2613 = vst [vmem:[#allocation2 + $0x20] sm:$0xff] %v364_v32  ;;  %v369_v56 = vpop.f32.mrf.mxu0  ;;  %vm1930_vm1 = vcmp.ge.s32.totalorder %v3106_v28, 0 }
 0x541   :  { %2615 = vst [vmem:[#allocation2 + $0x30] sm:$0xff] %v368_v20 }
 0x542   :  { %v4549_v19 = vpop.xlane.xlu1 %1488  ;;  %2166 = vperm.xlu0 %2937, %v1172_v4   ;;  %2221 = vperm.xlu1 %2936, %v1183_v27   ;;  %v370_v4 = vadd.f32 %v369_v56, %v5357_v15  ;;  %v3043_v27 = vpop.eup %3042  ;;  %v1146_v56 = vld [vmem:[%s5159_s4 + $0xa0] sm:$0xff]  ;;  %3074 = vlog2.f32 %v4495_v10 }
 0x543   :  { %v371_v48 = vpop.f32.mrf.mxu0  ;;  %v3045_v26 = vpop.eup %3044  ;;  %v1178_v47 = vmul.f32 %v1146_v56, %v4342_v50  ;;  %3076 = vlog2.f32 %v4499_v46 }
 0x544   :  { %v4554_v29 = vpop.xlane.xlu0 %1491  ;;  %2616 = vst [vmem:[#allocation2 + $0x38] sm:$0xff] %v370_v4  ;;  %v372_v60 = vadd.f32 %v371_v48, %v5356_v23  ;;  %v1518_v7 = vmul.f32 0.6931472, %v3045_v26  ;;  %v2820_v26 = vsel %vm1930_vm1, 1.0, %v5323_v0 }
 0x545   :  { %v373_v20 = vpop.f32.mrf.mxu0 }
 0x546   :  { %v4563_v32 = vpop.xlane.xlu1 %1506  ;;  %2176 = vperm.xlu0 %2937, %v1174_v1   ;;  %2231 = vperm.xlu1 %2936, %v1185_v58   ;;  %v1157_v1 = vld [vmem:[%s5159_s4 + $0xf8] sm:$0xff]  ;;  %v1514_v58 = vmul.f32 0.6931472, %v3043_v27  ;;  %2618 = vst [vmem:[#allocation2 + $0x48] sm:$0xff] %v372_v60  ;;  %v374_v4 = vadd.f32 %v373_v20, %v5357_v15  ;;  %v1578_v56 = vadd.f32 %v1518_v7, %v3930_v51 }
 0x547   :  { %5358 = vst [vmem:[#allocation36_spill] sm:$0xff] %v4563_v32  ;;  %v377_v5 = vpop.f32.mrf.mxu0  ;;  %v1189_v48 = vmul.f32 %v1157_v1, %v4435_v24  ;;  %v3107_v24 = vld [vmem:[%s5160_s5 + $0x18] sm:$0xff] }
 0x548   :  { %v4569_v63 = vpop.xlane.xlu0 %1840  ;;  %2619 = vst [vmem:[#allocation2 + $0x50] sm:$0xff] %v374_v4  ;;  %v378_v27 = vadd.f32 %v377_v5, %v5356_v23  ;;  %v1576_v20 = vadd.f32 %v1514_v58, %v3946_v59  ;;  %vm1932_vm5 = vcmp.ge.s32.totalorder %v3107_v24, 0  ;;  %v1150_v5 = vld [vmem:[%s5159_s4 + $0xc0] sm:$0xff] }
 0x549   :  { %v379_v60 = vpop.f32.mrf.mxu0  ;;  %v1182_v7 = vmul.f32 %v1150_v5, %v4401_v2  ;;  %v1154_v24 = vld [vmem:[%s5159_s4 + $0xe0] sm:$0xff] }
 0x54a   :  { %v4578_v37 = vpop.xlane.xlu1 %1500  ;;  %2186 = vperm.xlu0 %2937, %v1176_v36   ;;  %2241 = vperm.xlu1 %2936, %v1187_v30   ;;  %v1148_v36 = vld [vmem:[%s5159_s4 + $0xb0] sm:$0xff]  ;;  %v380_v32 = vadd.f32 %v379_v60, %v5357_v15  ;;  %2621 = vst [vmem:[#allocation2 + $0x60] sm:$0xff] %v378_v27 }
 0x54b   :  { %v381_v50 = vpop.f32.mrf.mxu0  ;;  %v1180_v59 = vmul.f32 %v1148_v36, %v4302_v45  ;;  %v3047_v36 = vpop.eup %3046  ;;  %3078 = vlog2.f32 %v4483_v14 }
 0x54c   :  { %v1844_v30 = vpop.xlane.xlu0 %1843  ;;  %2622 = vst [vmem:[#allocation2 + $0x68] sm:$0xff] %v380_v32  ;;  %v382_v62 = vadd.f32 %v381_v50, %v5356_v23  ;;  %v1512_v9 = vmul.f32 0.6931472, %v3047_v36  ;;  %v2819_v36 = vsel %vm1929_vm6, 1.0, %v5323_v0 }
 0x54d   :  { %v383_v58 = vpop.f32.mrf.mxu0  ;;  %v2028_v28 = vsub.f32 %v1578_v56, %v1844_v30 }
 0x54e   :  { %v1838_v4 = vpop.xlane.xlu1 %1837  ;;  %2196 = vperm.xlu0 %2937, %v1178_v47   ;;  %2251 = vperm.xlu1 %2936, %v1189_v48   ;;  %v2822_v48 = vsel %vm1932_vm5, 1.0, %v5323_v0  ;;  %2624 = vst [vmem:[#allocation2 + $0x78] sm:$0xff] %v382_v62  ;;  %v384_v51 = vadd.f32 %v383_v58, %v5357_v15  ;;  %v1575_v62 = vadd.f32 %v1512_v9, %v3972_v34 }
 0x54f   :  { %v2026_v1 = vsub.f32 %v1576_v20, %v1838_v4  ;;  %v387_v45 = vpop.f32.mrf.mxu0  ;;  %v2060_v30 = vmul.f32 %v2822_v48, %v2028_v28  ;;  %v1186_v58 = vmul.f32 %v1154_v24, %v4448_v18 }
 0x550   :  { %v388_v32 = vadd.f32 %v387_v45, %v5356_v23  ;;  %2625 = vst [vmem:[#allocation2 + $0x80] sm:$0xff] %v384_v51  ;;  %v5359_v51 = vld [vmem:[#allocation64_spill] sm:$0xff]  ;;  %v4646_v49 = vpop.xlane.xlu0 %1509 }
 0x551   :  { %v2058_v47 = vmul.f32 %v2820_v26, %v2026_v1  ;;  %v389_v60 = vpop.f32.mrf.mxu0  ;;  %v2025_v45 = vsub.f32 %v1575_v62, %v5359_v51 }
 0x552   :  { %v4604_v27 = vpop.xlane.xlu1 %1846  ;;  %2206 = vperm.xlu0 %2937, %v1180_v59   ;;  %2627 = vst [vmem:[#allocation2 + $0x90] sm:$0xff] %v388_v32  ;;  %v390_v20 = vadd.f32 %v389_v60, %v5357_v15  ;;  %v3049_v59 = vpop.eup %3048  ;;  %v1188_v32 = vmul.f32 %v1156_v41, %v4427_v16  ;;  %3080 = vlog2.f32 %v4487_v11 }
 0x553   :  { %2360 = vperm.xlu1 %2936, %v2058_v47   ;;  %v391_v4 = vpop.f32.mrf.mxu0  ;;  %v1516_v47 = vmul.f32 0.6931472, %v3049_v59  ;;  %v3051_v18 = vpop.eup %3050  ;;  %3082 = vlog2.f32 %v4520_v38 }
 0x554   :  { %2628 = vst [vmem:[#allocation2 + $0x98] sm:$0xff] %v390_v20  ;;  %v392_v2 = vadd.f32 %v391_v4, %v5356_v23  ;;  %v3053_v60 = vpop.eup %3052  ;;  %v5360_v4 = vld [vmem:[#allocation72_spill] sm:$0xff]  ;;  %v1520_v16 = vmul.f32 0.6931472, %v3051_v18  ;;  %3084 = vlog2.f32 %v4526_v54 }
 0x555   :  { %v393_v50 = vpop.f32.mrf.mxu0  ;;  %v3055_v20 = vpop.eup %3054  ;;  %3086 = vlog2.f32 %v4507_v40 }
 0x556   :  { %v4615_v26 = vpop.xlane.xlu1 %1852  ;;  %2216 = vperm.xlu0 %2937, %v1182_v7   ;;  %2630 = vst [vmem:[#allocation2 + $0xa8] sm:$0xff] %v392_v2  ;;  %v394_v56 = vadd.f32 %v393_v50, %v5357_v15  ;;  %v1577_v2 = vadd.f32 %v1516_v47, %v5360_v4  ;;  %v3057_v50 = vpop.eup %3056  ;;  %3088 = vlog2.f32 %v4511_v52 }
 0x557   :  { %2370 = vperm.xlu1 %2936, %v2060_v30   ;;  %v397_v17 = vpop.f32.mrf.mxu0  ;;  %v1526_v47 = vmul.f32 0.6931472, %v3057_v50 }
 0x558   :  { %2631 = vst [vmem:[#allocation2 + $0xb0] sm:$0xff] %v394_v56  ;;  %v398_v22 = vadd.f32 %v397_v17, %v5356_v23  ;;  %v2027_v24 = vsub.f32 %v1577_v2, %v4569_v63  ;;  %v2057_v56 = vmul.f32 %v2819_v36, %v2025_v45  ;;  %v1522_v17 = vmul.f32 0.6931472, %v3053_v60  ;;  %v3111_v63 = vld [vmem:[%s5160_s5 + $0x28] sm:$0xff] }
 0x559   :  { %v399_v5 = vpop.f32.mrf.mxu0  ;;  %vm1934_vm9 = vcmp.ge.s32.totalorder %v3111_v63, 0  ;;  %v3115_v63 = vld [vmem:[%s5160_s5 + $0x48] sm:$0xff] }
 0x55a   :  { %v4625_v1 = vpop.xlane.xlu1 %1858  ;;  %2226 = vperm.xlu0 %2937, %v1184_v39   ;;  %2633 = vst [vmem:[#allocation2 + $0xc0] sm:$0xff] %v398_v22  ;;  %v400_v28 = vadd.f32 %v399_v5, %v5357_v15  ;;  %v1524_v22 = vmul.f32 0.6931472, %v3055_v20  ;;  %v1579_v5 = vadd.f32 %v1520_v16, %v3985_v61  ;;  %v1580_v51 = vadd.f32 %v1522_v17, %v3970_v55  ;;  %v3114_v16 = vld [vmem:[%s5160_s5 + $0x40] sm:$0xff] }
 0x55b   :  { %v401_v34 = vpop.f32.mrf.mxu0  ;;  %v2824_v36 = vsel %vm1934_vm9, 1.0, %v5323_v0  ;;  %vm1937_vm12 = vcmp.ge.s32.totalorder %v3114_v16, 0  ;;  %vm1938_vm13 = vcmp.ge.s32.totalorder %v3115_v63, 0  ;;  %v3118_v16 = vld [vmem:[%s5160_s5 + $0x68] sm:$0xff] }
 0x55c   :  { %2634 = vst [vmem:[#allocation2 + $0xc8] sm:$0xff] %v400_v28  ;;  %v402_v12 = vadd.f32 %v401_v34, %v5356_v23  ;;  %v3059_v28 = vpop.eup %3058  ;;  %v2029_v61 = vsub.f32 %v1579_v5, %v4604_v27  ;;  %v1581_v60 = vadd.f32 %v1524_v22, %v5361_v43  ;;  %v2825_v22 = vsel %vm1935_vm10, 1.0, %v5323_v0  ;;  %v3117_v43 = vld [vmem:[%s5160_s5 + $0x50] sm:$0xff] }
 0x55d   :  { %v403_v7 = vpop.f32.mrf.mxu0  ;;  %v3061_v18 = vpop.eup %3060  ;;  %v1528_v55 = vmul.f32 0.6931472, %v3059_v28  ;;  %vm1939_vm15 = vcmp.ge.s32.totalorder %v3117_v43, 0  ;;  %v2827_v11 = vsel %vm1937_vm12, 1.0, %v5323_v0  ;;  %vm1942_vm0 = vcmp.ge.s32.totalorder %v3118_v16, 0 }
 0x55e   :  { %v4639_v48 = vpop.xlane.xlu1 %1864  ;;  %2236 = vperm.xlu0 %2937, %v1186_v58   ;;  %2636 = vst [vmem:[#allocation2 + $0xd8] sm:$0xff] %v402_v12  ;;  %v404_v30 = vadd.f32 %v403_v7, %v5357_v15  ;;  %v2059_v12 = vmul.f32 %v2821_v57, %v2027_v24  ;;  %v2823_v7 = vsel %vm1933_vm8, 1.0, %v5323_v0  ;;  %v3063_v20 = vpop.eup %3062  ;;  %v1530_v50 = vmul.f32 0.6931472, %v3061_v18 }
 0x55f   :  { %v407_v39 = vpop.f32.mrf.mxu0  ;;  %v3065_v10 = vpop.eup %3064  ;;  %v2031_v17 = vsub.f32 %v1581_v60, %v4615_v26  ;;  %v5362_v26 = vld [vmem:[#allocation77_spill] sm:$0xff]  ;;  %v5363_v60 = vld [vmem:[#allocation75_spill] sm:$0xff]  ;;  %3090 = vlog2.f32 %v4549_v19 }
 0x560   :  { %2637 = vst [vmem:[#allocation2 + $0xe0] sm:$0xff] %v404_v30  ;;  %v408_v59 = vadd.f32 %v407_v39, %v5356_v23  ;;  %v1582_v39 = vadd.f32 %v1526_v47, %v3956_v13  ;;  %v1583_v5 = vadd.f32 %v1528_v55, %v5362_v26  ;;  %v3067_v53 = vpop.eup %3066  ;;  %v3116_v47 = vld [vmem:[%s5160_s5 + $0x58] sm:$0xff]  ;;  %v1534_v18 = vmul.f32 0.6931472, %v3065_v10 }
 0x561   :  { %v409_v58 = vpop.f32.mrf.mxu0  ;;  %vm1940_vm14 = vcmp.ge.s32.totalorder %v3116_v47, 0  ;;  %v3120_v26 = vld [vmem:[%s5160_s5 + $0x78] sm:$0xff]  ;;  %3092 = vlog2.f32 %v4554_v29 }
 0x562   :  { %v4654_v9 = vpop.xlane.xlu1 %1870  ;;  %2246 = vperm.xlu0 %2937, %v1188_v32   ;;  %2639 = vst [vmem:[#allocation2 + $0xf0] sm:$0xff] %v408_v59  ;;  %v410_v3 = vadd.f32 %v409_v58, %v5357_v15  ;;  %v3113_v32 = vld [vmem:[%s5160_s5 + $0x38] sm:$0xff]  ;;  %v1532_v58 = vmul.f32 0.6931472, %v3063_v20  ;;  %v1536_v20 = vmul.f32 0.6931472, %v3067_v53  ;;  %3094 = vlog2.f32 %v4535_v31 }
 0x563   :  { %v411_v34 = vpop.f32.mrf.mxu0  ;;  %vm1936_vm11 = vcmp.ge.s32.totalorder %v3113_v32, 0  ;;  %v2830_v54 = vsel %vm1940_vm14, 1.0, %v5323_v0  ;;  %vm1944_vm3 = vcmp.ge.s32.totalorder %v3120_v26, 0  ;;  %3096 = vlog2.f32 %v4540_v6  ;;  %v3125_v26 = vld [vmem:[%s5160_s5 + $0x90] sm:$0xff] }
 0x564   :  { %2640 = vst [vmem:[#allocation2 + $0xf8] sm:$0xff] %v410_v3  ;;  %v412_v45 = vadd.f32 %v411_v34, %v5356_v23  ;;  %v2826_v46 = vsel %vm1936_vm11, 1.0, %v5323_v0  ;;  %v1584_v34 = vadd.f32 %v1530_v50, %v3983_v35  ;;  %v1585_v35 = vadd.f32 %v1532_v58, %v5363_v60 }
 0x565   :  { %v4661_v62 = vpop.xlane.xlu0 %1503  ;;  %v413_v27 = vpop.f32.mrf.mxu0  ;;  %vm1947_vm7 = vcmp.ge.s32.totalorder %v3125_v26, 0  ;;  %3098 = vlog2.f32 %v4578_v37 }
 0x566   :  { %v4670_v41 = vpop.xlane.xlu1 %1876  ;;  %2355 = vperm.xlu0 %2937, %v2057_v56   ;;  %2642 = vst [vmem:[#allocation2 + $0x108] sm:$0xff] %v412_v45  ;;  %v414_v2 = vadd.f32 %v413_v27, %v5357_v15  ;;  %v2061_v56 = vmul.f32 %v2823_v7, %v2029_v61  ;;  %v3069_v61 = vpop.eup %3068  ;;  %v2033_v45 = vsub.f32 %v1583_v5, %v4625_v1  ;;  %v5364_v5 = vld [vmem:[#allocation76_spill] sm:$0xff]  ;;  %3100 = vlog2.f32 %v4661_v62 }
 0x567   :  { %v417_v24 = vpop.f32.mrf.mxu0  ;;  %v3071_v1 = vpop.eup %3070  ;;  %v1538_v50 = vmul.f32 0.6931472, %v3069_v61  ;;  %v3121_v61 = vld [vmem:[%s5160_s5 + $0x70] sm:$0xff]  ;;  %v2837_v62 = vsel %vm1947_vm7, 1.0, %v5323_v0 }
 0x568   :  { %2643 = vst [vmem:[#allocation2 + $0x110] sm:$0xff] %v414_v2  ;;  %v418_v57 = vadd.f32 %v417_v24, %v5356_v23  ;;  %v3073_v24 = vpop.eup %3072  ;;  %v2065_v10 = vmul.f32 %v2827_v11, %v2033_v45  ;;  %vm1943_vm4 = vcmp.ge.s32.totalorder %v3121_v61, 0  ;;  %v5368_v61 = vld [vmem:[#allocation78_spill] sm:$0xff] }
 0x569   :  { %v1850_v30 = vpop.xlane.xlu0 %1849  ;;  %v419_v33 = vpop.f32.mrf.mxu0  ;;  %v2833_v29 = vsel %vm1943_vm4, 1.0, %v5323_v0 }
 0x56a   :  { %v2030_v8 = vsub.f32 %v1580_v51, %v1850_v30  ;;  %v4689_v4 = vpop.xlane.xlu1 %1882  ;;  %2365 = vperm.xlu0 %2937, %v2059_v12   ;;  %2645 = vst [vmem:[#allocation2 + $0x120] sm:$0xff] %v418_v57  ;;  %v420_v14 = vadd.f32 %v419_v33, %v5357_v15  ;;  %v2063_v51 = vmul.f32 %v2825_v22, %v2031_v17  ;;  %v2829_v57 = vsel %vm1939_vm15, 1.0, %v5323_v0  ;;  %v3075_v63 = vpop.eup %3074 }
 0x56b   :  { %v421_v12 = vpop.f32.mrf.mxu0  ;;  %v1540_v22 = vmul.f32 0.6931472, %v3071_v1  ;;  %v3077_v53 = vpop.eup %3076  ;;  %v1544_v11 = vmul.f32 0.6931472, %v3075_v63 }
 0x56c   :  { %v2062_v59 = vmul.f32 %v2824_v36, %v2030_v8  ;;  %2646 = vst [vmem:[#allocation2 + $0x128] sm:$0xff] %v420_v14  ;;  %v422_v7 = vadd.f32 %v421_v12, %v5356_v23  ;;  %v2828_v36 = vsel %vm1938_vm13, 1.0, %v5323_v0  ;;  %v1542_v14 = vmul.f32 0.6931472, %v3073_v24 }
 0x56d   :  { %v1856_v13 = vpop.xlane.xlu0 %1855  ;;  %v423_v27 = vpop.f32.mrf.mxu0 }
 0x56e   :  { %v2032_v3 = vsub.f32 %v1582_v39, %v1856_v13  ;;  %v4708_v28 = vpop.xlane.xlu1 %1888  ;;  %2375 = vperm.xlu0 %2937, %v2061_v56   ;;  %2380 = vperm.xlu1 %2936, %v2062_v59   ;;  %2648 = vst [vmem:[#allocation2 + $0x138] sm:$0xff] %v422_v7  ;;  %v424_v2 = vadd.f32 %v423_v27, %v5357_v15  ;;  %v5366_v27 = vld [vmem:[#allocation74_spill] sm:$0xff] }
 0x56f   :  { %v1586_v39 = vadd.f32 %v1534_v18, %v3977_v44  ;;  %v427_v38 = vpop.f32.mrf.mxu0  ;;  %v2035_v56 = vsub.f32 %v1585_v35, %v4639_v48  ;;  %v1587_v48 = vadd.f32 %v1536_v20, %v4023_v25  ;;  %v1590_v1 = vadd.f32 %v1542_v14, %v5366_v27 }
 0x570   :  { %v2064_v32 = vmul.f32 %v2826_v46, %v2032_v3  ;;  %2649 = vst [vmem:[#allocation2 + $0x140] sm:$0xff] %v424_v2  ;;  %v428_v59 = vadd.f32 %v427_v38, %v5356_v23  ;;  %v3119_v46 = vld [vmem:[%s5160_s5 + $0x60] sm:$0xff]  ;;  %v1588_v3 = vadd.f32 %v1538_v50, %v5364_v5  ;;  %v1546_v20 = vmul.f32 0.6931472, %v3077_v53 }
 0x571   :  { %v1862_v30 = vpop.xlane.xlu0 %1861  ;;  %v429_v58 = vpop.f32.mrf.mxu0  ;;  %vm1941_vm2 = vcmp.ge.s32.totalorder %v3119_v46, 0  ;;  %v2067_v47 = vmul.f32 %v2829_v57, %v2035_v56  ;;  %v3123_v38 = vld [vmem:[%s5160_s5 + $0x80] sm:$0xff] }
 0x572   :  { %v2034_v55 = vsub.f32 %v1584_v34, %v1862_v30  ;;  %v4727_v8 = vpop.xlane.xlu1 %1894  ;;  %2385 = vperm.xlu0 %2937, %v2063_v51   ;;  %2390 = vperm.xlu1 %2936, %v2064_v32   ;;  %2651 = vst [vmem:[#allocation2 + $0x150] sm:$0xff] %v428_v59  ;;  %v430_v40 = vadd.f32 %v429_v58, %v5357_v15  ;;  %v2831_v52 = vsel %vm1941_vm2, 1.0, %v5323_v0  ;;  %v5365_v51 = vld [vmem:[#allocation79_spill] sm:$0xff]  ;;  %v2832_v32 = vsel %vm1942_vm0, 1.0, %v5323_v0  ;;  %v3122_v30 = vld [vmem:[%s5160_s5 + $0x88] sm:$0xff]  ;;  %v5367_v5 = vld [vmem:[#allocation81_spill] sm:$0xff] }
 0x573   :  { %v431_v25 = vpop.f32.mrf.mxu0  ;;  %v2037_v34 = vsub.f32 %v1587_v48, %v4654_v9  ;;  %v1589_v45 = vadd.f32 %v1540_v22, %v5365_v51  ;;  %v3079_v9 = vpop.eup %3078  ;;  %vm1946_vm1 = vcmp.ge.s32.totalorder %v3122_v30, 0  ;;  %vm1945_vm5 = vcmp.ge.s32.totalorder %v3123_v38, 0 }
 0x574   :  { %v2066_v17 = vmul.f32 %v2828_v36, %v2034_v55  ;;  %2652 = vst [vmem:[#allocation2 + $0x158] sm:$0xff] %v430_v40  ;;  %v432_v12 = vadd.f32 %v431_v25, %v5356_v23  ;;  %v3081_v55 = vpop.eup %3080  ;;  %v1548_v24 = vmul.f32 0.6931472, %v3079_v9  ;;  %v1592_v31 = vadd.f32 %v1546_v20, %v4020_v21 }
 0x575   :  { %v1868_v44 = vpop.xlane.xlu0 %1867  ;;  %v433_v43 = vpop.f32.mrf.mxu0  ;;  %v2069_v2 = vmul.f32 %v2831_v52, %v2037_v34  ;;  %v2039_v16 = vsub.f32 %v1589_v45, %v4670_v41  ;;  %v1591_v41 = vadd.f32 %v1544_v11, %v4052_v42  ;;  %v1550_v58 = vmul.f32 0.6931472, %v3081_v55  ;;  %v3127_v11 = vld [vmem:[%s5160_s5 + $0xa0] sm:$0xff] }
 0x576   :  { %v2036_v13 = vsub.f32 %v1586_v39, %v1868_v44  ;;  %v4746_v33 = vpop.xlane.xlu1 %1900  ;;  %2395 = vperm.xlu0 %2937, %v2065_v10   ;;  %2400 = vperm.xlu1 %2936, %v2066_v17   ;;  %2654 = vst [vmem:[#allocation2 + $0x168] sm:$0xff] %v432_v12  ;;  %v434_v36 = vadd.f32 %v433_v43, %v5357_v15  ;;  %v2834_v10 = vsel %vm1944_vm3, 1.0, %v5323_v0  ;;  %v3124_v44 = vld [vmem:[%s5160_s5 + $0x98] sm:$0xff]  ;;  %v2835_v6 = vsel %vm1945_vm5, 1.0, %v5323_v0  ;;  %v3126_v12 = vld [vmem:[%s5160_s5 + $0xa8] sm:$0xff] }
 0x577   :  { %v437_v19 = vpop.f32.mrf.mxu0  ;;  %vm1948_vm6 = vcmp.ge.s32.totalorder %v3124_v44, 0  ;;  %v2071_v48 = vmul.f32 %v2833_v29, %v2039_v16  ;;  %v1593_v21 = vadd.f32 %v1548_v24, %v5367_v5  ;;  %vm1950_vm8 = vcmp.ge.s32.totalorder %v3126_v12, 0 }
 0x578   :  { %v2068_v18 = vmul.f32 %v2830_v54, %v2036_v13  ;;  %2655 = vst [vmem:[#allocation2 + $0x170] sm:$0xff] %v434_v36  ;;  %v438_v50 = vadd.f32 %v437_v19, %v5356_v23  ;;  %v3083_v54 = vpop.eup %3082  ;;  %v2041_v13 = vsub.f32 %v1591_v41, %v4689_v4  ;;  %v1594_v52 = vadd.f32 %v1550_v58, %v5368_v61 }
 0x579   :  { %v1874_v7 = vpop.xlane.xlu0 %1873  ;;  %v439_v17 = vpop.f32.mrf.mxu0  ;;  %v1552_v53 = vmul.f32 0.6931472, %v3083_v54  ;;  %vm1949_vm9 = vcmp.ge.s32.totalorder %v3127_v11, 0  ;;  %v2838_v36 = vsel %vm1948_vm6, 1.0, %v5323_v0 }
 0x57a   :  { %v2038_v60 = vsub.f32 %v1588_v3, %v1874_v7  ;;  %v4765_v35 = vpop.xlane.xlu1 %1906  ;;  %2405 = vperm.xlu0 %2937, %v2067_v47   ;;  %2410 = vperm.xlu1 %2936, %v2068_v18   ;;  %2657 = vst [vmem:[#allocation2 + $0x180] sm:$0xff] %v438_v50  ;;  %v440_v22 = vadd.f32 %v439_v17, %v5357_v15  ;;  %v3085_v46 = vpop.eup %3084  ;;  %v2836_v3 = vsel %vm1946_vm1, 1.0, %v5323_v0 }
 0x57b   :  { %v441_v42 = vpop.f32.mrf.mxu0  ;;  %v3087_v4 = vpop.eup %3086  ;;  %v1554_v51 = vmul.f32 0.6931472, %v3085_v46  ;;  %v2043_v7 = vsub.f32 %v1593_v21, %v4708_v28  ;;  %v5370_v28 = vld [vmem:[#allocation86_spill] sm:$0xff] }
 0x57c   :  { %v2070_v39 = vmul.f32 %v2832_v32, %v2038_v60  ;;  %2658 = vst [vmem:[#allocation2 + $0x188] sm:$0xff] %v440_v22  ;;  %v442_v63 = vadd.f32 %v441_v42, %v5356_v23  ;;  %v3089_v45 = vpop.eup %3088  ;;  %v2073_v32 = vmul.f32 %v2835_v6, %v2041_v13  ;;  %v1556_v60 = vmul.f32 0.6931472, %v3087_v4 }
 0x57d   :  { %v1880_v56 = vpop.xlane.xlu0 %1879  ;;  %v443_v25 = vpop.f32.mrf.mxu0  ;;  %v1595_v20 = vadd.f32 %v1552_v53, %v5370_v28  ;;  %v1558_v38 = vmul.f32 0.6931472, %v3089_v45  ;;  %v2839_v22 = vsel %vm1949_vm9, 1.0, %v5323_v0  ;;  %v3130_v53 = vld [vmem:[%s5160_s5 + $0xc8] sm:$0xff] }
 0x57e   :  { %v2040_v59 = vsub.f32 %v1590_v1, %v1880_v56  ;;  %v4784_v57 = vpop.xlane.xlu1 %1912  ;;  %2415 = vperm.xlu0 %2937, %v2069_v2   ;;  %2420 = vperm.xlu1 %2936, %v2070_v39   ;;  %2660 = vst [vmem:[#allocation2 + $0x198] sm:$0xff] %v442_v63  ;;  %v444_v18 = vadd.f32 %v443_v25, %v5357_v15  ;;  %v5369_v1 = vld [vmem:[#allocation36_spill] sm:$0xff]  ;;  %v3091_v16 = vpop.eup %3090  ;;  %v5371_v39 = vld [vmem:[#allocation82_spill] sm:$0xff]  ;;  %vm1954_vm12 = vcmp.ge.s32.totalorder %v3130_v53, 0 }
 0x57f   :  { %v447_v37 = vpop.f32.mrf.mxu0  ;;  %3102 = vlog2.f32 %v5369_v1  ;;  %v1596_v50 = vadd.f32 %v1554_v51, %v5371_v39  ;;  %v3093_v24 = vpop.eup %3092  ;;  %v2045_v56 = vsub.f32 %v1595_v20, %v4727_v8  ;;  %v2840_v8 = vsel %vm1950_vm8, 1.0, %v5323_v0  ;;  %v5373_v63 = vld [vmem:[#allocation80_spill] sm:$0xff] }
 0x580   :  { %v2072_v40 = vmul.f32 %v2834_v10, %v2040_v59  ;;  %2661 = vst [vmem:[#allocation2 + $0x1a0] sm:$0xff] %v444_v18  ;;  %v448_v9 = vadd.f32 %v447_v37, %v5356_v23  ;;  %3104 = vlog2.f32 %v4646_v49  ;;  %v2075_v10 = vmul.f32 %v2837_v62, %v2043_v7  ;;  %v3128_v59 = vld [vmem:[%s5160_s5 + $0xb8] sm:$0xff]  ;;  %v3129_v49 = vld [vmem:[%s5160_s5 + $0xb0] sm:$0xff] }
 0x581   :  { %v1886_v14 = vpop.xlane.xlu0 %1885  ;;  %v449_v27 = vpop.f32.mrf.mxu0  ;;  %vm1952_vm10 = vcmp.ge.s32.totalorder %v3128_v59, 0  ;;  %vm1951_vm11 = vcmp.ge.s32.totalorder %v3129_v49, 0  ;;  %v1560_v42 = vmul.f32 0.6931472, %v3091_v16  ;;  %v1598_v26 = vadd.f32 %v1558_v38, %v5373_v63  ;;  %v3132_v20 = vld [vmem:[%s5160_s5 + $0xd8] sm:$0xff]  ;;  %v5376_v38 = vld [vmem:[#allocation87_spill] sm:$0xff] }
 0x582   :  { %v2042_v47 = vsub.f32 %v1592_v31, %v1886_v14  ;;  %v4803_v34 = vpop.xlane.xlu1 %1918  ;;  %2425 = vperm.xlu0 %2937, %v2071_v48   ;;  %2430 = vperm.xlu1 %2936, %v2072_v40   ;;  %2663 = vst [vmem:[#allocation2 + $0x1b0] sm:$0xff] %v448_v9  ;;  %v450_v2 = vadd.f32 %v449_v27, %v5357_v15  ;;  %v5372_v31 = vld [vmem:[#allocation84_spill] sm:$0xff]  ;;  %v3095_v40 = vpop.eup %3094  ;;  %v1562_v6 = vmul.f32 0.6931472, %v3093_v24  ;;  %v2841_v18 = vsel %vm1951_vm11, 1.0, %v5323_v0  ;;  %v5375_v9 = vld [vmem:[#allocation85_spill] sm:$0xff] }
 0x583   :  { %v451_v29 = vpop.f32.mrf.mxu0  ;;  %v1597_v58 = vadd.f32 %v1556_v60, %v5372_v31  ;;  %v3097_v21 = vpop.eup %3096  ;;  %v1564_v37 = vmul.f32 0.6931472, %v3095_v40  ;;  %vm1956_vm14 = vcmp.ge.s32.totalorder %v3132_v20, 0  ;;  %v5377_v59 = vld [vmem:[#allocation83_spill] sm:$0xff] }
 0x584   :  { %v2074_v43 = vmul.f32 %v2836_v3, %v2042_v47  ;;  %2664 = vst [vmem:[#allocation2 + $0x1b8] sm:$0xff] %v450_v2  ;;  %v452_v41 = vadd.f32 %v451_v29, %v5356_v23  ;;  %v2077_v3 = vmul.f32 %v2839_v22, %v2045_v56  ;;  %v3131_v47 = vld [vmem:[%s5160_s5 + $0xc0] sm:$0xff]  ;;  %v1600_v11 = vadd.f32 %v1562_v6, %v5375_v9 }
 0x585   :  { %v1892_v30 = vpop.xlane.xlu0 %1891  ;;  %v453_v44 = vpop.f32.mrf.mxu0  ;;  %v2047_v14 = vsub.f32 %v1597_v58, %v4746_v33  ;;  %vm1953_vm13 = vcmp.ge.s32.totalorder %v3131_v47, 0  ;;  %v2842_v33 = vsel %vm1952_vm10, 1.0, %v5323_v0  ;;  %v1566_v62 = vmul.f32 0.6931472, %v3097_v21 }
 0x586   :  { %v2044_v19 = vsub.f32 %v1594_v52, %v1892_v30  ;;  %v4822_v55 = vpop.xlane.xlu1 %1924  ;;  %2435 = vperm.xlu0 %2937, %v2073_v32   ;;  %2440 = vperm.xlu1 %2936, %v2074_v43   ;;  %2666 = vst [vmem:[#allocation2 + $0x1c8] sm:$0xff] %v452_v41  ;;  %v454_v13 = vadd.f32 %v453_v44, %v5357_v15  ;;  %v5374_v52 = vld [vmem:[#allocation88_spill] sm:$0xff]  ;;  %v3099_v43 = vpop.eup %3098  ;;  %v2843_v2 = vsel %vm1953_vm13, 1.0, %v5323_v0 }
 0x587   :  { %v457_v5 = vpop.f32.mrf.mxu0  ;;  %v1599_v51 = vadd.f32 %v1560_v42, %v5374_v52  ;;  %v2079_v30 = vmul.f32 %v2841_v18, %v2047_v14  ;;  %v1601_v29 = vadd.f32 %v1564_v37, %v5376_v38  ;;  %v1602_v49 = vadd.f32 %v1566_v62, %v5377_v59  ;;  %v3134_v42 = vld [vmem:[%s5160_s5 + $0xe8] sm:$0xff]  ;;  %v3136_v52 = vld [vmem:[%s5160_s5 + $0xf8] sm:$0xff] }
 0x588   :  { %v2076_v17 = vmul.f32 %v2838_v36, %v2044_v19  ;;  %2667 = vst [vmem:[#allocation2 + $0x1d0] sm:$0xff] %v454_v13  ;;  %v458_v4 = vadd.f32 %v457_v5, %v5356_v23  ;;  %v3101_v36 = vpop.eup %3100  ;;  %v3133_v19 = vld [vmem:[%s5160_s5 + $0xd0] sm:$0xff]  ;;  %vm1958_vm0 = vcmp.ge.s32.totalorder %v3134_v42, 0  ;;  %vm1960_vm3 = vcmp.ge.s32.totalorder %v3136_v52, 0 }
 0x589   :  { %v1898_v54 = vpop.xlane.xlu0 %1897  ;;  %v459_v61 = vpop.f32.mrf.mxu0  ;;  %v2049_v27 = vsub.f32 %v1599_v51, %v4765_v35  ;;  %vm1955_vm15 = vcmp.ge.s32.totalorder %v3133_v19, 0  ;;  %v2844_v35 = vsel %vm1954_vm12, 1.0, %v5323_v0  ;;  %v1570_v41 = vmul.f32 0.6931472, %v3101_v36 }
 0x58a   :  { %v2046_v46 = vsub.f32 %v1596_v50, %v1898_v54  ;;  %v4840_v48 = vpop.permute.xlu1 %2096  ;;  %2445 = vperm.xlu0 %2937, %v2075_v10   ;;  %2450 = vperm.xlu1 %2936, %v2076_v17   ;;  %2669 = vst [vmem:[#allocation2 + $0x1e0] sm:$0xff] %v458_v4  ;;  %v460_v7 = vadd.f32 %v459_v61, %v5357_v15  ;;  %v1568_v50 = vmul.f32 0.6931472, %v3099_v43  ;;  %v2845_v13 = vsel %vm1955_vm15, 1.0, %v5323_v0  ;;  %v5379_v4 = vld [vmem:[#allocation35_spill] sm:$0xff]  ;;  %v5380_v43 = vld [vmem:[#allocation89_spill] sm:$0xff] }
 0x58b   :  { %v461_v60 = vpop.f32.mrf.mxu0  ;;  %v2081_v54 = vmul.f32 %v2843_v2, %v2049_v27  ;;  %v2051_v44 = vsub.f32 %v1601_v29, %v4784_v57  ;;  %v2846_v57 = vsel %vm1956_vm14, 1.0, %v5323_v0  ;;  %v1604_v53 = vadd.f32 %v1570_v41, %v5379_v4  ;;  %v5381_v27 = vld [vmem:[#allocation91_spill] sm:$0xff] }
 0x58c   :  { %v2078_v25 = vmul.f32 %v2840_v8, %v2046_v46  ;;  %2670 = vst [vmem:[#allocation2 + $0x1e8] sm:$0xff] %v460_v7  ;;  %v462_v28 = vadd.f32 %v461_v60, %v5356_v23  ;;  %v3103_v17 = vpop.eup %3102  ;;  %v3135_v46 = vld [vmem:[%s5160_s5 + $0xe0] sm:$0xff]  ;;  %v2848_v37 = vsel %vm1958_vm0, 1.0, %v5323_v0  ;;  %v2850_v20 = vsel %vm1960_vm3, 1.0, %v5323_v0 }
 0x58d   :  { %v1904_v12 = vpop.xlane.xlu0 %1903  ;;  %v463_v39 = vpop.f32.mrf.mxu0  ;;  %vm1957_vm2 = vcmp.ge.s32.totalorder %v3135_v46, 0  ;;  %v1572_v5 = vmul.f32 0.6931472, %v3103_v17  ;;  %v2083_v18 = vmul.f32 %v2845_v13, %v2051_v44  ;;  %v5382_v46 = vld [vmem:[#allocation10_spill] sm:$0xff] }
 0x58e   :  { %v2048_v45 = vsub.f32 %v1598_v26, %v1904_v12  ;;  %v4857_v32 = vpop.permute.xlu1 %2106  ;;  %2455 = vperm.xlu0 %2937, %v2077_v3   ;;  %2460 = vperm.xlu1 %2936, %v2078_v25   ;;  %2672 = vst [vmem:[#allocation2 + $0x1f8] sm:$0xff] %v462_v28  ;;  %v464_v56 = vadd.f32 %v463_v39, %v5357_v15  ;;  %v3105_v8 = vpop.eup %3104  ;;  %v5378_v26 = vld [vmem:[#allocation90_spill] sm:$0xff]  ;;  %v2847_v51 = vsel %vm1957_vm2, 1.0, %v5323_v0  ;;  %v4947_v13 = vadd.s32 256, %v5382_v46 }
 0x58f   :  { %v467_v22 = vpop.f32.mrf.mxu0  ;;  %v1603_v6 = vadd.f32 %v1568_v50, %v5378_v26  ;;  %v1574_v25 = vmul.f32 0.6931472, %v3105_v8  ;;  %v5383_v26 = vld [vmem:[#allocation12_spill] sm:$0xff] }
 0x590   :  { %v2080_v1 = vmul.f32 %v2842_v33, %v2048_v45  ;;  %2673 = vst [vmem:[#allocation2 + $0x200] sm:$0xff] %v464_v56  ;;  %v468_v58 = vadd.f32 %v467_v22, %v5356_v23  ;;  %vm2352_vm1 = vcmp.eq.s32.totalorder %v4947_v13, 276  ;;  %vm2093_vm5 = vcmp.eq.s32.totalorder %v4947_v13, 275 }
 0x591   :  { %v1910_v16 = vpop.xlane.xlu0 %1909  ;;  %v469_v63 = vpop.f32.mrf.mxu0  ;;  %v2053_v33 = vsub.f32 %v1603_v6, %v4803_v34  ;;  %v3137_v34 = vld [vmem:[%s5160_s5 + $0xf0] sm:$0xff]  ;;  %s3164_s5 = smov [#allocation2]  }
 0x592   :  { %v2050_v24 = vsub.f32 %v1600_v11, %v1910_v16  ;;  %v4874_v10 = vpop.permute.xlu1 %2111  ;;  %2465 = vperm.xlu0 %2937, %v2079_v30   ;;  %2470 = vperm.xlu1 %2936, %v2080_v1   ;;  %2675 = vst [vmem:[#allocation2 + $0x210] sm:$0xff] %v468_v58  ;;  %v470_v14 = vadd.f32 %v469_v63, %v5357_v15  ;;  %vm1959_vm4 = vcmp.ge.s32.totalorder %v3137_v34, 0  ;;  %s2710_s4 = sshll.u32 %s3164_s5, 4  ;;  %s2711_s4 = int_to_ptr.vmem [resolvable:$true] %s2710_s4 }
 0x593   :  { %v471_v47 = vpop.f32.mrf.mxu0  ;;  %v2085_v60 = vmul.f32 %v2847_v51, %v2053_v33  ;;  %v1606_v1 = vadd.f32 %v1574_v25, %v5381_v27  ;;  %v2849_v28 = vsel %vm1959_vm4, 1.0, %v5323_v0  ;;  %v5384_v25 = vld [vmem:[#allocation9_spill] sm:$0xff]  ;;  %s3138_s10 = scalar_lea.vmem %s2711_s4, 12288  ;;  %p3143_p1 = scmp.lt.s32.totalorder %s2711_s4, %s2711_s4 }
 0x594   :  { %v2082_v31 = vmul.f32 %v2844_v35, %v2050_v24  ;;  %2676 = vst [vmem:[#allocation2 + $0x218] sm:$0xff] %v470_v14  ;;  %v472_v61 = vadd.f32 %v471_v47, %v5356_v23  ;;  %v1605_v23 = vadd.f32 %v1572_v5, %v5380_v43  ;;  %v2265_v4 = vsel %vm2093_vm5, %v4874_v10, %v5384_v25  ;;  %v5387_v43 = vld [vmem:[#allocation16_spill] sm:$0xff]  ;;  %p3139_p0 = scmp.ne.s32.totalorder %s2711_s4, %s3138_s10  ;;  %p3144_p2 = scmp.lt.s32.totalorder %s3138_s10, %s3138_s10 }
 0x595   :  { %v1916_v40 = vpop.xlane.xlu0 %1915  ;;  %v473_v7 = vpop.f32.mrf.mxu0 }
 0x596   :  { %v2052_v21 = vsub.f32 %v1602_v49, %v1916_v40  ;;  %v4891_v3 = vpop.permute.xlu1 %2121  ;;  %2475 = vperm.xlu0 %2937, %v2081_v54   ;;  %2480 = vperm.xlu1 %2936, %v2082_v31   ;;  %2678 = vst [vmem:[#allocation2 + $0x228] sm:$0xff] %v472_v61  ;;  %v474_v62 = vadd.f32 %v473_v7, %v5357_v15  ;;  %v5385_v61 = vld [vmem:[#allocation8_spill] sm:$0xff]  ;;  %p3145_p3 = por %p3144_p2, %p3143_p1 }
 0x597   :  { %v2055_v36 = vsub.f32 %v1605_v23, %v4822_v55  ;;  %v2256_v52 = vsel %vm2093_vm5, %v4840_v48, %v5385_v61  ;;  %v2271_v48 = vsel %vm2093_vm5, %v4891_v3, %v5387_v43  ;;  %v5388_v23 = vld [vmem:[#allocation13_spill] sm:$0xff]  ;;  %v5390_v3 = vld [vmem:[#allocation11_spill] sm:$0xff] }
 0x598   :  { %v2084_v12 = vmul.f32 %v2846_v57, %v2052_v21  ;;  %2679 = vst [vmem:[#allocation2 + $0x230] sm:$0xff] %v474_v62  ;;  %p3146_p4 = pnand %p3145_p3, %p3139_p0 }
 0x599   :  { %v1922_v45 = vpop.xlane.xlu0 %1921  ;;  %v2087_v16 = vmul.f32 %v2849_v28, %v2055_v36 }
 0x59a   :  { %v2054_v9 = vsub.f32 %v1604_v53, %v1922_v45  ;;  %v4908_v11 = vpop.permute.xlu1 %2131  ;;  %2485 = vperm.xlu0 %2937, %v2083_v18   ;;  %2490 = vperm.xlu1 %2936, %v2084_v12  }
 0x59c   :  { %v2086_v30 = vmul.f32 %v2848_v37, %v2054_v9  ;;  %v5386_v37 = vld [vmem:[#allocation7_spill] sm:$0xff] }
 0x59d   :  { %v1928_v19 = vpop.xlane.xlu0 %1927  ;;  %v2262_v45 = vsel %vm2093_vm5, %v4857_v32, %v5386_v37 }
 0x59e   :  { %v2056_v2 = vsub.f32 %v1606_v1, %v1928_v19  ;;  %v4916_v35 = vpop.permute.xlu1 %2141  ;;  %2495 = vperm.xlu0 %2937, %v2085_v60   ;;  %2500 = vperm.xlu1 %2936, %v2086_v30   ;;  %v5389_v30 = vld [vmem:[#allocation14_spill] sm:$0xff] }
 0x59f   :  { %v2277_v27 = vsel %vm2093_vm5, %v4908_v11, %v5389_v30  ;;  %v5392_v11 = vld [vmem:[#allocation17_spill] sm:$0xff] }
 0x5a0   :  { %v2088_v15 = vmul.f32 %v2850_v20, %v2056_v2 }
 0x5a2   :  { %v4918_v39 = vpop.permute.xlu1 %2151  ;;  %2505 = vperm.xlu0 %2937, %v2087_v16   ;;  %2510 = vperm.xlu1 %2936, %v2088_v15   ;;  %v5391_v16 = vld [vmem:[#allocation20_spill] sm:$0xff] }
 0x5a3   :  { %v2283_v15 = vsel %vm2093_vm5, %v4916_v35, %v5391_v16  ;;  %v5394_v35 = vld [vmem:[#allocation15_spill] sm:$0xff]  ;;  %v5404_v16 = vld [vmem:[#allocation29_spill] sm:$0xff] }
 0x5a5   :  { %v2102_v55 = vpop.permute.xlu0 %2101 }
 0x5a6   :  { %v4920_v50 = vpop.permute.xlu1 %2161  ;;  %v2259_v6 = vsel %vm2093_vm5, %v2102_v55, %v5383_v26 }
 0x5a9   :  { %v2117_v38 = vpop.permute.xlu0 %2116 }
 0x5aa   :  { %v4922_v29 = vpop.permute.xlu1 %2171  ;;  %v2268_v9 = vsel %vm2093_vm5, %v2117_v38, %v5388_v23 }
 0x5ad   :  { %v2127_v24 = vpop.permute.xlu0 %2126 }
 0x5ae   :  { %v4924_v0 = vpop.permute.xlu1 %2181  ;;  %v2274_v1 = vsel %vm2093_vm5, %v2127_v24, %v5390_v3  ;;  %v5402_v3 = vld [vmem:[#allocation23_spill] sm:$0xff] }
 0x5b1   :  { %v2137_v56 = vpop.permute.xlu0 %2136 }
 0x5b2   :  { %v4926_v17 = vpop.permute.xlu1 %2191  ;;  %v2280_v55 = vsel %vm2093_vm5, %v2137_v56, %v5392_v11 }
 0x5b5   :  { %v2147_v41 = vpop.permute.xlu0 %2146 }
 0x5b6   :  { %v4928_v59 = vpop.permute.xlu1 %2201 }
 0x5b9   :  { %v4930_v49 = vpop.permute.xlu0 %2156 }
 0x5ba   :  { %v4932_v22 = vpop.permute.xlu1 %2211 }
 0x5bd   :  { %v4934_v8 = vpop.permute.xlu0 %2166 }
 0x5be   :  { %v4936_v54 = vpop.permute.xlu1 %2221 }
 0x5c1   :  { %v4938_v44 = vpop.permute.xlu0 %2176 }
 0x5c2   :  { %v4940_v31 = vpop.permute.xlu1 %2231 }
 0x5c5   :  { %v4942_v58 = vpop.permute.xlu0 %2186 }
 0x5c6   :  { %v4944_v42 = vpop.permute.xlu1 %2241 }
 0x5c9   :  { %v4949_v57 = vpop.permute.xlu0 %2196 }
 0x5ca   :  { %v4951_v40 = vpop.permute.xlu1 %2251 }
 0x5cd   :  { %v4955_v63 = vpop.permute.xlu0 %2206 }
 0x5ce   :  { %v2361_v5 = vpop.permute.xlu1 %2360 }
 0x5cf   :  { %v2518_v21 = vsel %vm2352_vm1, %v2361_v5, %v2259_v6  ;;  %v5393_v6 = vld [vmem:[#allocation18_spill] sm:$0xff] }
 0x5d0   :  { %2614 = vst [vmem:[#allocation2 + $0x28] sm:$0xff] %v2518_v21  ;;  %v2289_v5 = vsel %vm2093_vm5, %v4918_v39, %v5393_v6  ;;  %v2286_v21 = vsel %vm2093_vm5, %v2147_v41, %v5394_v35  ;;  %v5396_v39 = vld [vmem:[#allocation21_spill] sm:$0xff] }
 0x5d1   :  { %v4962_v14 = vpop.permute.xlu0 %2216  ;;  %v2292_v41 = vsel %vm2093_vm5, %v4930_v49, %v5396_v39  ;;  %v5410_v39 = vld [vmem:[#allocation31_spill] sm:$0xff] }
 0x5d2   :  { %v2371_v53 = vpop.permute.xlu1 %2370 }
 0x5d3   :  { %v2524_v47 = vsel %vm2352_vm1, %v2371_v53, %v2265_v4 }
 0x5d4   :  { %2620 = vst [vmem:[#allocation2 + $0x58] sm:$0xff] %v2524_v47  ;;  %v5395_v47 = vld [vmem:[#allocation24_spill] sm:$0xff] }
 0x5d5   :  { %v4970_v18 = vpop.permute.xlu0 %2226  ;;  %v2295_v61 = vsel %vm2093_vm5, %v4920_v50, %v5395_v47 }
 0x5d9   :  { %v4972_v33 = vpop.permute.xlu0 %2236 }
 0x5dd   :  { %v4974_v12 = vpop.permute.xlu0 %2246 }
 0x5e1   :  { %v2356_v51 = vpop.permute.xlu0 %2355 }
 0x5e2   :  { %v2515_v10 = vsel %vm2352_vm1, %v2356_v51, %v2256_v52 }
 0x5e3   :  { %2611 = vst [vmem:[#allocation2 + $0x10] sm:$0xff] %v2515_v10 }
 0x5e5   :  { %v2366_v7 = vpop.permute.xlu0 %2365 }
 0x5e6   :  { %v2521_v34 = vsel %vm2352_vm1, %v2366_v7, %v2262_v45  ;;  %v5397_v45 = vld [vmem:[#allocation22_spill] sm:$0xff]  ;;  %v5398_v7 = vld [vmem:[#allocation19_spill] sm:$0xff] }
 0x5e7   :  { %2617 = vst [vmem:[#allocation2 + $0x40] sm:$0xff] %v2521_v34  ;;  %v2301_v50 = vsel %vm2093_vm5, %v4922_v29, %v5397_v45  ;;  %v2298_v49 = vsel %vm2093_vm5, %v4934_v8, %v5398_v7  ;;  %v5412_v45 = vld [vmem:[#allocation66_spill] sm:$0xff] }
 0x5e9   :  { %v2381_v62 = vpop.permute.xlu1 %2380  ;;  %v2376_v60 = vpop.permute.xlu0 %2375 }
 0x5ea   :  { %v2530_v36 = vsel %vm2352_vm1, %v2381_v62, %v2271_v48  ;;  %v2527_v32 = vsel %vm2352_vm1, %v2376_v60, %v2268_v9  ;;  %v5399_v9 = vld [vmem:[#allocation28_spill] sm:$0xff]  ;;  %v5400_v62 = vld [vmem:[#allocation25_spill] sm:$0xff] }
 0x5eb   :  { %2626 = vst [vmem:[#allocation2 + $0x88] sm:$0xff] %v2530_v36  ;;  %2623 = vst [vmem:[#allocation2 + $0x70] sm:$0xff] %v2527_v32  ;;  %v2307_v29 = vsel %vm2093_vm5, %v4924_v0, %v5399_v9  ;;  %v2304_v8 = vsel %vm2093_vm5, %v4938_v44, %v5400_v62  ;;  %v2310_v44 = vsel %vm2093_vm5, %v4942_v58, %v5402_v3 }
 0x5ec   :  { %v2316_v58 = vsel %vm2093_vm5, %v4949_v57, %v5404_v16 }
 0x5ed   :  { %v2391_v28 = vpop.permute.xlu1 %2390  ;;  %v2386_v20 = vpop.permute.xlu0 %2385 }
 0x5ee   :  { %v2536_v19 = vsel %vm2352_vm1, %v2391_v28, %v2277_v27  ;;  %v2533_v2 = vsel %vm2352_vm1, %v2386_v20, %v2274_v1  ;;  %v5401_v27 = vld [vmem:[#allocation26_spill] sm:$0xff] }
 0x5ef   :  { %2632 = vst [vmem:[#allocation2 + $0xb8] sm:$0xff] %v2536_v19  ;;  %2629 = vst [vmem:[#allocation2 + $0xa0] sm:$0xff] %v2533_v2  ;;  %v2313_v0 = vsel %vm2093_vm5, %v4926_v17, %v5401_v27  ;;  %v5403_v2 = vld [vmem:[#allocation32_spill] sm:$0xff] }
 0x5f0   :  { %v2319_v17 = vsel %vm2093_vm5, %v4928_v59, %v5403_v2 }
 0x5f1   :  { %v2401_v38 = vpop.permute.xlu1 %2400  ;;  %v2396_v24 = vpop.permute.xlu0 %2395 }
 0x5f2   :  { %v2542_v46 = vsel %vm2352_vm1, %v2401_v38, %v2283_v15  ;;  %v2539_v26 = vsel %vm2352_vm1, %v2396_v24, %v2280_v55  ;;  %v5405_v24 = vld [vmem:[#allocation30_spill] sm:$0xff] }
 0x5f3   :  { %2638 = vst [vmem:[#allocation2 + $0xe8] sm:$0xff] %v2542_v46  ;;  %2635 = vst [vmem:[#allocation2 + $0xd0] sm:$0xff] %v2539_v26  ;;  %v2325_v59 = vsel %vm2093_vm5, %v4932_v22, %v5405_v24  ;;  %v5406_v46 = vld [vmem:[#allocation27_spill] sm:$0xff] }
 0x5f4   :  { %v2322_v57 = vsel %vm2093_vm5, %v4955_v63, %v5406_v46 }
 0x5f5   :  { %v2411_v56 = vpop.permute.xlu1 %2410  ;;  %v2406_v25 = vpop.permute.xlu0 %2405 }
 0x5f6   :  { %v2548_v4 = vsel %vm2352_vm1, %v2411_v56, %v2289_v5  ;;  %v2545_v53 = vsel %vm2352_vm1, %v2406_v25, %v2286_v21  ;;  %v5407_v21 = vld [vmem:[#allocation53_spill] sm:$0xff] }
 0x5f7   :  { %2644 = vst [vmem:[#allocation2 + $0x118] sm:$0xff] %v2548_v4  ;;  %2641 = vst [vmem:[#allocation2 + $0x100] sm:$0xff] %v2545_v53  ;;  %v2331_v22 = vsel %vm2093_vm5, %v4936_v54, %v5407_v21  ;;  %v5408_v56 = vld [vmem:[#allocation33_spill] sm:$0xff] }
 0x5f8   :  { %v2328_v63 = vsel %vm2093_vm5, %v4962_v14, %v5408_v56  ;;  %v2334_v14 = vsel %vm2093_vm5, %v4970_v18, %v5410_v39  ;;  %v2340_v18 = vsel %vm2093_vm5, %v4972_v33, %v5412_v45 }
 0x5f9   :  { %v2421_v52 = vpop.permute.xlu1 %2420  ;;  %v2416_v51 = vpop.permute.xlu0 %2415 }
 0x5fa   :  { %v2554_v10 = vsel %vm2352_vm1, %v2421_v52, %v2295_v61  ;;  %v2551_v37 = vsel %vm2352_vm1, %v2416_v51, %v2292_v41  ;;  %v5409_v61 = vld [vmem:[#allocation34_spill] sm:$0xff] }
 0x5fb   :  { %2650 = vst [vmem:[#allocation2 + $0x148] sm:$0xff] %v2554_v10  ;;  %2647 = vst [vmem:[#allocation2 + $0x130] sm:$0xff] %v2551_v37  ;;  %v2337_v54 = vsel %vm2093_vm5, %v4940_v31, %v5409_v61  ;;  %v5411_v37 = vld [vmem:[#allocation71_spill] sm:$0xff] }
 0x5fc   :  { %v2343_v31 = vsel %vm2093_vm5, %v4944_v42, %v5411_v37 }
 0x5fd   :  { %v2431_v34 = vpop.permute.xlu1 %2430  ;;  %v2426_v43 = vpop.permute.xlu0 %2425 }
 0x5fe   :  { %v2560_v48 = vsel %vm2352_vm1, %v2431_v34, %v2301_v50  ;;  %v2557_v23 = vsel %vm2352_vm1, %v2426_v43, %v2298_v49  ;;  %v5413_v43 = vld [vmem:[#allocation69_spill] sm:$0xff] }
 0x5ff   :  { %2656 = vst [vmem:[#allocation2 + $0x178] sm:$0xff] %v2560_v48  ;;  %2653 = vst [vmem:[#allocation2 + $0x160] sm:$0xff] %v2557_v23  ;;  %v2349_v42 = vsel %vm2093_vm5, %v4951_v40, %v5413_v43  ;;  %v5414_v48 = vld [vmem:[#allocation48_spill] sm:$0xff] }
 0x600   :  { %v2346_v33 = vsel %vm2093_vm5, %v4974_v12, %v5414_v48 }
 0x601   :  { %v2441_v60 = vpop.permute.xlu1 %2440  ;;  %v2436_v36 = vpop.permute.xlu0 %2435 }
 0x602   :  { %v2566_v32 = vsel %vm2352_vm1, %v2441_v60, %v2307_v29  ;;  %v2563_v30 = vsel %vm2352_vm1, %v2436_v36, %v2304_v8 }
 0x603   :  { %2662 = vst [vmem:[#allocation2 + $0x1a8] sm:$0xff] %v2566_v32  ;;  %2659 = vst [vmem:[#allocation2 + $0x190] sm:$0xff] %v2563_v30 }
 0x605   :  { %v2451_v1 = vpop.permute.xlu1 %2450  ;;  %v2446_v28 = vpop.permute.xlu0 %2445 }
 0x606   :  { %v2572_v20 = vsel %vm2352_vm1, %v2451_v1, %v2313_v0  ;;  %v2569_v19 = vsel %vm2352_vm1, %v2446_v28, %v2310_v44 }
 0x607   :  { %2668 = vst [vmem:[#allocation2 + $0x1d8] sm:$0xff] %v2572_v20  ;;  %2665 = vst [vmem:[#allocation2 + $0x1c0] sm:$0xff] %v2569_v19 }
 0x609   :  { %v2461_v15 = vpop.permute.xlu1 %2460  ;;  %v2456_v11 = vpop.permute.xlu0 %2455 }
 0x60a   :  { %v2578_v55 = vsel %vm2352_vm1, %v2461_v15, %v2319_v17  ;;  %v2575_v38 = vsel %vm2352_vm1, %v2456_v11, %v2316_v58 }
 0x60b   :  { %2674 = vst [vmem:[#allocation2 + $0x208] sm:$0xff] %v2578_v55  ;;  %2671 = vst [vmem:[#allocation2 + $0x1f0] sm:$0xff] %v2575_v38 }
 0x60d   :  { %v2471_v26 = vpop.permute.xlu1 %2470  ;;  %v2466_v6 = vpop.permute.xlu0 %2465 }
 0x60e   :  { %v2584_v5 = vsel %vm2352_vm1, %v2471_v26, %v2325_v59  ;;  %v2581_v35 = vsel %vm2352_vm1, %v2466_v6, %v2322_v57 }
 0x60f   :  { %2680 = vst [vmem:[#allocation2 + $0x238] sm:$0xff] %v2584_v5  ;;  %2677 = vst [vmem:[#allocation2 + $0x220] sm:$0xff] %v2581_v35 }
 0x611   :  { %v2481_v25 = vpop.permute.xlu1 %2480  ;;  %v2476_v4 = vpop.permute.xlu0 %2475 }
 0x612   :  { %v2590_v53 = vsel %vm2352_vm1, %v2481_v25, %v2331_v22  ;;  %v2587_v47 = vsel %vm2352_vm1, %v2476_v4, %v2328_v63 }
 0x613   :  { %2686 = vst [vmem:[#allocation2 + $0x268] sm:$0xff] %v2590_v53  ;;  %2683 = vst [vmem:[#allocation2 + $0x250] sm:$0xff] %v2587_v47 }
 0x615   :  { %v2491_v41 = vpop.permute.xlu1 %2490  ;;  %v2486_v52 = vpop.permute.xlu0 %2485 }
 0x616   :  { %v2596_v51 = vsel %vm2352_vm1, %v2491_v41, %v2337_v54  ;;  %v2593_v10 = vsel %vm2352_vm1, %v2486_v52, %v2334_v14 }
 0x617   :  { %2692 = vst [vmem:[#allocation2 + $0x298] sm:$0xff] %v2596_v51  ;;  %2689 = vst [vmem:[#allocation2 + $0x280] sm:$0xff] %v2593_v10 }
 0x619   :  { %v2501_v50 = vpop.permute.xlu1 %2500  ;;  %v2496_v7 = vpop.permute.xlu0 %2495 }
 0x61a   :  { %v2602_v49 = vsel %vm2352_vm1, %v2501_v50, %v2343_v31  ;;  %v2599_v34 = vsel %vm2352_vm1, %v2496_v7, %v2340_v18 }
 0x61b   :  { %2698 = vst [vmem:[#allocation2 + $0x2c8] sm:$0xff] %v2602_v49  ;;  %2695 = vst [vmem:[#allocation2 + $0x2b0] sm:$0xff] %v2599_v34 }
 0x61d   :  { %v2511_v23 = vpop.permute.xlu1 %2510  ;;  %v2506_v9 = vpop.permute.xlu0 %2505 }
 0x61e   :  { %v2608_v29 = vsel %vm2352_vm1, %v2511_v23, %v2349_v42  ;;  %v2605_v62 = vsel %vm2352_vm1, %v2506_v9, %v2346_v33 }
 0x61f   :  { %2704 = vst [vmem:[#allocation2 + $0x2f8] sm:$0xff] %v2608_v29  ;;  %2701 = vst [vmem:[#allocation2 + $0x2e0] sm:$0xff] %v2605_v62 }
 0x620   :  { %3149 = shalt.err (!%p3146_p4)
}
 0x621   :  { %s3165_s11 = smov 384   ;;  %s3166_s12 = smov 24  }
 0x622   :  { %2716 = dma.vmem_to_hbm [thread:$0]  %s2711_s4, 12288, %s5161_s6, [#allocation3], %s3165_s11, %s3165_s11, %s3166_s12  }
 0x623   :  { %3158 = dma.done.wait [#allocation3], 12288  }
 0x624   :  { %3159 = vsyncadd [#allocation3], 4294955008 }
 0x625   :  { %2720 = vsyncpa [#allocation3], 1 }

</bundles_post_ra>
